<compile_context>
chip_gen: v5e
topology: v5e:2x2
jax: 0.10.0
libtpu: 0.0.40
codegen_flags: <defaults>
</compile_context>

<pallas_src>
import math
import functools

import jax
import jax.numpy as jnp
from jax import lax
from jax.experimental import pallas as pl
from jax.experimental.pallas import tpu as pltpu


# ------------------------------ fused kernel ------------------------------- #

def _fused_decoder_kernel(
    tgt_ref, mem_ref, qpos_ref, kpos_ref,
    ln_g_ref, ln_b_ref,
    ca_w1_ref, ca_b1_ref, ca_w2_ref, ca_b2_ref, ca_w3_ref, ca_b3_ref,
    sa_wqk_ref, sa_bqk_ref, sa_wv_ref, sa_bv_ref, sa_wo_ref, sa_bo_ref,
    ff_w1_ref, ff_b1_ref, ff_w2_ref, ff_b2_ref,
    cls_w_ref,
    tgt_out_ref, cls_out_ref,
    *, num_layers, nheads, topk):
    f32 = jnp.float32
    bf16 = jnp.bfloat16

    tgt = tgt_ref[...].astype(f32)       # (nq, d)
    mem = mem_ref[...].astype(f32)       # (mnp, d)  (loaded as bf16, upcast here)
    qpos = qpos_ref[...].astype(f32)     # (nq, d)
    kpos = kpos_ref[...].astype(f32)     # (mnp, d)

    nq, d = tgt.shape
    mnp = mem.shape[0]
    dh = d // nheads
    inv_sqrt_dh = 1.0 / math.sqrt(dh)

    ln_g = ln_g_ref[...].astype(f32)     # (4, d): norm0, norm1, norm2, norm3
    ln_b = ln_b_ref[...].astype(f32)

    def matmul(x, w_ref, b_ref=None):
        # bf16 MXU operands, f32 accumulation; bias add in f32.
        w = w_ref[...]
        acc = jnp.dot(x.astype(w.dtype), w, preferred_element_type=f32)
        if b_ref is not None:
            acc = acc + b_ref[...].astype(f32)
        return acc

    def layer_norm(x, idx):
        g = ln_g[idx:idx + 1, :]
        b = ln_b[idx:idx + 1, :]
        mu = jnp.mean(x, axis=-1, keepdims=True)
        xc = x - mu
        var = jnp.mean(xc * xc, axis=-1, keepdims=True)   # biased, as torch LN
        return xc * lax.rsqrt(var + 1e-5) * g + b

    def softmax(s):
        s = s - jnp.max(s, axis=-1, keepdims=True)
        e = jnp.exp(s)
        return e * pl.reciprocal(jnp.sum(e, axis=-1, keepdims=True), approx=True)

    def split_heads(x):
        # (n, d) -> (nheads, n, dh) using static lane slices + stack
        # (avoids minor-dim reshapes; built once per projection).
        return jnp.stack([x[:, h * dh:(h + 1) * dh] for h in range(nheads)], axis=0)

    def merge_heads(x):
        # (nheads, n, dh) -> (n, d)
        return jnp.concatenate([x[h] for h in range(nheads)], axis=-1)

    def mha(q3, k3, v3, mask=None):
        # q3:(H,nq,dh) k3/v3:(H,kn,dh), bf16 operands; scores/softmax in f32.
        sc = lax.dot_general(q3, k3, (((2,), (2,)), ((0,), (0,))),
                             preferred_element_type=f32) * inv_sqrt_dh   # (H,nq,kn)
        if mask is not None:
            sc = jnp.where(mask, sc, jnp.float32(-1e9))   # == w*mask + -1e9*(1-mask)
        p = softmax(sc).astype(bf16)
        ctx = lax.dot_general(p, v3, (((2,), (1,)), ((0,), (0,))),
                              preferred_element_type=f32)                # (H,nq,dh)
        return merge_heads(ctx)                                          # (nq, d) f32

    # ---- layer-invariant precompute (weights are shared across layers) ----
    mem_n = (mem * lax.rsqrt(jnp.sum(mem * mem, axis=-1, keepdims=True) + 1e-12)
             ).astype(bf16)                                              # (mnp, d) bf16
    k3_cross = split_heads(matmul(mem + kpos, ca_w2_ref, ca_b2_ref).astype(bf16))
    v3_cross = split_heads(matmul(mem, ca_w3_ref, ca_b3_ref).astype(bf16))

    # ---- norm0 ----
    tgt = layer_norm(tgt, 0)

    def topk_body(_, carry):
        # One cross-lane reduction per iteration (max); exact ties select together.
        s, hit = carry
        mx = jnp.max(s, axis=-1, keepdims=True)
        sel = s >= mx
        hit = jnp.maximum(hit, sel.astype(f32))
        s = jnp.where(sel, jnp.float32(-jnp.inf), s)
        return s, hit

    def layer_body(_, tgt):
        # --- re-attention: per-query top-k memory mask (cosine similarity) ---
        tgt_n = (tgt * lax.rsqrt(jnp.sum(tgt * tgt, axis=-1, keepdims=True) + 1e-12)
                 ).astype(bf16)
        sim = lax.dot_general(tgt_n, mem_n, (((1,), (1,)), ((), ())),
                              preferred_element_type=f32)                # (nq, mnp)
        _, hit = lax.fori_loop(0, topk, topk_body, (sim, jnp.zeros_like(sim)))
        mask = (hit > 0.5)[None, :, :]                                   # (1, nq, mnp)

        # --- cross attention (K/V projections hoisted above the layer loop) ---
        # TODO(synk): for DETR-scale mnp (~8K) tile sim/top-k/cross-attn over nq blocks
        # to keep (nq, mnp) intermediates within v7x's 64 MiB VMEM.
        q3 = split_heads(matmul(tgt + qpos, ca_w1_ref, ca_b1_ref).astype(bf16))
        tgt = layer_norm(tgt + mha(q3, k3_cross, v3_cross, mask=mask), 1)  # dropout1=id

        # --- self attention (fused Wq|Wk projection on the shared input) ---
        qk = matmul(tgt + qpos, sa_wqk_ref, sa_bqk_ref)                  # (nq, 2d)
        q3 = split_heads(qk[:, :d].astype(bf16))
        k3 = split_heads(qk[:, d:].astype(bf16))
        v3 = split_heads(matmul(tgt, sa_wv_ref, sa_bv_ref).astype(bf16))
        attn = mha(q3, k3, v3)
        tgt = layer_norm(tgt + matmul(attn, sa_wo_ref, sa_bo_ref), 2)    # dropout2=id

        # --- feed forward: linear2(gelu(linear1(tgt))) ---
        h1 = matmul(tgt, ff_w1_ref, ff_b1_ref)
        # tanh-approx GELU (F.gelu is exact erf; |err| ~3e-4, erf lowering not guaranteed)
        h1 = 0.5 * h1 * (1.0 + jnp.tanh(0.7978845608028654 *
                                        (h1 + 0.044715 * h1 * h1 * h1)))
        tgt = layer_norm(tgt + matmul(h1, ff_w2_ref, ff_b2_ref), 3)      # dropout3=id
        return tgt

    tgt = lax.fori_loop(0, num_layers, layer_body, tgt)

    # --- BatchNorm1d (eval running stats; scale folded into cls_w) + classifier ---
    # TODO(synk): train-mode BatchNorm (batch statistics / running-stat updates) not modeled.
    cls = matmul(tgt, cls_w_ref)                                          # (nq, ncp)
    tgt_out_ref[...] = tgt.astype(tgt_out_ref.dtype)
    cls_out_ref[...] = cls.astype(cls_out_ref.dtype)


# ------------------------------ wrapper / glue ------------------------------ #

def redetr_decoder_forward(p, tgt, memory, query_pos, key_pos, *,
                           num_layers, nheads, topk, num_classes):
    bs, nq, d = tgt.shape
    mnp = memory.shape[1]
    dff = p["ff_w1"].shape[1]

    wdt = jnp.bfloat16                                  # MXU operand dtype
    def w(x): return x.astype(wdt)
    def b(x): return x.reshape(1, -1).astype(jnp.float32)

    ln_g = jnp.stack([p["norm0_g"], p["norm1_g"], p["norm2_g"], p["norm3_g"]]).astype(jnp.float32)
    ln_b = jnp.stack([p["norm0_b"], p["norm1_b"], p["norm2_b"], p["norm3_b"]]).astype(jnp.float32)
    sa_wqk = jnp.concatenate([p["sa_wq"], p["sa_wk"]], axis=1)   # (d, 2d)
    sa_bqk = jnp.concatenate([p["sa_bq"], p["sa_bk"]])           # (2d,)

    # Lane-dense classifier output: pad classes up to a multiple of 128 and fold the
    # eval-mode BatchNorm scale 1/sqrt(1+eps) into the (bias-free) classifier weight.
    ncp = max(128, ((num_classes + 127) // 128) * 128)
    bn_scale = 1.0 / math.sqrt(1.0 + 1e-5)
    cls_w = jnp.zeros((d, ncp), jnp.float32).at[:, :num_classes].set(
        p["cls_w"].astype(jnp.float32) * bn_scale).astype(wdt)

    # bf16 DMA for the large (mnp, d) operands: halves HBM traffic + VMEM buffers.
    memory_b = memory.astype(jnp.bfloat16)
    key_pos_b = key_pos.astype(jnp.bfloat16)

    sq = pl.Squeezed()
    act_spec = lambda n: pl.BlockSpec((sq, n, d), lambda bb: (bb, 0, 0))
    full2d = lambda shp: pl.BlockSpec(shp, lambda bb: (0, 0))    # same block every step

    operands = [
        tgt, memory_b, query_pos, key_pos_b,
        ln_g, ln_b,
        w(p["ca_w1"]), b(p["ca_b1"]), w(p["ca_w2"]), b(p["ca_b2"]),
        w(p["ca_w3"]), b(p["ca_b3"]),
        w(sa_wqk), b(sa_bqk), w(p["sa_wv"]), b(p["sa_bv"]),
        w(p["sa_wo"]), b(p["sa_bo"]),
        w(p["ff_w1"]), b(p["ff_b1"]), w(p["ff_w2"]), b(p["ff_b2"]),
        cls_w,
    ]
    in_specs = [
        act_spec(nq), act_spec(mnp), act_spec(nq), act_spec(mnp),
        full2d((4, d)), full2d((4, d)),
        full2d((d, d)), full2d((1, d)), full2d((d, d)), full2d((1, d)),
        full2d((d, d)), full2d((1, d)),
        full2d((d, 2 * d)), full2d((1, 2 * d)), full2d((d, d)), full2d((1, d)),
        full2d((d, d)), full2d((1, d)),
        full2d((d, dff)), full2d((1, dff)), full2d((dff, d)), full2d((1, d)),
        full2d((d, ncp)),
    ]
    out_shape = (jax.ShapeDtypeStruct((bs, nq, d), jnp.float32),
                 jax.ShapeDtypeStruct((bs, nq, ncp), jnp.float32))
    out_specs = (pl.BlockSpec((sq, nq, d), lambda bb: (bb, 0, 0)),
                 pl.BlockSpec((sq, nq, ncp), lambda bb: (bb, 0, 0)))

    # Explicit VMEM budget: double-buffered activation blocks + weights + in-kernel
    # live intermediates (with headroom), capped to ~85% of physical VMEM.
    act_in = nq * d * 4 * 2 + mnp * d * 2 * 2
    act_out = nq * d * 4 + nq * ncp * 4
    weight_bytes = sum(int(a.size) * a.dtype.itemsize for a in operands[4:])
    inter = (5 * mnp * d * 4 + 4 * nq * mnp * 4
             + 2 * nheads * nq * mnp * 4 + 8 * nq * max(d, dff, 2 * d, ncp) * 4)
    est = 2 * (act_in + act_out) + 2 * weight_bytes + inter
    try:
        cap = int(0.85 * pltpu.get_tpu_info().vmem_capacity_bytes)
    except Exception:
        cap = 56 << 20                       # safe on v5e/v6e (128 MiB) and v7x (64 MiB)
    vmem_limit = int(min(max(int(1.5 * est) + (4 << 20), 32 << 20), cap))

    kernel = functools.partial(_fused_decoder_kernel,
                               num_layers=num_layers, nheads=nheads, topk=topk)
    out_tgt, out_cls = pl.pallas_call(
        kernel,
        out_shape=out_shape,
        grid=(bs,),
        in_specs=in_specs,
        out_specs=out_specs,
        compiler_params=pltpu.CompilerParams(
            dimension_semantics=("parallel",),   # batch axis -> both v7x TCs (bs even)
            vmem_limit_bytes=vmem_limit),
    )(*operands)
    return out_tgt, out_cls[..., :num_classes]


# ------------------------------ parameters ---------------------------------- #

def init_params(key, dim, dff, num_classes, num_patch):
    """Deterministic synthetic init matching the module's parameter shapes.
    The PyTorch module deep-copies one DetrDecoderLayer / BN / classifier, so every
    layer starts with identical weights -> a single parameter set is reused."""
    keys = jax.random.split(key, 12)

    def lin(k, fan_in, fan_out, std=None):
        std = math.sqrt(2.0 / fan_in) if std is None else std
        return (jax.random.normal(k, (fan_in, fan_out), jnp.float32) * std,
                jnp.zeros((fan_out,), jnp.float32))

    p = {"norm0_g": jnp.ones((dim,), jnp.float32),
         "norm0_b": jnp.zeros((dim,), jnp.float32)}
    p["ca_w1"], p["ca_b1"] = lin(keys[0], dim, dim)
    p["ca_w2"], p["ca_b2"] = lin(keys[1], dim, dim)
    p["ca_w3"], p["ca_b3"] = lin(keys[2], dim, dim)
    p["sa_wq"], p["sa_bq"] = lin(keys[3], dim, dim)
    p["sa_wk"], p["sa_bk"] = lin(keys[4], dim, dim)
    p["sa_wv"], p["sa_bv"] = lin(keys[5], dim, dim)
    p["sa_wo"], p["sa_bo"] = lin(keys[6], dim, dim)
    p["ff_w1"], p["ff_b1"] = lin(keys[7], dim, dff)
    p["ff_w2"], p["ff_b2"] = lin(keys[8], dff, dim)
    for n in ("norm1", "norm2", "norm3"):
        p[n + "_g"] = jnp.ones((dim,), jnp.float32)
        p[n + "_b"] = jnp.zeros((dim,), jnp.float32)
    # Classifier: Linear(dim, num_classes, bias=False), std=0.001
    p["cls_w"] = jax.random.normal(keys[9], (dim, num_classes), jnp.float32) * 0.001
    # cls_tgt: present in __init__ but unused in forward()
    p["cls_tgt_w"], p["cls_tgt_b"] = lin(keys[10], dim, num_patch)
    return p


# ---------------------------------- main ------------------------------------ #

if __name__ == "__main__":
    # Small but TPU-friendly shapes (d = one lane width, mnp = one lane width).
    bs, nq, mnp, d = 2, 8, 128, 128
    nheads, dff, num_classes, topk, num_layers = 4, 256, 10, 4, 2

    root = jax.random.PRNGKey(0)
    kt, km, kqp, kkp, kp = jax.random.split(root, 5)
    tgt = jax.random.normal(kt, (bs, nq, d), jnp.float32)
    memory = jax.random.normal(km, (bs, mnp, d), jnp.float32)
    query_pos = jax.random.normal(kqp, (bs, nq, d), jnp.float32)
    key_pos = jax.random.normal(kkp, (bs, mnp, d), jnp.float32)

    params = init_params(kp, d, dff, num_classes, num_patch=nq)

    out_tgt, out_cls = redetr_decoder_forward(
        params, tgt, memory, query_pos, key_pos,
        num_layers=num_layers, nheads=nheads, topk=topk, num_classes=num_classes)
    jax.block_until_ready((out_tgt, out_cls))

    assert out_tgt.shape == (bs, nq, d)
    assert out_cls.shape == (bs, nq, num_classes)
    assert bool(jnp.all(jnp.isfinite(out_tgt))) and bool(jnp.all(jnp.isfinite(out_cls)))
    print("KERNEL_OK")
</pallas_src>

<mosaic_0001>
module attributes {stable_mosaic.version = 11 : i64} {
  func.func @_fused_decoder_kernel(%arg0: i32, %arg1: memref<1x8x128xf32, #tpu.memory_space<vmem>>, %arg2: memref<1x128x128xbf16, #tpu.memory_space<vmem>>, %arg3: memref<1x8x128xf32, #tpu.memory_space<vmem>>, %arg4: memref<1x128x128xbf16, #tpu.memory_space<vmem>>, %arg5: memref<4x128xf32, #tpu.memory_space<vmem>>, %arg6: memref<4x128xf32, #tpu.memory_space<vmem>>, %arg7: memref<128x128xbf16, #tpu.memory_space<vmem>>, %arg8: memref<1x128xf32, #tpu.memory_space<vmem>>, %arg9: memref<128x128xbf16, #tpu.memory_space<vmem>>, %arg10: memref<1x128xf32, #tpu.memory_space<vmem>>, %arg11: memref<128x128xbf16, #tpu.memory_space<vmem>>, %arg12: memref<1x128xf32, #tpu.memory_space<vmem>>, %arg13: memref<128x256xbf16, #tpu.memory_space<vmem>>, %arg14: memref<1x256xf32, #tpu.memory_space<vmem>>, %arg15: memref<128x128xbf16, #tpu.memory_space<vmem>>, %arg16: memref<1x128xf32, #tpu.memory_space<vmem>>, %arg17: memref<128x128xbf16, #tpu.memory_space<vmem>>, %arg18: memref<1x128xf32, #tpu.memory_space<vmem>>, %arg19: memref<128x256xbf16, #tpu.memory_space<vmem>>, %arg20: memref<1x256xf32, #tpu.memory_space<vmem>>, %arg21: memref<256x128xbf16, #tpu.memory_space<vmem>>, %arg22: memref<1x128xf32, #tpu.memory_space<vmem>>, %arg23: memref<128x128xbf16, #tpu.memory_space<vmem>>, %arg24: memref<1x8x128xf32, #tpu.memory_space<vmem>>, %arg25: memref<1x8x128xf32, #tpu.memory_space<vmem>>) attributes {dimension_semantics = [#tpu.dimension_semantics<parallel>], iteration_bounds = array<i64: 2>, scalar_prefetch = 0 : i64, scratch_operands = 0 : i64, tpu.core_type = #tpu.core_type<tc>, window_params = [{transform_indices = @transform_0, window_bounds = array<i64: 1, 8, 128>}, {transform_indices = @transform_1, window_bounds = array<i64: 1, 128, 128>}, {transform_indices = @transform_2, window_bounds = array<i64: 1, 8, 128>}, {transform_indices = @transform_3, window_bounds = array<i64: 1, 128, 128>}, {pipeline_mode = #tpu.pipeline_mode<synchronous>, transform_indices = @transform_4, window_bounds = array<i64: 4, 128>}, {pipeline_mode = #tpu.pipeline_mode<synchronous>, transform_indices = @transform_5, window_bounds = array<i64: 4, 128>}, {pipeline_mode = #tpu.pipeline_mode<synchronous>, transform_indices = @transform_6, window_bounds = array<i64: 128, 128>}, {pipeline_mode = #tpu.pipeline_mode<synchronous>, transform_indices = @transform_7, window_bounds = array<i64: 1, 128>}, {pipeline_mode = #tpu.pipeline_mode<synchronous>, transform_indices = @transform_8, window_bounds = array<i64: 128, 128>}, {pipeline_mode = #tpu.pipeline_mode<synchronous>, transform_indices = @transform_9, window_bounds = array<i64: 1, 128>}, {pipeline_mode = #tpu.pipeline_mode<synchronous>, transform_indices = @transform_10, window_bounds = array<i64: 128, 128>}, {pipeline_mode = #tpu.pipeline_mode<synchronous>, transform_indices = @transform_11, window_bounds = array<i64: 1, 128>}, {pipeline_mode = #tpu.pipeline_mode<synchronous>, transform_indices = @transform_12, window_bounds = array<i64: 128, 256>}, {pipeline_mode = #tpu.pipeline_mode<synchronous>, transform_indices = @transform_13, window_bounds = array<i64: 1, 256>}, {pipeline_mode = #tpu.pipeline_mode<synchronous>, transform_indices = @transform_14, window_bounds = array<i64: 128, 128>}, {pipeline_mode = #tpu.pipeline_mode<synchronous>, transform_indices = @transform_15, window_bounds = array<i64: 1, 128>}, {pipeline_mode = #tpu.pipeline_mode<synchronous>, transform_indices = @transform_16, window_bounds = array<i64: 128, 128>}, {pipeline_mode = #tpu.pipeline_mode<synchronous>, transform_indices = @transform_17, window_bounds = array<i64: 1, 128>}, {pipeline_mode = #tpu.pipeline_mode<synchronous>, transform_indices = @transform_18, window_bounds = array<i64: 128, 256>}, {pipeline_mode = #tpu.pipeline_mode<synchronous>, transform_indices = @transform_19, window_bounds = array<i64: 1, 256>}, {pipeline_mode = #tpu.pipeline_mode<synchronous>, transform_indices = @transform_20, window_bounds = array<i64: 256, 128>}, {pipeline_mode = #tpu.pipeline_mode<synchronous>, transform_indices = @transform_21, window_bounds = array<i64: 1, 128>}, {pipeline_mode = #tpu.pipeline_mode<synchronous>, transform_indices = @transform_22, window_bounds = array<i64: 128, 128>}, {transform_indices = @transform_23, window_bounds = array<i64: 1, 8, 128>}, {transform_indices = @transform_24, window_bounds = array<i64: 1, 8, 128>}]} {
    %c0 = arith.constant 0 : index
    %c0_0 = arith.constant 0 : index
    %c0_1 = arith.constant 0 : index
    %0 = vector.load %arg1[%c0, %c0_0, %c0_1] : memref<1x8x128xf32, #tpu.memory_space<vmem>>, vector<1x8x128xf32>
    %1 = vector.shape_cast %0 : vector<1x8x128xf32> to vector<8x128xf32>
    %c0_2 = arith.constant 0 : index
    %c0_3 = arith.constant 0 : index
    %c0_4 = arith.constant 0 : index
    %2 = vector.load %arg2[%c0_2, %c0_3, %c0_4] : memref<1x128x128xbf16, #tpu.memory_space<vmem>>, vector<1x128x128xbf16>
    %3 = vector.shape_cast %2 : vector<1x128x128xbf16> to vector<128x128xbf16>
    %4 = arith.extf %3 : vector<128x128xbf16> to vector<128x128xf32>
    %c0_5 = arith.constant 0 : index
    %c0_6 = arith.constant 0 : index
    %c0_7 = arith.constant 0 : index
    %5 = vector.load %arg3[%c0_5, %c0_6, %c0_7] : memref<1x8x128xf32, #tpu.memory_space<vmem>>, vector<1x8x128xf32>
    %6 = vector.shape_cast %5 : vector<1x8x128xf32> to vector<8x128xf32>
    %c0_8 = arith.constant 0 : index
    %c0_9 = arith.constant 0 : index
    %c0_10 = arith.constant 0 : index
    %7 = vector.load %arg4[%c0_8, %c0_9, %c0_10] : memref<1x128x128xbf16, #tpu.memory_space<vmem>>, vector<1x128x128xbf16>
    %8 = vector.shape_cast %7 : vector<1x128x128xbf16> to vector<128x128xbf16>
    %9 = arith.extf %8 : vector<128x128xbf16> to vector<128x128xf32>
    %c0_11 = arith.constant 0 : index
    %c0_12 = arith.constant 0 : index
    %10 = vector.load %arg5[%c0_11, %c0_12] : memref<4x128xf32, #tpu.memory_space<vmem>>, vector<4x128xf32>
    %c0_13 = arith.constant 0 : index
    %c0_14 = arith.constant 0 : index
    %11 = vector.load %arg6[%c0_13, %c0_14] : memref<4x128xf32, #tpu.memory_space<vmem>>, vector<4x128xf32>
    %12 = arith.mulf %4, %4 : vector<128x128xf32>
    %cst = arith.constant dense<0.000000e+00> : vector<128xf32>
    %13 = vector.multi_reduction <add>, %12, %cst [1] : vector<128x128xf32> to vector<128xf32>
    %14 = vector.shape_cast %13 : vector<128xf32> to vector<128x1xf32>
    %cst_15 = arith.constant 9.99999996E-13 : f32
    %15 = vector.broadcast %cst_15 : f32 to vector<128x1xf32>
    %16 = arith.addf %14, %15 : vector<128x1xf32>
    %17 = math.rsqrt %16 : vector<128x1xf32>
    %18 = vector.broadcast %17 : vector<128x1xf32> to vector<128x128xf32>
    %19 = arith.mulf %4, %18 : vector<128x128xf32>
    %20 = arith.truncf %19 : vector<128x128xf32> to vector<128x128xbf16>
    %21 = arith.addf %4, %9 : vector<128x128xf32>
    %c0_16 = arith.constant 0 : index
    %c0_17 = arith.constant 0 : index
    %22 = vector.load %arg9[%c0_16, %c0_17] : memref<128x128xbf16, #tpu.memory_space<vmem>>, vector<128x128xbf16>
    %23 = arith.truncf %21 : vector<128x128xf32> to vector<128x128xbf16>
    %cst_18 = arith.constant dense<0.000000e+00> : vector<128x128xf32>
    %24 = tpu.matmul %23, %22, %cst_18 {dimension_numbers = #tpu.dot_dimension_numbers<[1], [0], [0], [1], [0, 0, 1, 1], [], []>} : vector<128x128xbf16>, vector<128x128xbf16>, vector<128x128xf32> -> vector<128x128xf32>
    %c0_19 = arith.constant 0 : index
    %c0_20 = arith.constant 0 : index
    %25 = vector.load %arg10[%c0_19, %c0_20] : memref<1x128xf32, #tpu.memory_space<vmem>>, vector<1x128xf32>
    %26 = vector.broadcast %25 : vector<1x128xf32> to vector<128x128xf32>
    %27 = arith.addf %24, %26 : vector<128x128xf32>
    %28 = arith.truncf %27 : vector<128x128xf32> to vector<128x128xbf16>
    %29 = vector.extract_strided_slice %28 {offsets = [0, 0], sizes = [128, 32], strides = [1, 1]} : vector<128x128xbf16> to vector<128x32xbf16>
    %30 = vector.extract_strided_slice %28 {offsets = [0, 32], sizes = [128, 32], strides = [1, 1]} : vector<128x128xbf16> to vector<128x32xbf16>
    %31 = vector.extract_strided_slice %28 {offsets = [0, 64], sizes = [128, 32], strides = [1, 1]} : vector<128x128xbf16> to vector<128x32xbf16>
    %32 = vector.extract_strided_slice %28 {offsets = [0, 96], sizes = [128, 32], strides = [1, 1]} : vector<128x128xbf16> to vector<128x32xbf16>
    %33 = vector.shape_cast %29 : vector<128x32xbf16> to vector<1x128x32xbf16>
    %34 = vector.shape_cast %30 : vector<128x32xbf16> to vector<1x128x32xbf16>
    %35 = vector.shape_cast %31 : vector<128x32xbf16> to vector<1x128x32xbf16>
    %36 = vector.shape_cast %32 : vector<128x32xbf16> to vector<1x128x32xbf16>
    %37 = tpu.concatenate %33, %34, %35, %36 in 0 : vector<1x128x32xbf16>, vector<1x128x32xbf16>, vector<1x128x32xbf16>, vector<1x128x32xbf16> -> vector<4x128x32xbf16>
    %c0_21 = arith.constant 0 : index
    %c0_22 = arith.constant 0 : index
    %38 = vector.load %arg11[%c0_21, %c0_22] : memref<128x128xbf16, #tpu.memory_space<vmem>>, vector<128x128xbf16>
    %39 = arith.truncf %4 : vector<128x128xf32> to vector<128x128xbf16>
    %cst_23 = arith.constant dense<0.000000e+00> : vector<128x128xf32>
    %40 = tpu.matmul %39, %38, %cst_23 {dimension_numbers = #tpu.dot_dimension_numbers<[1], [0], [0], [1], [0, 0, 1, 1], [], []>} : vector<128x128xbf16>, vector<128x128xbf16>, vector<128x128xf32> -> vector<128x128xf32>
    %c0_24 = arith.constant 0 : index
    %c0_25 = arith.constant 0 : index
    %41 = vector.load %arg12[%c0_24, %c0_25] : memref<1x128xf32, #tpu.memory_space<vmem>>, vector<1x128xf32>
    %42 = vector.broadcast %41 : vector<1x128xf32> to vector<128x128xf32>
    %43 = arith.addf %40, %42 : vector<128x128xf32>
    %44 = arith.truncf %43 : vector<128x128xf32> to vector<128x128xbf16>
    %45 = vector.extract_strided_slice %44 {offsets = [0, 0], sizes = [128, 32], strides = [1, 1]} : vector<128x128xbf16> to vector<128x32xbf16>
    %46 = vector.extract_strided_slice %44 {offsets = [0, 32], sizes = [128, 32], strides = [1, 1]} : vector<128x128xbf16> to vector<128x32xbf16>
    %47 = vector.extract_strided_slice %44 {offsets = [0, 64], sizes = [128, 32], strides = [1, 1]} : vector<128x128xbf16> to vector<128x32xbf16>
    %48 = vector.extract_strided_slice %44 {offsets = [0, 96], sizes = [128, 32], strides = [1, 1]} : vector<128x128xbf16> to vector<128x32xbf16>
    %49 = vector.shape_cast %45 : vector<128x32xbf16> to vector<1x128x32xbf16>
    %50 = vector.shape_cast %46 : vector<128x32xbf16> to vector<1x128x32xbf16>
    %51 = vector.shape_cast %47 : vector<128x32xbf16> to vector<1x128x32xbf16>
    %52 = vector.shape_cast %48 : vector<128x32xbf16> to vector<1x128x32xbf16>
    %53 = tpu.concatenate %49, %50, %51, %52 in 0 : vector<1x128x32xbf16>, vector<1x128x32xbf16>, vector<1x128x32xbf16>, vector<1x128x32xbf16> -> vector<4x128x32xbf16>
    %54 = vector.extract_strided_slice %10 {offsets = [0, 0], sizes = [1, 128], strides = [1, 1]} : vector<4x128xf32> to vector<1x128xf32>
    %55 = vector.extract_strided_slice %11 {offsets = [0, 0], sizes = [1, 128], strides = [1, 1]} : vector<4x128xf32> to vector<1x128xf32>
    %cst_26 = arith.constant dense<0.000000e+00> : vector<8xf32>
    %56 = vector.multi_reduction <add>, %1, %cst_26 [1] : vector<8x128xf32> to vector<8xf32>
    %57 = vector.shape_cast %56 : vector<8xf32> to vector<8x1xf32>
    %cst_27 = arith.constant 1.280000e+02 : f32
    %58 = vector.broadcast %cst_27 : f32 to vector<8x1xf32>
    %59 = arith.divf %57, %58 : vector<8x1xf32>
    %60 = vector.broadcast %59 : vector<8x1xf32> to vector<8x128xf32>
    %61 = arith.subf %1, %60 : vector<8x128xf32>
    %62 = arith.mulf %61, %61 : vector<8x128xf32>
    %cst_28 = arith.constant dense<0.000000e+00> : vector<8xf32>
    %63 = vector.multi_reduction <add>, %62, %cst_28 [1] : vector<8x128xf32> to vector<8xf32>
    %64 = vector.shape_cast %63 : vector<8xf32> to vector<8x1xf32>
    %cst_29 = arith.constant 1.280000e+02 : f32
    %65 = vector.broadcast %cst_29 : f32 to vector<8x1xf32>
    %66 = arith.divf %64, %65 : vector<8x1xf32>
    %cst_30 = arith.constant 9.99999974E-6 : f32
    %67 = vector.broadcast %cst_30 : f32 to vector<8x1xf32>
    %68 = arith.addf %66, %67 : vector<8x1xf32>
    %69 = math.rsqrt %68 : vector<8x1xf32>
    %70 = vector.broadcast %69 : vector<8x1xf32> to vector<8x128xf32>
    %71 = arith.mulf %61, %70 : vector<8x128xf32>
    %72 = vector.broadcast %54 : vector<1x128xf32> to vector<8x128xf32>
    %73 = arith.mulf %71, %72 : vector<8x128xf32>
    %74 = vector.broadcast %55 : vector<1x128xf32> to vector<8x128xf32>
    %75 = arith.addf %73, %74 : vector<8x128xf32>
    %c0_i32 = arith.constant 0 : i32
    %c2_i32 = arith.constant 2 : i32
    %76 = arith.addi %c0_i32, %c2_i32 : i32
    %c1_i32 = arith.constant 1 : i32
    %77 = scf.for %arg26 = %c0_i32 to %76 step %c1_i32 iter_args(%arg27 = %75) -> (vector<8x128xf32>)  : i32 {
      %87 = arith.mulf %arg27, %arg27 : vector<8x128xf32>
      %cst_40 = arith.constant dense<0.000000e+00> : vector<8xf32>
      %88 = vector.multi_reduction <add>, %87, %cst_40 [1] : vector<8x128xf32> to vector<8xf32>
      %89 = vector.shape_cast %88 : vector<8xf32> to vector<8x1xf32>
      %cst_41 = arith.constant 9.99999996E-13 : f32
      %90 = vector.broadcast %cst_41 : f32 to vector<8x1xf32>
      %91 = arith.addf %89, %90 : vector<8x1xf32>
      %92 = math.rsqrt %91 : vector<8x1xf32>
      %93 = vector.broadcast %92 : vector<8x1xf32> to vector<8x128xf32>
      %94 = arith.mulf %arg27, %93 : vector<8x128xf32>
      %95 = arith.truncf %94 : vector<8x128xf32> to vector<8x128xbf16>
      %cst_42 = arith.constant dense<0.000000e+00> : vector<8x128xf32>
      %96 = tpu.matmul %95, %20, %cst_42 {dimension_numbers = #tpu.dot_dimension_numbers<[1], [1], [0], [0], [0, 0, 1, 0], [], []>} : vector<8x128xbf16>, vector<128x128xbf16>, vector<8x128xf32> -> vector<8x128xf32>
      %cst_43 = arith.constant 0.000000e+00 : f32
      %97 = vector.broadcast %cst_43 : f32 to vector<8x128xf32>
      %c0_i32_44 = arith.constant 0 : i32
      %c4_i32 = arith.constant 4 : i32
      %98 = arith.addi %c0_i32_44, %c4_i32 : i32
      %c1_i32_45 = arith.constant 1 : i32
      %99:2 = scf.for %arg28 = %c0_i32_44 to %98 step %c1_i32_45 iter_args(%arg29 = %96, %arg30 = %97) -> (vector<8x128xf32>, vector<8x128xf32>)  : i32 {
        %cst_107 = arith.constant dense<0xFF800000> : vector<8xf32>
        %317 = vector.multi_reduction <maximumf>, %arg29, %cst_107 [1] : vector<8x128xf32> to vector<8xf32>
        %318 = vector.shape_cast %317 : vector<8xf32> to vector<8x1xf32>
        %319 = vector.broadcast %318 : vector<8x1xf32> to vector<8x128xf32>
        %320 = arith.cmpf oge, %arg29, %319 : vector<8x128xf32>
        %321 = arith.extui %320 : vector<8x128xi1> to vector<8x128xi32>
        %322 = arith.sitofp %321 : vector<8x128xi32> to vector<8x128xf32>
        %323 = arith.maximumf %arg30, %322 : vector<8x128xf32>
        %cst_108 = arith.constant 0xFF800000 : f32
        %324 = vector.broadcast %cst_108 : f32 to vector<8x128xf32>
        %325 = arith.select %320, %324, %arg29 : vector<8x128xi1>, vector<8x128xf32>
        scf.yield %325, %323 : vector<8x128xf32>, vector<8x128xf32>
      }
      %cst_46 = arith.constant 5.000000e-01 : f32
      %100 = vector.broadcast %cst_46 : f32 to vector<8x128xf32>
      %101 = arith.cmpf ogt, %99#1, %100 : vector<8x128xf32>
      %102 = vector.shape_cast %101 : vector<8x128xi1> to vector<1x8x128xi1>
      %103 = arith.addf %arg27, %6 : vector<8x128xf32>
      %c0_47 = arith.constant 0 : index
      %c0_48 = arith.constant 0 : index
      %104 = vector.load %arg7[%c0_47, %c0_48] : memref<128x128xbf16, #tpu.memory_space<vmem>>, vector<128x128xbf16>
      %105 = arith.truncf %103 : vector<8x128xf32> to vector<8x128xbf16>
      %cst_49 = arith.constant dense<0.000000e+00> : vector<8x128xf32>
      %106 = tpu.matmul %105, %104, %cst_49 {dimension_numbers = #tpu.dot_dimension_numbers<[1], [0], [0], [1], [0, 0, 1, 1], [], []>} : vector<8x128xbf16>, vector<128x128xbf16>, vector<8x128xf32> -> vector<8x128xf32>
      %c0_50 = arith.constant 0 : index
      %c0_51 = arith.constant 0 : index
      %107 = vector.load %arg8[%c0_50, %c0_51] : memref<1x128xf32, #tpu.memory_space<vmem>>, vector<1x128xf32>
      %108 = vector.broadcast %107 : vector<1x128xf32> to vector<8x128xf32>
      %109 = arith.addf %106, %108 : vector<8x128xf32>
      %110 = arith.truncf %109 : vector<8x128xf32> to vector<8x128xbf16>
      %111 = vector.extract_strided_slice %110 {offsets = [0, 0], sizes = [8, 32], strides = [1, 1]} : vector<8x128xbf16> to vector<8x32xbf16>
      %112 = vector.extract_strided_slice %110 {offsets = [0, 32], sizes = [8, 32], strides = [1, 1]} : vector<8x128xbf16> to vector<8x32xbf16>
      %113 = vector.extract_strided_slice %110 {offsets = [0, 64], sizes = [8, 32], strides = [1, 1]} : vector<8x128xbf16> to vector<8x32xbf16>
      %114 = vector.extract_strided_slice %110 {offsets = [0, 96], sizes = [8, 32], strides = [1, 1]} : vector<8x128xbf16> to vector<8x32xbf16>
      %115 = vector.shape_cast %111 : vector<8x32xbf16> to vector<1x8x32xbf16>
      %116 = vector.shape_cast %112 : vector<8x32xbf16> to vector<1x8x32xbf16>
      %117 = vector.shape_cast %113 : vector<8x32xbf16> to vector<1x8x32xbf16>
      %118 = vector.shape_cast %114 : vector<8x32xbf16> to vector<1x8x32xbf16>
      %119 = tpu.concatenate %115, %116, %117, %118 in 0 : vector<1x8x32xbf16>, vector<1x8x32xbf16>, vector<1x8x32xbf16>, vector<1x8x32xbf16> -> vector<4x8x32xbf16>
      %cst_52 = arith.constant dense<0.000000e+00> : vector<4x8x128xf32>
      %120 = tpu.matmul %119, %37, %cst_52 {dimension_numbers = #tpu.dot_dimension_numbers<[2], [2], [1], [1], [0, 0, 0, 1, 1, 1], [0], [0]>} : vector<4x8x32xbf16>, vector<4x128x32xbf16>, vector<4x8x128xf32> -> vector<4x8x128xf32>
      %cst_53 = arith.constant 0.176776692 : f32
      %121 = vector.broadcast %cst_53 : f32 to vector<4x8x128xf32>
      %122 = arith.mulf %120, %121 : vector<4x8x128xf32>
      %cst_54 = arith.constant -1.000000e+09 : f32
      %123 = vector.shape_cast %102 : vector<1x8x128xi1> to vector<1x8x128xi1>
      %124 = vector.broadcast %123 : vector<1x8x128xi1> to vector<4x8x128xi1>
      %125 = vector.broadcast %cst_54 : f32 to vector<4x8x128xf32>
      %126 = arith.select %124, %122, %125 : vector<4x8x128xi1>, vector<4x8x128xf32>
      %cst_55 = arith.constant dense<0xFF800000> : vector<4x8xf32>
      %127 = vector.multi_reduction <maximumf>, %126, %cst_55 [2] : vector<4x8x128xf32> to vector<4x8xf32>
      %128 = vector.shape_cast %127 : vector<4x8xf32> to vector<4x8x1xf32>
      %129 = vector.broadcast %128 : vector<4x8x1xf32> to vector<4x8x128xf32>
      %130 = arith.subf %126, %129 : vector<4x8x128xf32>
      %131 = math.exp %130 : vector<4x8x128xf32>
      %cst_56 = arith.constant dense<0.000000e+00> : vector<4x8xf32>
      %132 = vector.multi_reduction <add>, %131, %cst_56 [2] : vector<4x8x128xf32> to vector<4x8xf32>
      %133 = vector.shape_cast %132 : vector<4x8xf32> to vector<4x8x1xf32>
      %134 = tpu.reciprocal %133 {approx = true} : vector<4x8x1xf32> -> vector<4x8x1xf32>
      %135 = vector.broadcast %134 : vector<4x8x1xf32> to vector<4x8x128xf32>
      %136 = arith.mulf %131, %135 : vector<4x8x128xf32>
      %137 = arith.truncf %136 : vector<4x8x128xf32> to vector<4x8x128xbf16>
      %cst_57 = arith.constant dense<0.000000e+00> : vector<4x8x32xf32>
      %138 = tpu.matmul %137, %53, %cst_57 {dimension_numbers = #tpu.dot_dimension_numbers<[2], [1], [1], [2], [0, 0, 0, 1, 1, 2], [0], [0]>} : vector<4x8x128xbf16>, vector<4x128x32xbf16>, vector<4x8x32xf32> -> vector<4x8x32xf32>
      %139 = vector.extract_strided_slice %138 {offsets = [0, 0, 0], sizes = [1, 8, 32], strides = [1, 1, 1]} : vector<4x8x32xf32> to vector<1x8x32xf32>
      %140 = vector.shape_cast %139 : vector<1x8x32xf32> to vector<8x32xf32>
      %141 = vector.extract_strided_slice %138 {offsets = [1, 0, 0], sizes = [1, 8, 32], strides = [1, 1, 1]} : vector<4x8x32xf32> to vector<1x8x32xf32>
      %142 = vector.shape_cast %141 : vector<1x8x32xf32> to vector<8x32xf32>
      %143 = vector.extract_strided_slice %138 {offsets = [2, 0, 0], sizes = [1, 8, 32], strides = [1, 1, 1]} : vector<4x8x32xf32> to vector<1x8x32xf32>
      %144 = vector.shape_cast %143 : vector<1x8x32xf32> to vector<8x32xf32>
      %145 = vector.extract_strided_slice %138 {offsets = [3, 0, 0], sizes = [1, 8, 32], strides = [1, 1, 1]} : vector<4x8x32xf32> to vector<1x8x32xf32>
      %146 = vector.shape_cast %145 : vector<1x8x32xf32> to vector<8x32xf32>
      %147 = tpu.concatenate %140, %142, %144, %146 in 1 : vector<8x32xf32>, vector<8x32xf32>, vector<8x32xf32>, vector<8x32xf32> -> vector<8x128xf32>
      %148 = arith.addf %arg27, %147 : vector<8x128xf32>
      %149 = vector.extract_strided_slice %10 {offsets = [1, 0], sizes = [1, 128], strides = [1, 1]} : vector<4x128xf32> to vector<1x128xf32>
      %150 = vector.extract_strided_slice %11 {offsets = [1, 0], sizes = [1, 128], strides = [1, 1]} : vector<4x128xf32> to vector<1x128xf32>
      %cst_58 = arith.constant dense<0.000000e+00> : vector<8xf32>
      %151 = vector.multi_reduction <add>, %148, %cst_58 [1] : vector<8x128xf32> to vector<8xf32>
      %152 = vector.shape_cast %151 : vector<8xf32> to vector<8x1xf32>
      %cst_59 = arith.constant 1.280000e+02 : f32
      %153 = vector.broadcast %cst_59 : f32 to vector<8x1xf32>
      %154 = arith.divf %152, %153 : vector<8x1xf32>
      %155 = vector.broadcast %154 : vector<8x1xf32> to vector<8x128xf32>
      %156 = arith.subf %148, %155 : vector<8x128xf32>
      %157 = arith.mulf %156, %156 : vector<8x128xf32>
      %cst_60 = arith.constant dense<0.000000e+00> : vector<8xf32>
      %158 = vector.multi_reduction <add>, %157, %cst_60 [1] : vector<8x128xf32> to vector<8xf32>
      %159 = vector.shape_cast %158 : vector<8xf32> to vector<8x1xf32>
      %cst_61 = arith.constant 1.280000e+02 : f32
      %160 = vector.broadcast %cst_61 : f32 to vector<8x1xf32>
      %161 = arith.divf %159, %160 : vector<8x1xf32>
      %cst_62 = arith.constant 9.99999974E-6 : f32
      %162 = vector.broadcast %cst_62 : f32 to vector<8x1xf32>
      %163 = arith.addf %161, %162 : vector<8x1xf32>
      %164 = math.rsqrt %163 : vector<8x1xf32>
      %165 = vector.broadcast %164 : vector<8x1xf32> to vector<8x128xf32>
      %166 = arith.mulf %156, %165 : vector<8x128xf32>
      %167 = vector.broadcast %149 : vector<1x128xf32> to vector<8x128xf32>
      %168 = arith.mulf %166, %167 : vector<8x128xf32>
      %169 = vector.broadcast %150 : vector<1x128xf32> to vector<8x128xf32>
      %170 = arith.addf %168, %169 : vector<8x128xf32>
      %171 = arith.addf %170, %6 : vector<8x128xf32>
      %c0_63 = arith.constant 0 : index
      %c0_64 = arith.constant 0 : index
      %172 = vector.load %arg13[%c0_63, %c0_64] : memref<128x256xbf16, #tpu.memory_space<vmem>>, vector<128x256xbf16>
      %173 = arith.truncf %171 : vector<8x128xf32> to vector<8x128xbf16>
      %cst_65 = arith.constant dense<0.000000e+00> : vector<8x256xf32>
      %174 = tpu.matmul %173, %172, %cst_65 {dimension_numbers = #tpu.dot_dimension_numbers<[1], [0], [0], [1], [0, 0, 1, 1], [], []>} : vector<8x128xbf16>, vector<128x256xbf16>, vector<8x256xf32> -> vector<8x256xf32>
      %c0_66 = arith.constant 0 : index
      %c0_67 = arith.constant 0 : index
      %175 = vector.load %arg14[%c0_66, %c0_67] : memref<1x256xf32, #tpu.memory_space<vmem>>, vector<1x256xf32>
      %176 = vector.broadcast %175 : vector<1x256xf32> to vector<8x256xf32>
      %177 = arith.addf %174, %176 : vector<8x256xf32>
      %178 = vector.extract_strided_slice %177 {offsets = [0, 0], sizes = [8, 128], strides = [1, 1]} : vector<8x256xf32> to vector<8x128xf32>
      %179 = arith.truncf %178 : vector<8x128xf32> to vector<8x128xbf16>
      %180 = vector.extract_strided_slice %179 {offsets = [0, 0], sizes = [8, 32], strides = [1, 1]} : vector<8x128xbf16> to vector<8x32xbf16>
      %181 = vector.extract_strided_slice %179 {offsets = [0, 32], sizes = [8, 32], strides = [1, 1]} : vector<8x128xbf16> to vector<8x32xbf16>
      %182 = vector.extract_strided_slice %179 {offsets = [0, 64], sizes = [8, 32], strides = [1, 1]} : vector<8x128xbf16> to vector<8x32xbf16>
      %183 = vector.extract_strided_slice %179 {offsets = [0, 96], sizes = [8, 32], strides = [1, 1]} : vector<8x128xbf16> to vector<8x32xbf16>
      %184 = vector.shape_cast %180 : vector<8x32xbf16> to vector<1x8x32xbf16>
      %185 = vector.shape_cast %181 : vector<8x32xbf16> to vector<1x8x32xbf16>
      %186 = vector.shape_cast %182 : vector<8x32xbf16> to vector<1x8x32xbf16>
      %187 = vector.shape_cast %183 : vector<8x32xbf16> to vector<1x8x32xbf16>
      %188 = tpu.concatenate %184, %185, %186, %187 in 0 : vector<1x8x32xbf16>, vector<1x8x32xbf16>, vector<1x8x32xbf16>, vector<1x8x32xbf16> -> vector<4x8x32xbf16>
      %189 = vector.extract_strided_slice %177 {offsets = [0, 128], sizes = [8, 128], strides = [1, 1]} : vector<8x256xf32> to vector<8x128xf32>
      %190 = arith.truncf %189 : vector<8x128xf32> to vector<8x128xbf16>
      %191 = vector.extract_strided_slice %190 {offsets = [0, 0], sizes = [8, 32], strides = [1, 1]} : vector<8x128xbf16> to vector<8x32xbf16>
      %192 = vector.extract_strided_slice %190 {offsets = [0, 32], sizes = [8, 32], strides = [1, 1]} : vector<8x128xbf16> to vector<8x32xbf16>
      %193 = vector.extract_strided_slice %190 {offsets = [0, 64], sizes = [8, 32], strides = [1, 1]} : vector<8x128xbf16> to vector<8x32xbf16>
      %194 = vector.extract_strided_slice %190 {offsets = [0, 96], sizes = [8, 32], strides = [1, 1]} : vector<8x128xbf16> to vector<8x32xbf16>
      %195 = vector.shape_cast %191 : vector<8x32xbf16> to vector<1x8x32xbf16>
      %196 = vector.shape_cast %192 : vector<8x32xbf16> to vector<1x8x32xbf16>
      %197 = vector.shape_cast %193 : vector<8x32xbf16> to vector<1x8x32xbf16>
      %198 = vector.shape_cast %194 : vector<8x32xbf16> to vector<1x8x32xbf16>
      %199 = tpu.concatenate %195, %196, %197, %198 in 0 : vector<1x8x32xbf16>, vector<1x8x32xbf16>, vector<1x8x32xbf16>, vector<1x8x32xbf16> -> vector<4x8x32xbf16>
      %c0_68 = arith.constant 0 : index
      %c0_69 = arith.constant 0 : index
      %200 = vector.load %arg15[%c0_68, %c0_69] : memref<128x128xbf16, #tpu.memory_space<vmem>>, vector<128x128xbf16>
      %201 = arith.truncf %170 : vector<8x128xf32> to vector<8x128xbf16>
      %cst_70 = arith.constant dense<0.000000e+00> : vector<8x128xf32>
      %202 = tpu.matmul %201, %200, %cst_70 {dimension_numbers = #tpu.dot_dimension_numbers<[1], [0], [0], [1], [0, 0, 1, 1], [], []>} : vector<8x128xbf16>, vector<128x128xbf16>, vector<8x128xf32> -> vector<8x128xf32>
      %c0_71 = arith.constant 0 : index
      %c0_72 = arith.constant 0 : index
      %203 = vector.load %arg16[%c0_71, %c0_72] : memref<1x128xf32, #tpu.memory_space<vmem>>, vector<1x128xf32>
      %204 = vector.broadcast %203 : vector<1x128xf32> to vector<8x128xf32>
      %205 = arith.addf %202, %204 : vector<8x128xf32>
      %206 = arith.truncf %205 : vector<8x128xf32> to vector<8x128xbf16>
      %207 = vector.extract_strided_slice %206 {offsets = [0, 0], sizes = [8, 32], strides = [1, 1]} : vector<8x128xbf16> to vector<8x32xbf16>
      %208 = vector.extract_strided_slice %206 {offsets = [0, 32], sizes = [8, 32], strides = [1, 1]} : vector<8x128xbf16> to vector<8x32xbf16>
      %209 = vector.extract_strided_slice %206 {offsets = [0, 64], sizes = [8, 32], strides = [1, 1]} : vector<8x128xbf16> to vector<8x32xbf16>
      %210 = vector.extract_strided_slice %206 {offsets = [0, 96], sizes = [8, 32], strides = [1, 1]} : vector<8x128xbf16> to vector<8x32xbf16>
      %211 = vector.shape_cast %207 : vector<8x32xbf16> to vector<1x8x32xbf16>
      %212 = vector.shape_cast %208 : vector<8x32xbf16> to vector<1x8x32xbf16>
      %213 = vector.shape_cast %209 : vector<8x32xbf16> to vector<1x8x32xbf16>
      %214 = vector.shape_cast %210 : vector<8x32xbf16> to vector<1x8x32xbf16>
      %215 = tpu.concatenate %211, %212, %213, %214 in 0 : vector<1x8x32xbf16>, vector<1x8x32xbf16>, vector<1x8x32xbf16>, vector<1x8x32xbf16> -> vector<4x8x32xbf16>
      %cst_73 = arith.constant dense<0.000000e+00> : vector<4x8x8xf32>
      %216 = tpu.matmul %188, %199, %cst_73 {dimension_numbers = #tpu.dot_dimension_numbers<[2], [2], [1], [1], [0, 0, 0, 1, 1, 1], [0], [0]>} : vector<4x8x32xbf16>, vector<4x8x32xbf16>, vector<4x8x8xf32> -> vector<4x8x8xf32>
      %cst_74 = arith.constant 0.176776692 : f32
      %217 = vector.broadcast %cst_74 : f32 to vector<4x8x8xf32>
      %218 = arith.mulf %216, %217 : vector<4x8x8xf32>
      %cst_75 = arith.constant dense<0xFF800000> : vector<4x8xf32>
      %219 = vector.multi_reduction <maximumf>, %218, %cst_75 [2] : vector<4x8x8xf32> to vector<4x8xf32>
      %220 = vector.shape_cast %219 : vector<4x8xf32> to vector<4x8x1xf32>
      %221 = vector.broadcast %220 : vector<4x8x1xf32> to vector<4x8x8xf32>
      %222 = arith.subf %218, %221 : vector<4x8x8xf32>
      %223 = math.exp %222 : vector<4x8x8xf32>
      %cst_76 = arith.constant dense<0.000000e+00> : vector<4x8xf32>
      %224 = vector.multi_reduction <add>, %223, %cst_76 [2] : vector<4x8x8xf32> to vector<4x8xf32>
      %225 = vector.shape_cast %224 : vector<4x8xf32> to vector<4x8x1xf32>
      %226 = tpu.reciprocal %225 {approx = true} : vector<4x8x1xf32> -> vector<4x8x1xf32>
      %227 = vector.broadcast %226 : vector<4x8x1xf32> to vector<4x8x8xf32>
      %228 = arith.mulf %223, %227 : vector<4x8x8xf32>
      %229 = arith.truncf %228 : vector<4x8x8xf32> to vector<4x8x8xbf16>
      %cst_77 = arith.constant dense<0.000000e+00> : vector<4x8x32xf32>
      %230 = tpu.matmul %229, %215, %cst_77 {dimension_numbers = #tpu.dot_dimension_numbers<[2], [1], [1], [2], [0, 0, 0, 1, 1, 2], [0], [0]>} : vector<4x8x8xbf16>, vector<4x8x32xbf16>, vector<4x8x32xf32> -> vector<4x8x32xf32>
      %231 = vector.extract_strided_slice %230 {offsets = [0, 0, 0], sizes = [1, 8, 32], strides = [1, 1, 1]} : vector<4x8x32xf32> to vector<1x8x32xf32>
      %232 = vector.shape_cast %231 : vector<1x8x32xf32> to vector<8x32xf32>
      %233 = vector.extract_strided_slice %230 {offsets = [1, 0, 0], sizes = [1, 8, 32], strides = [1, 1, 1]} : vector<4x8x32xf32> to vector<1x8x32xf32>
      %234 = vector.shape_cast %233 : vector<1x8x32xf32> to vector<8x32xf32>
      %235 = vector.extract_strided_slice %230 {offsets = [2, 0, 0], sizes = [1, 8, 32], strides = [1, 1, 1]} : vector<4x8x32xf32> to vector<1x8x32xf32>
      %236 = vector.shape_cast %235 : vector<1x8x32xf32> to vector<8x32xf32>
      %237 = vector.extract_strided_slice %230 {offsets = [3, 0, 0], sizes = [1, 8, 32], strides = [1, 1, 1]} : vector<4x8x32xf32> to vector<1x8x32xf32>
      %238 = vector.shape_cast %237 : vector<1x8x32xf32> to vector<8x32xf32>
      %239 = tpu.concatenate %232, %234, %236, %238 in 1 : vector<8x32xf32>, vector<8x32xf32>, vector<8x32xf32>, vector<8x32xf32> -> vector<8x128xf32>
      %c0_78 = arith.constant 0 : index
      %c0_79 = arith.constant 0 : index
      %240 = vector.load %arg17[%c0_78, %c0_79] : memref<128x128xbf16, #tpu.memory_space<vmem>>, vector<128x128xbf16>
      %241 = arith.truncf %239 : vector<8x128xf32> to vector<8x128xbf16>
      %cst_80 = arith.constant dense<0.000000e+00> : vector<8x128xf32>
      %242 = tpu.matmul %241, %240, %cst_80 {dimension_numbers = #tpu.dot_dimension_numbers<[1], [0], [0], [1], [0, 0, 1, 1], [], []>} : vector<8x128xbf16>, vector<128x128xbf16>, vector<8x128xf32> -> vector<8x128xf32>
      %c0_81 = arith.constant 0 : index
      %c0_82 = arith.constant 0 : index
      %243 = vector.load %arg18[%c0_81, %c0_82] : memref<1x128xf32, #tpu.memory_space<vmem>>, vector<1x128xf32>
      %244 = vector.broadcast %243 : vector<1x128xf32> to vector<8x128xf32>
      %245 = arith.addf %242, %244 : vector<8x128xf32>
      %246 = arith.addf %170, %245 : vector<8x128xf32>
      %247 = vector.extract_strided_slice %10 {offsets = [2, 0], sizes = [1, 128], strides = [1, 1]} : vector<4x128xf32> to vector<1x128xf32>
      %248 = vector.extract_strided_slice %11 {offsets = [2, 0], sizes = [1, 128], strides = [1, 1]} : vector<4x128xf32> to vector<1x128xf32>
      %cst_83 = arith.constant dense<0.000000e+00> : vector<8xf32>
      %249 = vector.multi_reduction <add>, %246, %cst_83 [1] : vector<8x128xf32> to vector<8xf32>
      %250 = vector.shape_cast %249 : vector<8xf32> to vector<8x1xf32>
      %cst_84 = arith.constant 1.280000e+02 : f32
      %251 = vector.broadcast %cst_84 : f32 to vector<8x1xf32>
      %252 = arith.divf %250, %251 : vector<8x1xf32>
      %253 = vector.broadcast %252 : vector<8x1xf32> to vector<8x128xf32>
      %254 = arith.subf %246, %253 : vector<8x128xf32>
      %255 = arith.mulf %254, %254 : vector<8x128xf32>
      %cst_85 = arith.constant dense<0.000000e+00> : vector<8xf32>
      %256 = vector.multi_reduction <add>, %255, %cst_85 [1] : vector<8x128xf32> to vector<8xf32>
      %257 = vector.shape_cast %256 : vector<8xf32> to vector<8x1xf32>
      %cst_86 = arith.constant 1.280000e+02 : f32
      %258 = vector.broadcast %cst_86 : f32 to vector<8x1xf32>
      %259 = arith.divf %257, %258 : vector<8x1xf32>
      %cst_87 = arith.constant 9.99999974E-6 : f32
      %260 = vector.broadcast %cst_87 : f32 to vector<8x1xf32>
      %261 = arith.addf %259, %260 : vector<8x1xf32>
      %262 = math.rsqrt %261 : vector<8x1xf32>
      %263 = vector.broadcast %262 : vector<8x1xf32> to vector<8x128xf32>
      %264 = arith.mulf %254, %263 : vector<8x128xf32>
      %265 = vector.broadcast %247 : vector<1x128xf32> to vector<8x128xf32>
      %266 = arith.mulf %264, %265 : vector<8x128xf32>
      %267 = vector.broadcast %248 : vector<1x128xf32> to vector<8x128xf32>
      %268 = arith.addf %266, %267 : vector<8x128xf32>
      %c0_88 = arith.constant 0 : index
      %c0_89 = arith.constant 0 : index
      %269 = vector.load %arg19[%c0_88, %c0_89] : memref<128x256xbf16, #tpu.memory_space<vmem>>, vector<128x256xbf16>
      %270 = arith.truncf %268 : vector<8x128xf32> to vector<8x128xbf16>
      %cst_90 = arith.constant dense<0.000000e+00> : vector<8x256xf32>
      %271 = tpu.matmul %270, %269, %cst_90 {dimension_numbers = #tpu.dot_dimension_numbers<[1], [0], [0], [1], [0, 0, 1, 1], [], []>} : vector<8x128xbf16>, vector<128x256xbf16>, vector<8x256xf32> -> vector<8x256xf32>
      %c0_91 = arith.constant 0 : index
      %c0_92 = arith.constant 0 : index
      %272 = vector.load %arg20[%c0_91, %c0_92] : memref<1x256xf32, #tpu.memory_space<vmem>>, vector<1x256xf32>
      %273 = vector.broadcast %272 : vector<1x256xf32> to vector<8x256xf32>
      %274 = arith.addf %271, %273 : vector<8x256xf32>
      %cst_93 = arith.constant 5.000000e-01 : f32
      %275 = vector.broadcast %cst_93 : f32 to vector<8x256xf32>
      %276 = arith.mulf %275, %274 : vector<8x256xf32>
      %cst_94 = arith.constant 4.471500e-02 : f32
      %277 = vector.broadcast %cst_94 : f32 to vector<8x256xf32>
      %278 = arith.mulf %277, %274 : vector<8x256xf32>
      %279 = arith.mulf %278, %274 : vector<8x256xf32>
      %280 = arith.mulf %279, %274 : vector<8x256xf32>
      %281 = arith.addf %274, %280 : vector<8x256xf32>
      %cst_95 = arith.constant 0.797884583 : f32
      %282 = vector.broadcast %cst_95 : f32 to vector<8x256xf32>
      %283 = arith.mulf %282, %281 : vector<8x256xf32>
      %284 = math.tanh %283 : vector<8x256xf32>
      %cst_96 = arith.constant 1.000000e+00 : f32
      %285 = vector.broadcast %cst_96 : f32 to vector<8x256xf32>
      %286 = arith.addf %285, %284 : vector<8x256xf32>
      %287 = arith.mulf %276, %286 : vector<8x256xf32>
      %c0_97 = arith.constant 0 : index
      %c0_98 = arith.constant 0 : index
      %288 = vector.load %arg21[%c0_97, %c0_98] : memref<256x128xbf16, #tpu.memory_space<vmem>>, vector<256x128xbf16>
      %289 = arith.truncf %287 : vector<8x256xf32> to vector<8x256xbf16>
      %cst_99 = arith.constant dense<0.000000e+00> : vector<8x128xf32>
      %290 = tpu.matmul %289, %288, %cst_99 {dimension_numbers = #tpu.dot_dimension_numbers<[1], [0], [0], [1], [0, 0, 1, 1], [], []>} : vector<8x256xbf16>, vector<256x128xbf16>, vector<8x128xf32> -> vector<8x128xf32>
      %c0_100 = arith.constant 0 : index
      %c0_101 = arith.constant 0 : index
      %291 = vector.load %arg22[%c0_100, %c0_101] : memref<1x128xf32, #tpu.memory_space<vmem>>, vector<1x128xf32>
      %292 = vector.broadcast %291 : vector<1x128xf32> to vector<8x128xf32>
      %293 = arith.addf %290, %292 : vector<8x128xf32>
      %294 = arith.addf %268, %293 : vector<8x128xf32>
      %295 = vector.extract_strided_slice %10 {offsets = [3, 0], sizes = [1, 128], strides = [1, 1]} : vector<4x128xf32> to vector<1x128xf32>
      %296 = vector.extract_strided_slice %11 {offsets = [3, 0], sizes = [1, 128], strides = [1, 1]} : vector<4x128xf32> to vector<1x128xf32>
      %cst_102 = arith.constant dense<0.000000e+00> : vector<8xf32>
      %297 = vector.multi_reduction <add>, %294, %cst_102 [1] : vector<8x128xf32> to vector<8xf32>
      %298 = vector.shape_cast %297 : vector<8xf32> to vector<8x1xf32>
      %cst_103 = arith.constant 1.280000e+02 : f32
      %299 = vector.broadcast %cst_103 : f32 to vector<8x1xf32>
      %300 = arith.divf %298, %299 : vector<8x1xf32>
      %301 = vector.broadcast %300 : vector<8x1xf32> to vector<8x128xf32>
      %302 = arith.subf %294, %301 : vector<8x128xf32>
      %303 = arith.mulf %302, %302 : vector<8x128xf32>
      %cst_104 = arith.constant dense<0.000000e+00> : vector<8xf32>
      %304 = vector.multi_reduction <add>, %303, %cst_104 [1] : vector<8x128xf32> to vector<8xf32>
      %305 = vector.shape_cast %304 : vector<8xf32> to vector<8x1xf32>
      %cst_105 = arith.constant 1.280000e+02 : f32
      %306 = vector.broadcast %cst_105 : f32 to vector<8x1xf32>
      %307 = arith.divf %305, %306 : vector<8x1xf32>
      %cst_106 = arith.constant 9.99999974E-6 : f32
      %308 = vector.broadcast %cst_106 : f32 to vector<8x1xf32>
      %309 = arith.addf %307, %308 : vector<8x1xf32>
      %310 = math.rsqrt %309 : vector<8x1xf32>
      %311 = vector.broadcast %310 : vector<8x1xf32> to vector<8x128xf32>
      %312 = arith.mulf %302, %311 : vector<8x128xf32>
      %313 = vector.broadcast %295 : vector<1x128xf32> to vector<8x128xf32>
      %314 = arith.mulf %312, %313 : vector<8x128xf32>
      %315 = vector.broadcast %296 : vector<1x128xf32> to vector<8x128xf32>
      %316 = arith.addf %314, %315 : vector<8x128xf32>
      scf.yield %316 : vector<8x128xf32>
    }
    %c0_31 = arith.constant 0 : index
    %c0_32 = arith.constant 0 : index
    %78 = vector.load %arg23[%c0_31, %c0_32] : memref<128x128xbf16, #tpu.memory_space<vmem>>, vector<128x128xbf16>
    %79 = arith.truncf %77 : vector<8x128xf32> to vector<8x128xbf16>
    %cst_33 = arith.constant dense<0.000000e+00> : vector<8x128xf32>
    %80 = tpu.matmul %79, %78, %cst_33 {dimension_numbers = #tpu.dot_dimension_numbers<[1], [0], [0], [1], [0, 0, 1, 1], [], []>} : vector<8x128xbf16>, vector<128x128xbf16>, vector<8x128xf32> -> vector<8x128xf32>
    %c0_34 = arith.constant 0 : index
    %c0_35 = arith.constant 0 : index
    %c0_36 = arith.constant 0 : index
    %81 = vector.load %arg24[%c0_34, %c0_35, %c0_36] : memref<1x8x128xf32, #tpu.memory_space<vmem>>, vector<1x8x128xf32>
    %82 = vector.shape_cast %81 : vector<1x8x128xf32> to vector<8x128xf32>
    %83 = vector.shape_cast %77 : vector<8x128xf32> to vector<1x8x128xf32>
    tpu.vector_store %arg24[%c0_34, %c0_35, %c0_36], %83 {strides = array<i32>} : memref<1x8x128xf32, #tpu.memory_space<vmem>>, vector<1x8x128xf32>,
    %c0_37 = arith.constant 0 : index
    %c0_38 = arith.constant 0 : index
    %c0_39 = arith.constant 0 : index
    %84 = vector.load %arg25[%c0_37, %c0_38, %c0_39] : memref<1x8x128xf32, #tpu.memory_space<vmem>>, vector<1x8x128xf32>
    %85 = vector.shape_cast %84 : vector<1x8x128xf32> to vector<8x128xf32>
    %86 = vector.shape_cast %80 : vector<8x128xf32> to vector<1x8x128xf32>
    tpu.vector_store %arg25[%c0_37, %c0_38, %c0_39], %86 {strides = array<i32>} : memref<1x8x128xf32, #tpu.memory_space<vmem>>, vector<1x8x128xf32>,
    return
  }
  func.func @transform_0(%arg0: i32) -> (i32, i32, i32) {
    %c0_i32 = arith.constant 0 : i32
    %c0_i32_0 = arith.constant 0 : i32
    %c0_i32_1 = arith.constant 0 : i32
    return %arg0, %c0_i32, %c0_i32_0 : i32, i32, i32
  }
  func.func @transform_1(%arg0: i32) -> (i32, i32, i32) {
    %c0_i32 = arith.constant 0 : i32
    %c0_i32_0 = arith.constant 0 : i32
    %c0_i32_1 = arith.constant 0 : i32
    return %arg0, %c0_i32, %c0_i32_0 : i32, i32, i32
  }
  func.func @transform_2(%arg0: i32) -> (i32, i32, i32) {
    %c0_i32 = arith.constant 0 : i32
    %c0_i32_0 = arith.constant 0 : i32
    %c0_i32_1 = arith.constant 0 : i32
    return %arg0, %c0_i32, %c0_i32_0 : i32, i32, i32
  }
  func.func @transform_3(%arg0: i32) -> (i32, i32, i32) {
    %c0_i32 = arith.constant 0 : i32
    %c0_i32_0 = arith.constant 0 : i32
    %c0_i32_1 = arith.constant 0 : i32
    return %arg0, %c0_i32, %c0_i32_0 : i32, i32, i32
  }
  func.func @transform_4(%arg0: i32) -> (i32, i32) {
    %c0_i32 = arith.constant 0 : i32
    %c0_i32_0 = arith.constant 0 : i32
    %c0_i32_1 = arith.constant 0 : i32
    return %c0_i32, %c0_i32_0 : i32, i32
  }
  func.func @transform_5(%arg0: i32) -> (i32, i32) {
    %c0_i32 = arith.constant 0 : i32
    %c0_i32_0 = arith.constant 0 : i32
    %c0_i32_1 = arith.constant 0 : i32
    return %c0_i32, %c0_i32_0 : i32, i32
  }
  func.func @transform_6(%arg0: i32) -> (i32, i32) {
    %c0_i32 = arith.constant 0 : i32
    %c0_i32_0 = arith.constant 0 : i32
    %c0_i32_1 = arith.constant 0 : i32
    return %c0_i32, %c0_i32_0 : i32, i32
  }
  func.func @transform_7(%arg0: i32) -> (i32, i32) {
    %c0_i32 = arith.constant 0 : i32
    %c0_i32_0 = arith.constant 0 : i32
    %c0_i32_1 = arith.constant 0 : i32
    return %c0_i32, %c0_i32_0 : i32, i32
  }
  func.func @transform_8(%arg0: i32) -> (i32, i32) {
    %c0_i32 = arith.constant 0 : i32
    %c0_i32_0 = arith.constant 0 : i32
    %c0_i32_1 = arith.constant 0 : i32
    return %c0_i32, %c0_i32_0 : i32, i32
  }
  func.func @transform_9(%arg0: i32) -> (i32, i32) {
    %c0_i32 = arith.constant 0 : i32
    %c0_i32_0 = arith.constant 0 : i32
    %c0_i32_1 = arith.constant 0 : i32
    return %c0_i32, %c0_i32_0 : i32, i32
  }
  func.func @transform_10(%arg0: i32) -> (i32, i32) {
    %c0_i32 = arith.constant 0 : i32
    %c0_i32_0 = arith.constant 0 : i32
    %c0_i32_1 = arith.constant 0 : i32
    return %c0_i32, %c0_i32_0 : i32, i32
  }
  func.func @transform_11(%arg0: i32) -> (i32, i32) {
    %c0_i32 = arith.constant 0 : i32
    %c0_i32_0 = arith.constant 0 : i32
    %c0_i32_1 = arith.constant 0 : i32
    return %c0_i32, %c0_i32_0 : i32, i32
  }
  func.func @transform_12(%arg0: i32) -> (i32, i32) {
    %c0_i32 = arith.constant 0 : i32
    %c0_i32_0 = arith.constant 0 : i32
    %c0_i32_1 = arith.constant 0 : i32
    return %c0_i32, %c0_i32_0 : i32, i32
  }
  func.func @transform_13(%arg0: i32) -> (i32, i32) {
    %c0_i32 = arith.constant 0 : i32
    %c0_i32_0 = arith.constant 0 : i32
    %c0_i32_1 = arith.constant 0 : i32
    return %c0_i32, %c0_i32_0 : i32, i32
  }
  func.func @transform_14(%arg0: i32) -> (i32, i32) {
    %c0_i32 = arith.constant 0 : i32
    %c0_i32_0 = arith.constant 0 : i32
    %c0_i32_1 = arith.constant 0 : i32
    return %c0_i32, %c0_i32_0 : i32, i32
  }
  func.func @transform_15(%arg0: i32) -> (i32, i32) {
    %c0_i32 = arith.constant 0 : i32
    %c0_i32_0 = arith.constant 0 : i32
    %c0_i32_1 = arith.constant 0 : i32
    return %c0_i32, %c0_i32_0 : i32, i32
  }
  func.func @transform_16(%arg0: i32) -> (i32, i32) {
    %c0_i32 = arith.constant 0 : i32
    %c0_i32_0 = arith.constant 0 : i32
    %c0_i32_1 = arith.constant 0 : i32
    return %c0_i32, %c0_i32_0 : i32, i32
  }
  func.func @transform_17(%arg0: i32) -> (i32, i32) {
    %c0_i32 = arith.constant 0 : i32
    %c0_i32_0 = arith.constant 0 : i32
    %c0_i32_1 = arith.constant 0 : i32
    return %c0_i32, %c0_i32_0 : i32, i32
  }
  func.func @transform_18(%arg0: i32) -> (i32, i32) {
    %c0_i32 = arith.constant 0 : i32
    %c0_i32_0 = arith.constant 0 : i32
    %c0_i32_1 = arith.constant 0 : i32
    return %c0_i32, %c0_i32_0 : i32, i32
  }
  func.func @transform_19(%arg0: i32) -> (i32, i32) {
    %c0_i32 = arith.constant 0 : i32
    %c0_i32_0 = arith.constant 0 : i32
    %c0_i32_1 = arith.constant 0 : i32
    return %c0_i32, %c0_i32_0 : i32, i32
  }
  func.func @transform_20(%arg0: i32) -> (i32, i32) {
    %c0_i32 = arith.constant 0 : i32
    %c0_i32_0 = arith.constant 0 : i32
    %c0_i32_1 = arith.constant 0 : i32
    return %c0_i32, %c0_i32_0 : i32, i32
  }
  func.func @transform_21(%arg0: i32) -> (i32, i32) {
    %c0_i32 = arith.constant 0 : i32
    %c0_i32_0 = arith.constant 0 : i32
    %c0_i32_1 = arith.constant 0 : i32
    return %c0_i32, %c0_i32_0 : i32, i32
  }
  func.func @transform_22(%arg0: i32) -> (i32, i32) {
    %c0_i32 = arith.constant 0 : i32
    %c0_i32_0 = arith.constant 0 : i32
    %c0_i32_1 = arith.constant 0 : i32
    return %c0_i32, %c0_i32_0 : i32, i32
  }
  func.func @transform_23(%arg0: i32) -> (i32, i32, i32) {
    %c0_i32 = arith.constant 0 : i32
    %c0_i32_0 = arith.constant 0 : i32
    %c0_i32_1 = arith.constant 0 : i32
    return %arg0, %c0_i32, %c0_i32_0 : i32, i32, i32
  }
  func.func @transform_24(%arg0: i32) -> (i32, i32, i32) {
    %c0_i32 = arith.constant 0 : i32
    %c0_i32_0 = arith.constant 0 : i32
    %c0_i32_1 = arith.constant 0 : i32
    return %arg0, %c0_i32, %c0_i32_0 : i32, i32, i32
  }
}

</mosaic_0001>

<bundles_post_ra>
// kernel: tpu_custom_call.1
= control target key start
LH: loop header
LB: loop body
LE: loop exit
PB: predicated region body
PF: predicated region fallthrough
CT: control target
= control target key end

     0   :  { %s7415_s0 = inlined_call_operand.hbm [shape: f32[2,8,128], index: 0, kind: input, shape index: {}]   ;;  %s7416_s1 = inlined_call_operand.hbm [shape: bf16[2,128,128], index: 1, kind: input, shape index: {}]   ;;  %s7417_s2 = inlined_call_operand.hbm [shape: f32[2,8,128], index: 2, kind: input, shape index: {}]   ;;  %s7418_s3 = inlined_call_operand.hbm [shape: bf16[2,128,128], index: 3, kind: input, shape index: {}]   ;;  %s7419_s4 = inlined_call_operand.hbm [shape: f32[4,128], index: 4, kind: input, shape index: {}]   ;;  %s7420_s5 = inlined_call_operand.vmem [shape: f32[4,128], index: 5, kind: input, shape index: {}]   ;;  %s7421_s6 = inlined_call_operand.hbm [shape: bf16[128,128], index: 6, kind: input, shape index: {}]   ;;  %s7422_s7 = inlined_call_operand.hbm [shape: f32[1,128], index: 7, kind: input, shape index: {}]   ;;  %s7423_s8 = inlined_call_operand.hbm [shape: bf16[128,128], index: 8, kind: input, shape index: {}]   ;;  %s7424_s9 = inlined_call_operand.hbm [shape: f32[1,128], index: 9, kind: input, shape index: {}]   ;;  %s7425_s10 = inlined_call_operand.hbm [shape: bf16[128,128], index: 10, kind: input, shape index: {}]   ;;  %s7426_s11 = inlined_call_operand.vmem [shape: f32[1,128], index: 11, kind: input, shape index: {}]   ;;  %s7427_s12 = inlined_call_operand.hbm [shape: bf16[128,256], index: 12, kind: input, shape index: {}]   ;;  %s7428_s13 = inlined_call_operand.vmem [shape: f32[1,256], index: 13, kind: input, shape index: {}]   ;;  %s7429_s14 = inlined_call_operand.hbm [shape: bf16[128,128], index: 14, kind: input, shape index: {}]   ;;  %s7430_s15 = inlined_call_operand.vmem [shape: f32[1,128], index: 15, kind: input, shape index: {}]   ;;  %s7431_s16 = inlined_call_operand.hbm [shape: bf16[128,128], index: 16, kind: input, shape index: {}]   ;;  %s7432_s17 = inlined_call_operand.vmem [shape: f32[1,128], index: 17, kind: input, shape index: {}]   ;;  %s7433_s18 = inlined_call_operand.hbm [shape: bf16[128,256], index: 18, kind: input, shape index: {}]   ;;  %s7434_s19 = inlined_call_operand.vmem [shape: f32[1,256], index: 19, kind: input, shape index: {}]   ;;  %s7435_s20 = inlined_call_operand.hbm [shape: bf16[256,128], index: 20, kind: input, shape index: {}]   ;;  %s7436_s21 = inlined_call_operand.vmem [shape: f32[1,128], index: 21, kind: input, shape index: {}]   ;;  %s7437_s22 = inlined_call_operand.hbm [shape: bf16[128,128], index: 22, kind: input, shape index: {}]   ;;  %s7438_s23 = inlined_call_operand.hbm [shape: f32[2,8,128], index: 23, kind: output, shape index: {0}]   ;;  %s7439_s24 = inlined_call_operand.hbm [shape: f32[2,8,128], index: 24, kind: output, shape index: {1}]  }
   0x1   :  { %7495 = sst [smem:[#allocation166_spill]] %s7415_s0 }
   0x2   :  { %7496 = sst [smem:[#allocation167_spill]] %s7416_s1 }
   0x3   :  { %7497 = sst [smem:[#allocation168_spill]] %s7417_s2 }
   0x4   :  { %7498 = sst [smem:[#allocation169_spill]] %s7418_s3 }
   0x5   :  { %7499 = sst [smem:[#allocation170_spill]] %s7419_s4 }
   0x6   :  { %7500 = sst [smem:[#allocation171_spill]] %s7420_s5 }
   0x7   :  { %7501 = sst [smem:[#allocation172_spill]] %s7421_s6 }
   0x8   :  { %7502 = sst [smem:[#allocation173_spill]] %s7422_s7 }
   0x9   :  { %7503 = sst [smem:[#allocation174_spill]] %s7423_s8 }
   0xa   :  { %7504 = sst [smem:[#allocation175_spill]] %s7424_s9 }
   0xb   :  { %7505 = sst [smem:[#allocation176_spill]] %s7425_s10 }
   0xc   :  { %7506 = sst [smem:[#allocation177_spill]] %s7426_s11 }
   0xd   :  { %7507 = sst [smem:[#allocation178_spill]] %s7427_s12 }
   0xe   :  { %7508 = sst [smem:[#allocation179_spill]] %s7428_s13 }
   0xf   :  { %7509 = sst [smem:[#allocation180_spill]] %s7429_s14 }
  0x10   :  { %7510 = sst [smem:[#allocation181_spill]] %s7430_s15 }
  0x11   :  { %7511 = sst [smem:[#allocation182_spill]] %s7431_s16 }
  0x12   :  { %7512 = sst [smem:[#allocation183_spill]] %s7432_s17 }
  0x13   :  { %7513 = sst [smem:[#allocation184_spill]] %s7433_s18 }
  0x14   :  { %7514 = sst [smem:[#allocation185_spill]] %s7434_s19 }
  0x15   :  { %7515 = sst [smem:[#allocation186_spill]] %s7435_s20 }
  0x16   :  { %7516 = sst [smem:[#allocation187_spill]] %s7436_s21 }
  0x17   :  { %7517 = sst [smem:[#allocation188_spill]] %s7438_s23 }
  0x18   :  { %7518 = sst [smem:[#allocation189_spill]] %s7439_s24 }
  0x19   :  { %30 = vsyncpa [#allocation3], 0 }
  0x1a   :  { %32 = vsyncpa [#allocation3 + $0x1], 0 }
  0x1b   :  { %33 = vsyncpa [#allocation6], 0 }
  0x1c   :  { %35 = vsyncpa [#allocation6 + $0x1], 0 }
  0x1d   :  { %36 = vsyncpa [#allocation9], 0 }
  0x1e   :  { %38 = vsyncpa [#allocation9 + $0x1], 0 }
  0x1f   :  { %39 = vsyncpa [#allocation12], 0 }
  0x20   :  { %40 = vsyncpa [#allocation15], 0 }
  0x21   :  { %41 = vsyncpa [#allocation18], 0 }
  0x22   :  { %42 = vsyncpa [#allocation21], 0 }
  0x23   :  { %43 = vsyncpa [#allocation24], 0 }
  0x24   :  { %44 = vsyncpa [#allocation27], 0 }
  0x25   :  { %45 = vsyncpa [#allocation4], 0 }
  0x26   :  { %47 = vsyncpa [#allocation4 + $0x1], 0 }
  0x27   :  { %48 = vsyncpa [#allocation30], 0 }
  0x28   :  { %50 = vsyncpa [#allocation30 + $0x1], 0  ;;  %s5743_s5 = smov 0   ;;  %s5745_s26 = smov 0  }
  0x29   :  { %s5747_s27 = smov 0   ;;  %s5749_s28 = smov 0  }
  0x2a LB: > { %7519 = sst [smem:[#allocation43_spill]] %s5560_s5  ;;  %s5767_s7 = sadd.s32 4294967295, %s5572_s28   ;;  %s5572_s28 = sphi %s5749_s28, %s7853_s28   ;;  %s5568_s27 = sphi %s5747_s27, %s7855_s27   ;;  %s5564_s26 = sphi %s5745_s26, %s7857_s26   ;;  %s5560_s5 = sphi %s5743_s5, %s7856_s5  }
  0x2b   : > { %7520 = sst [smem:[#allocation44_spill]] %s5568_s27  ;;  %p3974_p0 = scmp.ge.s32.totalorder %s5572_s28, 1 }
  0x2c   : > { %s7521_s29 = sld [smem:[#allocation170_spill]]  ;;  %p7456_p1 = scmp.eq.s32.totalorder %s5767_s7, 0 }
  0x2d   : > { %7522 = sst [smem:[#allocation45_spill]] %s5767_s7  ;;  %p616_p2 = scmp.lt.s32.totalorder %s5572_s28, 3 }
  0x2e   : > { %s5594_s3 = smov [#allocation10]   ;;  %s7524_s1 = sld [smem:[#allocation172_spill]] }
  0x2f   : > { %p5772_p3 = pnand %p3974_p0, %p616_p2  ;;  %s630_s25 = sshll.u32 %s5594_s3, 4  ;;  %s631_s25 = int_to_ptr.vmem [resolvable:$true] %s630_s25 }
  0x30   : > { %s7448_s3 = smov 64   ;;  %s7450_s23 = smov 4  }
  0x31   : > { %p4673_p5 = pneg %p5772_p3  ;;  %s5598_s19 = smov [#allocation14]  }
  0x32   : > { %s628_s0 = sshll.u32 %s7521_s29, 4  ;;  %s5595_s29 = smov [#allocation11]   ;;  %s629_s0 = int_to_ptr.hbm [resolvable:$true] %s628_s0 }
  0x33   : > { %p5784_p6 = pnand %p4673_p5, %p7456_p1  ;;  %s644_s24 = sshll.u32 %s5595_s29, 4  ;;  %s645_s24 = int_to_ptr.vmem [resolvable:$true] %s644_s24 }
  0x34   : > { %s642_s6 = sshll.u32 %s7524_s1, 4  ;;  %s7526_s1 = sld [smem:[#allocation174_spill]]  ;;  %s643_s6 = int_to_ptr.hbm [resolvable:$true] %s642_s6 }
  0x35   : > { %4676 = dma.hbm_to_vmem [thread:$0]  (!%p5784_p6), %s629_s0, 64, %s631_s25, [#allocation9]  }
  0x36   : > { %4679 = dma.hbm_to_vmem [thread:$0]  (!%p5784_p6), %s643_s6, 1024, %s645_s24, [#allocation12], %s7448_s3, %s7448_s3, %s7450_s23  }
  0x37   : > { %s670_s17 = sshll.u32 %s5598_s19, 4  ;;  %s7527_s10 = sld [smem:[#allocation176_spill]]  ;;  %s671_s17 = int_to_ptr.vmem [resolvable:$true] %s670_s17 }
  0x38   : > { %s5599_s24 = smov [#allocation17]   ;;  %s7528_s14 = sld [smem:[#allocation180_spill]] }
  0x39   : > { %s696_s25 = sshll.u32 %s5599_s24, 4  ;;  %s5600_s15 = smov [#allocation20]   ;;  %s697_s25 = int_to_ptr.vmem [resolvable:$true] %s696_s25 }
  0x3a   : > { %s668_s21 = sshll.u32 %s7526_s1, 4  ;;  %s7529_s18 = sld [smem:[#allocation184_spill]]  ;;  %s669_s21 = int_to_ptr.hbm [resolvable:$true] %s668_s21 }
  0x3b   : > { %4685 = dma.hbm_to_vmem [thread:$0]  (!%p5784_p6), %s669_s21, 1024, %s671_s17, [#allocation15], %s7448_s3, %s7448_s3, %s7450_s23  }
  0x3c   : > { %s730_s17 = sshll.u32 %s5600_s15, 4  ;;  %s5601_s29 = smov [#allocation23]   ;;  %s731_s17 = int_to_ptr.vmem [resolvable:$true] %s730_s17 }
  0x3d   : > { %s694_s0 = sshll.u32 %s7527_s10, 4  ;;  %s7446_s24 = smov 128   ;;  %s695_s0 = int_to_ptr.hbm [resolvable:$true] %s694_s0 }
  0x3e   : > { %s728_s4 = sshll.u32 %s7528_s14, 4  ;;  %s3973_s6 = sadd.s32 4294967294, %s5572_s28   ;;  %s729_s4 = int_to_ptr.hbm [resolvable:$true] %s728_s4 }
  0x3f   : > { %4691 = dma.hbm_to_vmem [thread:$0]  (!%p5784_p6), %s695_s0, 1024, %s697_s25, [#allocation18], %s7448_s3, %s7448_s3, %s7450_s23  }
  0x40   : > { %s762_s1 = sshll.u32 %s7529_s18, 4  ;;  %s764_s0 = sshll.u32 %s5601_s29, 4  ;;  %s763_s1 = int_to_ptr.hbm [resolvable:$true] %s762_s1  ;;  %s765_s0 = int_to_ptr.vmem [resolvable:$true] %s764_s0 }
  0x41   : > { %4697 = dma.hbm_to_vmem [thread:$0]  (!%p5784_p6), %s729_s4, 1024, %s731_s17, [#allocation21], %s7448_s3, %s7448_s3, %s7450_s23  }
  0x42   : > { %s7447_s25 = smov 8   ;;  %s5829_s8 = sadd.s32 1, %s5572_s28  }
  0x43   : > { %4703 = dma.hbm_to_vmem [thread:$0]  (!%p5784_p6), %s763_s1, 2048, %s765_s0, [#allocation24], %s7446_s24, %s7446_s24, %s7447_s25  }
  0x44   : > { %7530 = sst [smem:[#allocation46_spill]] %s5829_s8  ;;  %s60_s4 = ssub.s32 %s5572_s28, %s5829_s8 }
  0x45   : > { %s63_s15 = sadd.s32 1, %s5568_s27  ;;  %p61_p7 = scmp.eq.s32.totalorder %s60_s4, 0 }
  0x46   : > { %p70_p8 = scmp.ne.s32.totalorder %s5568_s27, %s5564_s26  ;;  %p71_p9 = scmp.eq.s32.totalorder %s5572_s28, 0 }
  0x47   : > { %p76_p10 = scmp.ne.s32.totalorder %s5564_s26, %s5560_s5  ;;  %p577_p13 = scmp.eq.s32.totalorder %s5767_s7, 1 }
  0x48   : > { %s5840_s17 = scalar_select %p61_p7, %s5568_s27, %s63_s15  }
  0x49   : > { %p72_p11 = por %p71_p9, %p70_p8  ;;  %p5844_p12 = por %p7456_p1, %p76_p10 }
  0x4a   : > { %7531 = sst [smem:[#allocation47_spill]] %s5840_s17  ;;  %p583_p0 = scmp.eq.s32.totalorder %s3973_s6, 1 }
  0x4b   : > { %s7532_s19 = scalar_select %p5844_p12, 1, 0 }
  0x4c   : > { %p4742_p2 = scmp.lt.s32.totalorder %s5572_s28, 2  ;;  %s5851_s21 = sand.u32 1, %s5568_s27  }
  0x4d   : > { %7533 = sst [smem:[#allocation48_spill]] %s7532_s19  ;;  %p5853_p5 = por %p577_p13, %p70_p8 }
  0x4e   : > { %p5857_p4 = por %p583_p0, %p76_p10  ;;  %p5861_p7 = pnand %p4742_p2, %p72_p11 }
  0x4f   : > { %s7534_s1 = scalar_select %p5853_p5, 1, 0 }
  0x50   : > { %s7536_s29 = scalar_select %p5857_p4, 1, 0 }
  0x51   : > { %7535 = sst [smem:[#allocation49_spill]] %s7534_s1  ;;  %s7457_s4 = sand.u32 1, %s5572_s28  }
  0x52   : > { %7537 = sst [smem:[#allocation50_spill]] %s7536_s29  ;;  %s3990_s6 = sshll.u32 %s5851_s21, 6 }
  0x53   : > { %s4452_s15 = sshll.u32 %s5572_s28, 6  ;;  %s835_s24 = scalar_lea.vmem [#allocation5], %s3990_s6 }
  0x54   : > { %s843_s25 = sshll.u32 %s835_s24, 4  ;;  %s7539_s10 = sld [smem:[#allocation167_spill]]  ;;  %s844_s25 = int_to_ptr.vmem [resolvable:$true] %s843_s25 }
  0x55   : > { %s5873_s17 = scalar_lea.sflag [#allocation6], %s7457_s4  ;;  %p5122_p9 = pneg %p5861_p7 }
  0x5a   : > { %s840_s14 = scalar_lea.hbm %s7539_s10, %s4452_s15  ;;  %s5125_s23 = scalar_lea.hbm %s7539_s10, 128 }
  0x5b   : > { %s841_s18 = sshll.u32 %s840_s14, 4  ;;  %s842_s18 = int_to_ptr.hbm [resolvable:$true] %s841_s18 }
  0x5c   : > { %s5118_s27 = sshra.s32 %s842_s18, 4  ;;  %s5119_s27 = int_to_ptr.hbm [resolvable:$true] %s5118_s27 }
  0x5d   : > { %s5120_s8 = scalar_lea.hbm %s5119_s27, 64  ;;  %p5126_p13 = scmp.lt.s32.totalorder %s5119_s27, %s7539_s10 }
  0x5e   : > { %p5121_p8 = scmp.ne.s32.totalorder %s5119_s27, %s5120_s8  ;;  %p5127_p0 = scmp.lt.s32.totalorder %s5125_s23, %s5120_s8 }
  0x60   : > { %p5123_p10 = pnand %p5122_p9, %p5121_p8  ;;  %p5128_p2 = por %p5127_p0, %p5126_p13 }
  0x62   : > { %p5124_p11 = pneg %p5123_p10 }
  0x64   : > { %p5129_p1 = pnand %p5128_p2, %p5124_p11 }
  0x66   : > { %5132 = shalt.err (!%p5129_p1)
}
  0x67   : > { %s7540_s4 = smov 4   ;;  %s7541_s5 = smov 64  }
  0x68   : > { %4716 = dma.hbm_to_vmem [thread:$0]  (!%p5861_p7), %s842_s18, 1024, %s844_s25, %s5873_s17, %s7541_s5, %s7541_s5, %s7540_s4  }
  0x69   : > { %s7542_s29 = sld [smem:[#allocation169_spill]]  ;;  %s876_s11 = scalar_lea.vmem [#allocation8], %s3990_s6 }
  0x6a   : > { %s884_s7 = sshll.u32 %s876_s11, 4  ;;  %s7543_s23 = sld [smem:[#allocation173_spill]]  ;;  %s5895_s7 = int_to_ptr.vmem [resolvable:$true] %s884_s7 }
  0x6b   : > { %s5604_s10 = smov [#allocation13]   ;;  %s7544_s9 = sld [smem:[#allocation175_spill]] }
  0x6c   : > { %s659_s19 = sshll.u32 %s5604_s10, 4  ;;  %s7545_s12 = sld [smem:[#allocation178_spill]]  ;;  %s660_s19 = int_to_ptr.vmem [resolvable:$true] %s659_s19 }
  0x6d   : > { %s5606_s10 = smov [#allocation19]   ;;  %s7546_s16 = sld [smem:[#allocation182_spill]] }
  0x6e   : > { %s713_s27 = sshll.u32 %s5606_s10, 4  ;;  %s7549_s20 = sld [smem:[#allocation186_spill]]  ;;  %s714_s27 = int_to_ptr.vmem [resolvable:$true] %s713_s27 }
  0x6f   : > { %s881_s24 = scalar_lea.hbm %s7542_s29, %s4452_s15  ;;  %s5605_s15 = smov [#allocation16]  }
  0x70   : > { %s882_s3 = sshll.u32 %s881_s24, 4  ;;  %s657_s14 = sshll.u32 %s7543_s23, 4  ;;  %s5897_s3 = int_to_ptr.hbm [resolvable:$true] %s882_s3  ;;  %s658_s14 = int_to_ptr.hbm [resolvable:$true] %s657_s14 }
  0x71   : > { %s683_s13 = sshll.u32 %s7544_s9, 4  ;;  %s685_s24 = sshll.u32 %s5605_s15, 4  ;;  %s684_s13 = int_to_ptr.hbm [resolvable:$true] %s683_s13  ;;  %s686_s24 = int_to_ptr.vmem [resolvable:$true] %s685_s24 }
  0x72   : > { %4682 = dma.hbm_to_vmem [thread:$0]  (!%p5784_p6), %s658_s14, 16, %s660_s19, [#allocation12]  }
  0x73   : > { %s711_s6 = sshll.u32 %s7545_s12, 4  ;;  %s745_s18 = sshll.u32 %s7546_s16, 4  ;;  %s712_s6 = int_to_ptr.hbm [resolvable:$true] %s711_s6  ;;  %s746_s18 = int_to_ptr.hbm [resolvable:$true] %s745_s18 }
  0x74   : > { %4688 = dma.hbm_to_vmem [thread:$0]  (!%p5784_p6), %s684_s13, 16, %s686_s24, [#allocation15]  }
  0x75   : > { %s7547_s19 = smov 8   ;;  %s7548_s14 = smov 128  }
  0x76   : > { %4694 = dma.hbm_to_vmem [thread:$0]  (!%p5784_p6), %s712_s6, 2048, %s714_s27, [#allocation18], %s7548_s14, %s7548_s14, %s7547_s19  }
  0x77   : > { %s779_s1 = sshll.u32 %s7549_s20, 4  ;;  %s5607_s13 = smov [#allocation22]   ;;  %s780_s1 = int_to_ptr.hbm [resolvable:$true] %s779_s1 }
  0x78   : > { %s747_s15 = sshll.u32 %s5607_s13, 4  ;;  %s5608_s24 = smov [#allocation25]   ;;  %s748_s15 = int_to_ptr.vmem [resolvable:$true] %s747_s15 }
  0x79   : > { %4700 = dma.hbm_to_vmem [thread:$0]  (!%p5784_p6), %s746_s18, 1024, %s748_s15, [#allocation21], %s7541_s5, %s7541_s5, %s7540_s4  }
  0x7a   : > { %s781_s10 = sshll.u32 %s5608_s24, 4  ;;  %s796_s6 = sshll.u32 %s7437_s22, 4  ;;  %s782_s10 = int_to_ptr.vmem [resolvable:$true] %s781_s10  ;;  %s797_s6 = int_to_ptr.hbm [resolvable:$true] %s796_s6 }
  0x7b   : > { %4706 = dma.hbm_to_vmem [thread:$0]  (!%p5784_p6), %s780_s1, 2048, %s782_s10, [#allocation24], %s7541_s5, %s7541_s5, %s7540_s4  }
  0x7c   : > { %s5609_s27 = smov [#allocation26]   ;;  %s3988_s14 = sshll.u32 %s5851_s21, 3 }
  0x7d   : > { %s798_s19 = sshll.u32 %s5609_s27, 4  ;;  %s3989_s18 = sshll.u32 %s5572_s28, 3  ;;  %s799_s19 = int_to_ptr.vmem [resolvable:$true] %s798_s19 }
  0x7e   : > { %4709 = dma.hbm_to_vmem [thread:$0]  (!%p5784_p6), %s797_s6, 1024, %s799_s19, [#allocation27], %s7541_s5, %s7541_s5, %s7540_s4  }
  0x7f   : > { %s816_s25 = scalar_lea.vmem [#allocation2], %s3988_s14  ;;  %s7550_s24 = sld [smem:[#allocation166_spill]] }
  0x80   : > { %s824_s11 = sshll.u32 %s816_s25, 4  ;;  %s7551_s27 = sld [smem:[#allocation168_spill]]  ;;  %s825_s11 = int_to_ptr.vmem [resolvable:$true] %s824_s11 }
  0x81   : > { %s813_s16 = scalar_lea.sflag [#allocation3], %s5851_s21 }
  0x85   : > { %s820_s8 = scalar_lea.hbm %s7550_s24, %s3989_s18  ;;  %s5335_s25 = scalar_lea.hbm %s7550_s24, 16 }
  0x86   : > { %s822_s23 = sshll.u32 %s820_s8, 4  ;;  %s7552_s9 = smov %s7551_s27  ;;  %s823_s23 = int_to_ptr.hbm [resolvable:$true] %s822_s23 }
  0x87   : > { %s861_s12 = scalar_lea.hbm %s7551_s27, %s3989_s18  ;;  %s5328_s2 = sshra.s32 %s823_s23, 4  ;;  %s5329_s2 = int_to_ptr.hbm [resolvable:$true] %s5328_s2 }
  0x88   : > { %s5330_s20 = scalar_lea.hbm %s5329_s2, 8  ;;  %p5336_p10 = scmp.lt.s32.totalorder %s5329_s2, %s7550_s24 }
  0x89   : > { %p5331_p1 = scmp.ne.s32.totalorder %s5329_s2, %s5330_s20  ;;  %p5337_p11 = scmp.lt.s32.totalorder %s5335_s25, %s5330_s20 }
  0x8b   : > { %p5333_p6 = pnand %p5331_p1, %p5122_p9  ;;  %p5338_p13 = por %p5337_p11, %p5336_p10 }
  0x8d   : > { %p5334_p8 = pneg %p5333_p6 }
  0x8f   : > { %p5339_p0 = pnand %p5338_p13, %p5334_p8 }
  0x91   : > { %5342 = shalt.err (!%p5339_p0)
}
  0x92   : > { %4713 = dma.hbm_to_vmem [thread:$0]  (!%p5861_p7), %s823_s23, 128, %s825_s11, %s813_s16  }
  0x93   : > { %s863_s21 = sshll.u32 %s861_s12, 4  ;;  %s857_s18 = scalar_lea.vmem [#allocation7], %s3988_s14  ;;  %s864_s21 = int_to_ptr.hbm [resolvable:$true] %s863_s21 }
  0x94   : > { %s865_s8 = sshll.u32 %s857_s18, 4  ;;  %s5358_s1 = sshra.s32 %s864_s21, 4  ;;  %s866_s8 = int_to_ptr.vmem [resolvable:$true] %s865_s8  ;;  %s5359_s1 = int_to_ptr.hbm [resolvable:$true] %s5358_s1 }
  0x95   : > { %s5360_s10 = scalar_lea.hbm %s5359_s1, 8  ;;  %s5365_s2 = scalar_lea.hbm %s7552_s9, 16 }
  0x96   : > { %p5361_p2 = scmp.ne.s32.totalorder %s5359_s1, %s5360_s10  ;;  %p5366_p8 = scmp.lt.s32.totalorder %s5359_s1, %s7552_s9 }
  0x97   : > { %p5367_p10 = scmp.lt.s32.totalorder %s5365_s2, %s5360_s10 }
  0x98   : > { %p5363_p1 = pnand %p5361_p2, %p5122_p9 }
  0x99   : > { %p5368_p11 = por %p5367_p10, %p5366_p8 }
  0x9a   : > { %p5364_p6 = pneg %p5363_p1 }
  0x9c   : > { %p5369_p13 = pnand %p5368_p11, %p5364_p6 }
  0x9e   : > { %5372 = shalt.err (!%p5369_p13)
}
  0x9f   : > { %4719 = dma.hbm_to_vmem [thread:$0]  (!%p5861_p7), %s864_s21, 128, %s866_s8, %s5873_s17  }
  0xa0   : > { %s7553_s12 = sand.u32 1, %s5572_s28   ;;  %s5388_s14 = sshra.s32 %s5897_s3, 4  ;;  %s5389_s14 = int_to_ptr.hbm [resolvable:$true] %s5388_s14 }
  0xa1   : > { %s873_s16 = scalar_lea.sflag [#allocation9], %s7553_s12  ;;  %s5390_s11 = scalar_lea.hbm %s5389_s14, 64 }
  0xa2   : > { %p5391_p0 = scmp.ne.s32.totalorder %s5389_s14, %s5390_s11  ;;  %s5395_s13 = scalar_lea.hbm %s7542_s29, 128 }
  0xa3   : > { %p5396_p6 = scmp.lt.s32.totalorder %s5389_s14, %s7542_s29  ;;  %p5397_p8 = scmp.lt.s32.totalorder %s5395_s13, %s5390_s11 }
  0xa4   : > { %p5393_p2 = pnand %p5391_p0, %p5122_p9 }
  0xa5   : > { %p5398_p10 = por %p5397_p8, %p5396_p6 }
  0xa6   : > { %p5394_p1 = pneg %p5393_p2 }
  0xa8   : > { %p5399_p11 = pnand %p5398_p10, %p5394_p1 }
  0xaa   : > { %5402 = shalt.err (!%p5399_p11)
}
  0xab   : > { %4722 = dma.hbm_to_vmem [thread:$0]  (!%p5861_p7), %s5897_s3, 1024, %s5895_s7, %s873_s16, %s7541_s5, %s7541_s5, %s7540_s4  }
  0xac   : > { %896 = sbr.rel (%p5772_p3) target bundleno = 4518 (0x11a6), region = 112 }
  0xb1   : > { %s5995_s21 = sand.u32 1, %s5564_s26  }
  0xb2   : > { %s5998_s8 = sshll.u32 %s5995_s21, 3  ;;  %s899_s1 = scalar_lea.sflag [#allocation3], %s5995_s21 }
  0xb3   : > { %s902_s0 = scalar_lea.vmem [#allocation2], %s5998_s8 }
  0xb4   : > { %5511 = dma.done.wait (%p5844_p12), %s899_s1, 128  }
  0xb5   : > { %5513 = vsyncadd (%p5844_p12), %s899_s1, 4294967168  ;;  %s7555_s5 = sld [smem:[#allocation45_spill]]  ;;  %s4000_s30 = sshll.u32 %s5995_s21, 6 }
  0xb6   : > { %s6008_s3 = scalar_lea.vmem [#allocation5], %s4000_s30 }
  0xbb   : > { %s908_s7 = sand.u32 1, %s7555_s5  }
  0xbc   : > { %s909_s4 = scalar_lea.sflag [#allocation6], %s908_s7 }
  0xbd   : > { %5515 = dma.done.wait (%p5844_p12), %s909_s4, 1152  }
  0xbe   : > { %5517 = vsyncadd (%p5844_p12), %s909_s4, 4294966144  ;;  %s922_s10 = scalar_lea.vmem [#allocation7], %s5998_s8  ;;  %s929_s20 = scalar_lea.sflag [#allocation9], %s908_s7 }
  0xbf   : > { %s6015_s27 = scalar_lea.vmem [#allocation8], %s4000_s30 }
  0xc0   : > { %5519 = dma.done.wait (%p5844_p12), %s929_s20, 1024  }
  0xc1   : > { %5521 = vsyncadd (%p5844_p12), %s929_s20, 4294966272  ;;  %p7556_p3 = scmp.eq.s32.totalorder %s7555_s5, 0 }
  0xc3   : > { %5523 = dma.done.wait (%p7556_p3), [#allocation9], 64   ;;  %p7557_p7 = pmov %p7556_p3 }
  0xc4   : > { %p7558_p9 = pmov %p7556_p3 }
  0xc5   : > { %5525 = vsyncadd (%p7557_p7), [#allocation9], 4294967232 }
  0xc6   : > { %5527 = dma.done.wait (%p7558_p9), [#allocation12], 1040   ;;  %p7559_p13 = pmov %p7556_p3 }
  0xc7   : > { %p7560_p0 = pmov %p7556_p3 }
  0xc8   : > { %5529 = vsyncadd (%p7559_p13), [#allocation12], 4294966256 }
  0xc9   : > { %5531 = dma.done.wait (%p7560_p0), [#allocation15], 1040   ;;  %p7561_p2 = pmov %p7560_p0 }
  0xca   : > { %p7562_p12 = pmov %p7560_p0 }
  0xcb   : > { %5533 = vsyncadd (%p7561_p2), [#allocation15], 4294966256 }
  0xcc   : > { %5535 = dma.done.wait (%p7562_p12), [#allocation18], 3072   ;;  %p7563_p1 = pmov %p7560_p0 }
  0xcd   : > { %p7564_p6 = pmov %p7560_p0 }
  0xce   : > { %5537 = vsyncadd (%p7563_p1), [#allocation18], 4294964224 }
  0xcf   : > { %5539 = dma.done.wait (%p7564_p6), [#allocation21], 2048   ;;  %p7565_p8 = pmov %p7560_p0 }
  0xd0   : > { %p7566_p10 = pmov %p7560_p0 }
  0xd1   : > { %5541 = vsyncadd (%p7565_p8), [#allocation21], 4294965248 }
  0xd2   : > { %5543 = dma.done.wait (%p7566_p10), [#allocation24], 4096   ;;  %p7567_p11 = pmov %p7560_p0 }
  0xd3   : > { %p7568_p3 = pmov %p7560_p0 }
  0xd4   : > { %5545 = vsyncadd (%p7567_p11), [#allocation24], 4294963200 }
  0xd5   : > { %5547 = dma.done.wait (%p7568_p3), [#allocation27], 1024   ;;  %p7569_p7 = pmov %p7560_p0 }
  0xd6   : > { %v6049_v0 = vld [vmem:[%s922_s10] sm:$0xff]  ;;  %v4477_v2 = vld [vmem:[#allocation17 + $0x38] sm:$0xff]  ;;  %v4474_v8 = vld [vmem:[#allocation17 + $0x20] sm:$0xff]  ;;  %s7570_s19 = sld [smem:[#allocation177_spill]]  ;;  %s5610_s12 = smov 96  }
  0xd7   : > { %5549 = vsyncadd (%p7569_p7), [#allocation27], 4294966272  ;;  %v4469_v1 = vld [vmem:[#allocation14 + $0x38] sm:$0xff]  ;;  %v4468_v3 = vld [vmem:[#allocation14 + $0x30] sm:$0xff]  ;;  %1780 = vmatpush.bf16.msra.mxu1 %v4477_v2  ;;  %4605 = vmatpush.bf16.msra.mxu3 %v4477_v2  ;;  %s5611_s16 = smov 32   ;;  %s5612_s14 = smov 64  }
  0xd8   : > { %1487 = vmatpush.bf16.msra.mxu0 %v4469_v1  ;;  %4597 = vmatpush.bf16.msra.mxu2 %v4469_v1  ;;  %v4476_v4 = vld [vmem:[#allocation17 + $0x30] sm:$0xff]  ;;  %v4467_v5 = vld [vmem:[#allocation14 + $0x28] sm:$0xff]  ;;  %v4466_v7 = vld [vmem:[#allocation14 + $0x20] sm:$0xff]  ;;  %s7714_s25 = sld [smem:[#allocation171_spill]]  ;;  %s1070_s13 = scalar_lea.vmem [#allocation28], %s5998_s8 }
  0xd9   : > { %v4475_v6 = vld [vmem:[#allocation17 + $0x28] sm:$0xff]  ;;  %v1082_v10 = vld [vmem:[%s6008_s3 + $0x8] sm:$0xff]   ;;  %v4473_v12 = vld [vmem:[#allocation17 + $0x18] sm:$0xff]  ;;  %s1077_s15 = scalar_lea.vmem [#allocation29], %s5998_s8  ;;  %s7014_s18 = smov 0  }
  0xda   : > { %v1080_v9 = vld [vmem:[%s6008_s3] sm:$0xff]   ;;  %v4465_v11 = vld [vmem:[#allocation14 + $0x18] sm:$0xff]  ;;  %v6055_v14 = vunpack.c.l.bf16 %v1082_v10  ;;  %v6073_v32 = vunpack.c.h.bf16 %v1082_v10  ;;  %v1087_v42 = vld [vmem:[%s6008_s3 + $0x18] sm:$0xff]  }
  0xdb   : > { %1781 = vmatpush.bf16.msra.mxu1 %v4476_v4  ;;  %4606 = vmatpush.bf16.msra.mxu3 %v4476_v4  ;;  %v6053_v13 = vunpack.c.l.bf16 %v1080_v9  ;;  %v4559_v15 = vld [vmem:[%s6015_s27] sm:$0xff]   ;;  %v4464_v16 = vld [vmem:[#allocation14 + $0x10] sm:$0xff]  ;;  %v6065_v23 = vunpack.c.h.bf16 %v1080_v9  ;;  %v4463_v31 = vld [vmem:[#allocation14 + $0x8] sm:$0xff]  ;;  %v6090_v46 = vunpack.c.h.bf16 %v1087_v42  ;;  %v6092_v47 = vunpack.c.l.bf16 %v1087_v42 }
  0xdc   : > { %1488 = vmatpush.bf16.msra.mxu0 %v4468_v3  ;;  %4598 = vmatpush.bf16.msra.mxu2 %v4468_v3  ;;  %v1088_v17 = vld [vmem:[%s6008_s3 + $0x20] sm:$0xff]   ;;  %v4593_v18 = vld [vmem:[%s6015_s27 + $0x20] sm:$0xff]   ;;  %v1149_v20 = vmul.f32 %v6055_v14, %v6055_v14  ;;  %v4472_v21 = vld [vmem:[#allocation17 + $0x10] sm:$0xff]  ;;  %v4560_v24 = vunpack.c.l.bf16 %v4559_v15  ;;  %v4561_v25 = vunpack.c.h.bf16 %v4559_v15  ;;  %v1150_v36 = vmul.f32 %v6073_v32, %v6073_v32 }
  0xdd   : > { %v1147_v19 = vmul.f32 %v6053_v13, %v6053_v13  ;;  %v1084_v22 = vld [vmem:[%s6008_s3 + $0x10] sm:$0xff]   ;;  %v6069_v27 = vunpack.c.l.bf16 %v1088_v17  ;;  %v6071_v28 = vunpack.c.h.bf16 %v1088_v17  ;;  %v4576_v29 = vunpack.c.l.bf16 %v4593_v18  ;;  %v4471_v34 = vld [vmem:[#allocation17 + $0x8] sm:$0xff]  ;;  %v4470_v44 = vld [vmem:[#allocation17] sm:$0xff] }
  0xde   : > { %1167 = vadd.xlane.f32.xlu1 %v1149_v20  ;;  %v6067_v26 = vunpack.c.l.bf16 %v1084_v22  ;;  %v4577_v30 = vunpack.c.h.bf16 %v4593_v18  ;;  %v1148_v35 = vmul.f32 %v6065_v23, %v6065_v23  ;;  %v6081_v37 = vunpack.c.h.bf16 %v1084_v22  ;;  %v4462_v43 = vld [vmem:[#allocation14] sm:$0xff]  ;;  %v4454_v50 = vld [vmem:[%s6008_s3] sm:$0xff]  ;;  %v1090_v55 = vld [vmem:[%s6008_s3 + $0x28] sm:$0xff]  }
  0xdf   : > { %1782 = vmatpush.bf16.msra.mxu1 %v4475_v6  ;;  %4607 = vmatpush.bf16.msra.mxu3 %v4475_v6  ;;  %v1395_v38 = vadd.f32 %v4560_v24, %v6053_v13  ;;  %v1396_v39 = vadd.f32 %v4561_v25, %v6065_v23  ;;  %v1403_v40 = vadd.f32 %v4576_v29, %v6069_v27  ;;  %v4458_v51 = vld [vmem:[%s6008_s3 + $0x20] sm:$0xff]  ;;  %v4590_v54 = vld [vmem:[%s6015_s27 + $0x8] sm:$0xff]   ;;  %v6105_v60 = vunpack.c.l.bf16 %v1090_v55  ;;  %v4459_v15 = vld [vmem:[%s6008_s3 + $0x28] sm:$0xff] }
  0xe0   : > { %1489 = vmatpush.bf16.msra.mxu0 %v4467_v5  ;;  %4599 = vmatpush.bf16.msra.mxu2 %v4467_v5  ;;  %v1151_v33 = vmul.f32 %v6067_v26, %v6067_v26  ;;  %v1404_v41 = vadd.f32 %v4577_v30, %v6071_v28  ;;  %v1152_v45 = vmul.f32 %v6081_v37, %v6081_v37  ;;  %v4594_v56 = vld [vmem:[%s6015_s27 + $0x28] sm:$0xff]   ;;  %v4564_v57 = vunpack.c.l.bf16 %v4590_v54  ;;  %v4595_v22 = vld [vmem:[%s6015_s27 + $0x30] sm:$0xff]   ;;  %v4456_v42 = vld [vmem:[%s6008_s3 + $0x10] sm:$0xff] }
  0xe1   : > { %1163 = vadd.xlane.f32.xlu0 %v1147_v19  ;;  %v1427_v48 = vpack.c.bf16 %v1396_v39, %v1395_v38  ;;  %v1154_v52 = vmul.f32 %v6090_v46, %v6090_v46  ;;  %v1153_v53 = vmul.f32 %v6092_v47, %v6092_v47  ;;  %v4565_v58 = vunpack.c.h.bf16 %v4590_v54 }
  0xe2   : > { %1171 = vadd.xlane.f32.xlu2 %v1151_v33  ;;  %v1431_v49 = vpack.c.bf16 %v1404_v41, %v1403_v40  ;;  %v1155_v59 = vmul.f32 %v6069_v27, %v6069_v27  ;;  %v6107_v61 = vunpack.c.h.bf16 %v1090_v55  ;;  %v4580_v62 = vunpack.c.l.bf16 %v4594_v56 }
  0xe3   : > { %1783 = vmatpush.bf16.msra.mxu1 %v4474_v8  ;;  %4608 = vmatpush.bf16.msra.mxu3 %v4474_v8  ;;  %v4581_v63 = vunpack.c.h.bf16 %v4594_v56  ;;  %v1157_v1 = vmul.f32 %v6105_v60, %v6105_v60  ;;  %v1156_v2 = vmul.f32 %v6071_v28, %v6071_v28  ;;  %v1397_v3 = vadd.f32 %v4564_v57, %v6055_v14 }
  0xe4   : > { %1490 = vmatpush.bf16.msra.mxu0 %v4466_v7  ;;  %4600 = vmatpush.bf16.msra.mxu2 %v4466_v7  ;;  %v1398_v4 = vadd.f32 %v4565_v58, %v6073_v32  ;;  %v1405_v5 = vadd.f32 %v4580_v62, %v6105_v60  ;;  %v1092_v7 = vld [vmem:[%s6008_s3 + $0x30] sm:$0xff]   ;;  %v1158_v8 = vmul.f32 %v6107_v61, %v6107_v61  ;;  %v4585_v33 = vunpack.c.h.bf16 %v4595_v22  ;;  %v4461_v58 = vld [vmem:[%s6008_s3 + $0x38] sm:$0xff] }
  0xe5   : > { %v1406_v6 = vadd.f32 %v4581_v63, %v6107_v61  ;;  %v6125_v17 = vunpack.c.h.bf16 %v1092_v7  ;;  %v6155_v62 = vld [vmem:[#allocation16] ss:$0 sm:$0xff]  ;;  %v6160_v63 = vld [vmem:[%s7570_s19] ss:$0 sm:$0xff] }
  0xe6   : > { %1169 = vadd.xlane.f32.xlu1 %v1150_v36  ;;  %v1428_v9 = vpack.c.bf16 %v1398_v4, %v1397_v3 }
  0xe7   : > { %1784 = vmatpush.bf16.msra.mxu1 %v4473_v12  ;;  %4609 = vmatpush.bf16.msra.mxu3 %v4473_v12  ;;  %v1432_v10 = vpack.c.bf16 %v1406_v6, %v1405_v5  ;;  %v4455_v12 = vld [vmem:[%s6008_s3 + $0x8] sm:$0xff]  ;;  %v1160_v18 = vmul.f32 %v6125_v17, %v6125_v17  ;;  %v1408_v39 = vadd.f32 %v4585_v33, %v6125_v17 }
  0xe8   : > { %1491 = vmatpush.bf16.msra.mxu0 %v4465_v11  ;;  %4601 = vmatpush.bf16.msra.mxu2 %v4465_v11  ;;  %v1094_v11 = vld [vmem:[%s6008_s3 + $0x38] sm:$0xff]  }
  0xe9   : > { %1165 = vadd.xlane.f32.xlu0 %v1148_v35  ;;  %v6131_v20 = vunpack.c.l.bf16 %v1094_v11  ;;  %v6137_v25 = vunpack.c.h.bf16 %v1094_v11 }
  0xea   : > { %1173 = vadd.xlane.f32.xlu2 %v1152_v45  ;;  %v4596_v45 = vld [vmem:[%s6015_s27 + $0x38] sm:$0xff]  }
  0xeb   : > { %1785 = vmatpush.bf16.msra.mxu1 %v4472_v21  ;;  %4610 = vmatpush.bf16.msra.mxu3 %v4472_v21  ;;  %v4591_v21 = vld [vmem:[%s6015_s27 + $0x10] sm:$0xff]   ;;  %v1161_v24 = vmul.f32 %v6131_v20, %v6131_v20 }
  0xec   : > { %1492 = vmatpush.bf16.msra.mxu0 %v4464_v16  ;;  %4602 = vmatpush.bf16.msra.mxu2 %v4464_v16  ;;  %v6123_v16 = vunpack.c.l.bf16 %v1092_v7  ;;  %v4568_v29 = vunpack.c.l.bf16 %v4591_v21  ;;  %v4569_v30 = vunpack.c.h.bf16 %v4591_v21 }
  0xee   : > { %1177 = vadd.xlane.f32.xlu1 %v1154_v52  ;;  %v1159_v19 = vmul.f32 %v6123_v16, %v6123_v16  ;;  %v1399_v35 = vadd.f32 %v4568_v29, %v6067_v26  ;;  %v1400_v36 = vadd.f32 %v4569_v30, %v6081_v37 }
  0xef   : > { %1786 = vmatpush.bf16.msra.mxu1 %v4471_v34  ;;  %4611 = vmatpush.bf16.msra.mxu3 %v4471_v34  ;;  %v1162_v34 = vmul.f32 %v6137_v25, %v6137_v25 }
  0xf0   : > { %1493 = vmatpush.bf16.msra.mxu0 %v4463_v31  ;;  %4603 = vmatpush.bf16.msra.mxu2 %v4463_v31  ;;  %v4584_v31 = vunpack.c.l.bf16 %v4595_v22  ;;  %v1429_v40 = vpack.c.bf16 %v1400_v36, %v1399_v35 }
  0xf1   : > { %1175 = vadd.xlane.f32.xlu0 %v1153_v53 }
  0xf2   : > { %1179 = vadd.xlane.f32.xlu2 %v1155_v59  ;;  %v1407_v38 = vadd.f32 %v4584_v31, %v6123_v16  ;;  %v4457_v59 = vld [vmem:[%s6008_s3 + $0x18] sm:$0xff] }
  0xf3   : > { %1787 = vmatpush.bf16.msra.mxu1 %v4470_v44  ;;  %4612 = vmatpush.bf16.msra.mxu3 %v4470_v44  ;;  %v4592_v44 = vld [vmem:[%s6015_s27 + $0x18] sm:$0xff]  }
  0xf4   : > { %1494 = vmatpush.bf16.msra.mxu0 %v4462_v43  ;;  %4604 = vmatpush.bf16.msra.mxu2 %v4462_v43  ;;  %v1433_v41 = vpack.c.bf16 %v1408_v39, %v1407_v38  ;;  %v4460_v43 = vld [vmem:[%s6008_s3 + $0x30] sm:$0xff] }
  0xf6   : > { %1788 = vmatmul.bf16.vlgmr.msra.gmra.mxu1 %v4454_v50  ;;  %1808 = vmatmul.bf16.vlgmr.msra.gmra.mxu3 %v4458_v51  ;;  %v4588_v50 = vunpack.c.l.bf16 %v4596_v45  ;;  %v4589_v51 = vunpack.c.h.bf16 %v4596_v45 }
  0xf7   : > { %1495 = vmatmul.bf16.vlgmr.msra.gmra.mxu0 %v1427_v48  ;;  %1515 = vmatmul.bf16.vlgmr.msra.gmra.mxu2 %v1431_v49  ;;  %v4572_v48 = vunpack.c.l.bf16 %v4592_v44  ;;  %v4573_v49 = vunpack.c.h.bf16 %v4592_v44 }
  0xf8   : > { %1183 = vadd.xlane.f32.xlu1 %v1157_v1  ;;  %v1409_v54 = vadd.f32 %v4588_v50, %v6131_v20  ;;  %v1410_v55 = vadd.f32 %v4589_v51, %v6137_v25 }
  0xf9   : > { %1181 = vadd.xlane.f32.xlu0 %v1156_v2  ;;  %v1401_v52 = vadd.f32 %v4572_v48, %v6092_v47  ;;  %v1402_v53 = vadd.f32 %v4573_v49, %v6090_v46 }
  0xfa   : > { %1185 = vadd.xlane.f32.xlu2 %v1158_v8  ;;  %v1434_v57 = vpack.c.bf16 %v1410_v55, %v1409_v54 }
  0xfb   : > { %v1430_v56 = vpack.c.bf16 %v1402_v53, %v1401_v52 }
 0x100   : > { %1189 = vadd.xlane.f32.xlu1 %v1160_v18 }
 0x101   : > { %1187 = vadd.xlane.f32.xlu0 %v1159_v19 }
 0x102   : > { %1191 = vadd.xlane.f32.xlu2 %v1161_v24 }
 0x106   : > { %1793 = vmatmul.bf16.gmra.mxu1 %v4455_v12  ;;  %1813 = vmatmul.bf16.gmra.mxu3 %v4459_v15 }
 0x107   : > { %1500 = vmatmul.bf16.gmra.mxu0 %v1428_v9  ;;  %1520 = vmatmul.bf16.gmra.mxu2 %v1432_v10 }
 0x109   : > { %1193 = vadd.xlane.f32.xlu0 %v1162_v34 }
 0x116   : > { %1798 = vmatmul.bf16.gmra.mxu1 %v4456_v42  ;;  %1818 = vmatmul.bf16.gmra.mxu3 %v4460_v43 }
 0x117   : > { %1505 = vmatmul.bf16.gmra.mxu0 %v1429_v40  ;;  %1525 = vmatmul.bf16.gmra.mxu2 %v1433_v41 }
 0x126   : > { %1823 = vmatmul.bf16.gmra.mxu3 %v4461_v58  ;;  %1803 = vmatmul.bf16.gmra.mxu1 %v4457_v59 }
 0x127   : > { %1510 = vmatmul.bf16.gmra.mxu0 %v1430_v56  ;;  %1530 = vmatmul.bf16.gmra.mxu2 %v1434_v57 }
 0x151   : > { %v1168_v11 = vpop.xlane.xlu1 %1167 }
 0x152   : > { %v6175_v12 = vadd.f32 1e-12, %v1168_v11 }
 0x154   : > { %v1164_v8 = vpop.xlane.xlu0 %1163  ;;  %vm1237_vm2 = vweird.f32 %v6175_v12 }
 0x155   : > { %v1195_v10 = vadd.f32 1e-12, %v1164_v8  ;;  %v1172_v30 = vpop.xlane.xlu2 %1171 }
 0x156   : > { %v6195_v35 = vadd.f32 1e-12, %v1172_v30 }
 0x157   : > { %4854 = vrsqrt.f32 %v1195_v10  ;;  %vm1217_vm0 = vweird.f32 %v1195_v10 }
 0x158   : > { %4856 = vrsqrt.f32 %v6175_v12  ;;  %vm1257_vm7 = vweird.f32 %v6195_v35 }
 0x159   : > { %v1170_v36 = vpop.xlane.xlu1 %1169 }
 0x15a   : > { %v6207_v45 = vadd.f32 1e-12, %v1170_v36 }
 0x15c   : > { %v1166_v22 = vpop.xlane.xlu0 %1165  ;;  %vm1247_vm11 = vweird.f32 %v6207_v45 }
 0x15d   : > { %v6187_v24 = vpop.eup %4854  ;;  %v6189_v29 = vadd.f32 1e-12, %v1166_v22  ;;  %v1174_v52 = vpop.xlane.xlu2 %1173 }
 0x15e   : > { %v6191_v31 = vpop.eup %4856  ;;  %v1212_v34 = vmul.f32 %v6187_v24, %v1195_v10  ;;  %vm1218_vm1 = vweird.f32 %v6187_v24  ;;  %v6225_v58 = vadd.f32 1e-12, %v1174_v52 }
 0x15f   : > { %v1232_v40 = vmul.f32 %v6191_v31, %v6175_v12  ;;  %4858 = vrsqrt.f32 %v6189_v29  ;;  %vm6241_vm3 = vmor %vm1217_vm0, %vm1218_vm1  ;;  %vm1238_vm4 = vweird.f32 %v6191_v31  ;;  %vm1227_vm5 = vweird.f32 %v6189_v29 }
 0x160   : > { %v1213_v41 = vmul.f32 %v6187_v24, %v1212_v34  ;;  %4860 = vrsqrt.f32 %v6195_v35  ;;  %vm6270_vm8 = vmor %vm1237_vm2, %vm1238_vm4  ;;  %vm1267_vm15 = vweird.f32 %v6225_v58 }
 0x161   : > { %v1233_v42 = vmul.f32 %v6191_v31, %v1232_v40  ;;  %4862 = vrsqrt.f32 %v6207_v45  ;;  %v1178_v55 = vpop.xlane.xlu1 %1177 }
 0x162   : > { %v1214_v44 = vmul.f32 0.5, %v1213_v41  ;;  %4864 = vrsqrt.f32 %v6225_v58 }
 0x163   : > { %v1234_v49 = vmul.f32 0.5, %v1233_v42 }
 0x164   : > { %v1215_v51 = vsub.f32 1.5, %v1214_v44  ;;  %v1176_v40 = vpop.xlane.xlu0 %1175 }
 0x165   : > { %v6217_v53 = vpop.eup %4858 }
 0x166   : > { %v6219_v56 = vpop.eup %4860  ;;  %v1222_v57 = vmul.f32 %v6217_v53, %v6189_v29  ;;  %vm1228_vm6 = vweird.f32 %v6217_v53 }
 0x167   : > { %vm6281_vm9 = vmor %vm1227_vm5, %vm1228_vm6  ;;  %vm1258_vm10 = vweird.f32 %v6219_v56 }
 0x168   : > { %vm6311_vm13 = vmor %vm1257_vm7, %vm1258_vm10 }
 0x16b   : > { %v1184_v12 = vpop.xlane.xlu1 %1183 }
 0x173   : > { %v1789_v3 = vpop.f32.mrf.mxu1 }
 0x174   : > { %v1496_v1 = vpop.f32.mrf.mxu0  ;;  %v1790_v4 = vadd.f32 %v6160_v63, %v1789_v3  ;;  %v1235_v3 = vsub.f32 1.5, %v1234_v49  ;;  %v6275_v49 = vadd.f32 1e-12, %v1176_v40 }
 0x175   : > { %v1497_v2 = vadd.f32 %v6155_v62, %v1496_v1 }
 0x176   : > { %v6166_v6 = vpack.c.bf16 %v1790_v4, %v1790_v4  ;;  %v1252_v4 = vmul.f32 %v6219_v56, %v6195_v35  ;;  %v1236_v34 = vmul.f32 %v6191_v31, %v1235_v3  ;;  %vm1277_vm2 = vweird.f32 %v6275_v49 }
 0x177   : > { %v6164_v5 = vpack.c.bf16 %v1497_v2, %v1497_v2 }
 0x178   : > { %7572 = vst [vmem:[#allocation52_spill] sm:$0xff] %v6166_v6  ;;  %1861 = vrot.lane.b32.xlu2 %v6166_v6, %s5610_s12  ;;  %v1253_v30 = vmul.f32 %v6219_v56, %v1252_v4 }
 0x179   : > { %7571 = vst [vmem:[#allocation51_spill] sm:$0xff] %v6164_v5  ;;  %1568 = vrot.lane.b32.xlu1 %v6164_v5, %s5610_s12  ;;  %1632 = vrot.lane.b32.xlu0 %v6164_v5, %s5611_s16  ;;  %v1809_v18 = vpop.f32.mrf.mxu3 }
 0x17a   : > { %v1516_v7 = vpop.f32.mrf.mxu2  ;;  %v1810_v21 = vadd.f32 %v6160_v63, %v1809_v18  ;;  %v1223_v18 = vmul.f32 %v6217_v53, %v1222_v57  ;;  %v1254_v36 = vmul.f32 0.5, %v1253_v30  ;;  %v1240_v57 = vsel %vm6270_vm8, %v6191_v31, %v1236_v34 }
 0x17b   : > { %v1517_v9 = vadd.f32 %v6155_v62, %v1516_v7  ;;  %v1791_v39 = vpop.f32.mrf.mxu1  ;;  %v6315_v31 = vadd.f32 1e-12, %v1184_v12 }
 0x17c   : > { %v1498_v19 = vpop.f32.mrf.mxu0  ;;  %v6197_v38 = vpack.c.bf16 %v1810_v21, %v1810_v21  ;;  %v1792_v48 = vadd.f32 %v6160_v63, %v1791_v39  ;;  %v6261_v39 = vadd.f32 1e-12, %v1178_v55 }
 0x17d   : > { %v6177_v15 = vpack.c.bf16 %v1517_v9, %v1517_v9  ;;  %v1499_v33 = vadd.f32 %v6155_v62, %v1498_v19  ;;  %v1216_v9 = vmul.f32 %v6187_v24, %v1215_v51  ;;  %v6236_v19 = vpop.eup %4862  ;;  %v1255_v51 = vsub.f32 1.5, %v1254_v36 }
 0x17e   : > { %7574 = vst [vmem:[#allocation54_spill] sm:$0xff] %v6197_v38  ;;  %v6228_v2 = vpack.c.bf16 %v1792_v48, %v1792_v48  ;;  %v1242_v10 = vmul.f32 %v6236_v19, %v6207_v45  ;;  %4866 = vrsqrt.f32 %v6261_v39  ;;  %vm1248_vm12 = vweird.f32 %v6236_v19  ;;  %v6301_v3 = vpop.eup %4864 }
 0x17f   : > { %7573 = vst [vmem:[#allocation53_spill] sm:$0xff] %v6177_v15  ;;  %v6205_v43 = vpack.c.bf16 %v1499_v33, %v1499_v33  ;;  %v1224_v33 = vmul.f32 0.5, %v1223_v18  ;;  %v1220_v41 = vsel %vm6241_vm3, %v6187_v24, %v1216_v9  ;;  %4868 = vrsqrt.f32 %v6275_v49  ;;  %vm6328_vm14 = vmor %vm1247_vm11, %vm1248_vm12 }
 0x180   : > { %1616 = vrot.lane.b32.xlu2 %v6177_v15, %s5612_s14  ;;  %7575 = vst [vmem:[#allocation55_spill] sm:$0xff] %v6228_v2  ;;  %v1243_v48 = vmul.f32 %v6236_v19, %v1242_v10  ;;  %v6294_v55 = vmul.f32 %v1220_v41, %v6053_v13  ;;  %v1256_v9 = vmul.f32 %v6219_v56, %v1255_v51  ;;  %vm1268_vm0 = vweird.f32 %v6301_v3 }
 0x181   : > { %1600 = vrot.lane.b32.xlu1 %v6164_v5, %s5612_s14  ;;  %1584 = vrot.lane.b32.xlu0 %v6177_v15, %s5610_s12  ;;  %v1811_v54 = vpop.f32.mrf.mxu3  ;;  %v1225_v44 = vsub.f32 1.5, %v1224_v33  ;;  %vm1287_vm1 = vweird.f32 %v6261_v39  ;;  %vm6388_vm3 = vmor %vm1267_vm15, %vm1268_vm0  ;;  %vm1317_vm8 = vweird.f32 %v6315_v31 }
 0x182   : > { %v1518_v50 = vpop.f32.mrf.mxu2  ;;  %v1812_v7 = vadd.f32 %v6160_v63, %v1811_v54  ;;  %v1244_v54 = vmul.f32 0.5, %v1243_v48  ;;  %v1260_v10 = vsel %vm6311_vm13, %v6219_v56, %v1256_v9  ;;  %v1190_v48 = vpop.xlane.xlu1 %1189 }
 0x183   : > { %v1519_v59 = vadd.f32 %v6155_v62, %v1518_v50  ;;  %v1794_v11 = vpop.f32.mrf.mxu1  ;;  %v1180_v50 = vpop.xlane.xlu2 %1179  ;;  %v1226_v52 = vmul.f32 %v6217_v53, %v1225_v44 }
 0x184   : > { %v1501_v1 = vpop.f32.mrf.mxu0  ;;  %v1795_v22 = vadd.f32 %v6160_v63, %v1794_v11  ;;  %v6317_v11 = vpack.c.bf16 %v1812_v7, %v1812_v7 }
 0x185   : > { %v1502_v8 = vadd.f32 %v6155_v62, %v1501_v1  ;;  %v6291_v29 = vpack.c.bf16 %v1519_v59, %v1519_v59  ;;  %v6299_v1 = vadd.f32 1e-12, %v1180_v50  ;;  %v1230_v4 = vsel %vm6281_vm9, %v6217_v53, %v1226_v52 }
 0x186   : > { %v1245_v59 = vsub.f32 1.5, %v1244_v54  ;;  %7584 = vst [vmem:[#allocation56_spill] sm:$0xff] %v6317_v11  ;;  %v6322_v21 = vmul.f32 %v1230_v4, %v6065_v23  ;;  %v1262_v53 = vmul.f32 %v6301_v3, %v6225_v58  ;;  %v6338_v7 = vpack.c.bf16 %v1795_v22, %v1795_v22 }
 0x187   : > { %v6319_v18 = vpack.c.bf16 %v1502_v8, %v1502_v8  ;;  %v6341_v23 = vmul.f32 %v1240_v57, %v6055_v14  ;;  %4870 = vrsqrt.f32 %v6299_v1  ;;  %v6345_v8 = vpop.eup %4866  ;;  %v1182_v14 = vpop.xlane.xlu0 %1181  ;;  %v6384_v52 = vmul.f32 %v1260_v10, %v6067_v26 }
 0x188   : > { %1570 = vrot.lane.b32.xlu2 %v6205_v43, %s5610_s12  ;;  %7586 = vst [vmem:[#allocation58_spill] sm:$0xff] %v6322_v21  ;;  %v1246_v45 = vmul.f32 %v6236_v19, %v1245_v59  ;;  %v1263_v33 = vmul.f32 %v6301_v3, %v1262_v53  ;;  %4872 = vrsqrt.f32 %v6315_v31  ;;  %v6354_v22 = vpop.eup %4868  ;;  %v1282_v36 = vmul.f32 %v6345_v8, %v6261_v39 }
 0x189   : > { %1893 = vrot.lane.b32.xlu1 %v6166_v6, %s5612_s14  ;;  %1877 = vrot.lane.b32.xlu0 %v6197_v38, %s5610_s12  ;;  %7585 = vst [vmem:[#allocation57_spill] sm:$0xff] %v6319_v18  ;;  %v6364_v40 = vadd.f32 1e-12, %v1182_v14  ;;  %v1272_v44 = vmul.f32 %v6354_v22, %v6275_v49  ;;  %vm1288_vm4 = vweird.f32 %v6345_v8  ;;  %v6393_v4 = vadd.f32 1e-12, %v1190_v48 }
 0x18a   : > { %7589 = vst [vmem:[#allocation59_spill] sm:$0xff] %v6338_v7  ;;  %v1250_v34 = vsel %vm6328_vm14, %v6236_v19, %v1246_v45  ;;  %v1264_v42 = vmul.f32 0.5, %v1263_v33  ;;  %v1283_v56 = vmul.f32 %v6345_v8, %v1282_v36  ;;  %vm1278_vm5 = vweird.f32 %v6354_v22  ;;  %vm6418_vm7 = vmor %vm1287_vm1, %vm1288_vm4 }
 0x18b   : > { %7590 = vst [vmem:[#allocation60_spill] sm:$0xff] %v6341_v23  ;;  %v6367_v41 = vmul.f32 %v1250_v34, %v6073_v32  ;;  %4874 = vrsqrt.f32 %v6364_v40  ;;  %v1186_v19 = vpop.xlane.xlu2 %1185  ;;  %v1273_v24 = vmul.f32 %v6354_v22, %v1272_v44  ;;  %vm1297_vm6 = vweird.f32 %v6299_v1  ;;  %vm6432_vm9 = vmor %vm1277_vm2, %vm1278_vm5 }
 0x18c   : > { %v1265_v50 = vsub.f32 1.5, %v1264_v42  ;;  %v6379_v51 = vadd.f32 1e-12, %v1186_v19  ;;  %v1284_v57 = vmul.f32 0.5, %v1283_v56  ;;  %vm1307_vm11 = vweird.f32 %v6364_v40 }
 0x18d   : > { %v6381_v12 = vpop.eup %4870  ;;  %v1274_v59 = vmul.f32 0.5, %v1273_v24  ;;  %vm1347_vm4 = vweird.f32 %v6393_v4 }
 0x18e   : > { %v6395_v9 = vpop.eup %4872  ;;  %v1266_v13 = vmul.f32 %v6301_v3, %v1265_v50  ;;  %v1292_v26 = vmul.f32 %v6381_v12, %v6299_v1  ;;  %v1285_v58 = vsub.f32 1.5, %v1284_v57  ;;  %4876 = vrsqrt.f32 %v6379_v51 }
 0x18f   : > { %v1312_v35 = vmul.f32 %v6395_v9, %v6315_v31  ;;  %v1275_v33 = vsub.f32 1.5, %v1274_v59  ;;  %v1188_v10 = vpop.xlane.xlu0 %1187  ;;  %4878 = vrsqrt.f32 %v6393_v4  ;;  %vm1298_vm10 = vweird.f32 %v6381_v12 }
 0x190   : > { %1634 = vrot.lane.b32.xlu2 %v6205_v43, %s5611_s16  ;;  %v1270_v53 = vsel %vm6388_vm3, %v6301_v3, %v1266_v13  ;;  %v1293_v14 = vmul.f32 %v6381_v12, %v1292_v26  ;;  %v1286_v3 = vmul.f32 %v6345_v8, %v1285_v58  ;;  %vm6460_vm12 = vmor %vm1297_vm6, %vm1298_vm10  ;;  %vm1318_vm13 = vweird.f32 %v6395_v9  ;;  %v1521_v58 = vpop.f32.mrf.mxu2 }
 0x191   : > { %1648 = vrot.lane.b32.xlu1 %v6177_v15, %s5611_s16  ;;  %1602 = vrot.lane.b32.xlu0 %v6205_v43, %s5612_s14  ;;  %v4875_v34 = vpop.eup %4874  ;;  %v6425_v36 = vmul.f32 %v1270_v53, %v6081_v37  ;;  %v1313_v42 = vmul.f32 %v6395_v9, %v1312_v35  ;;  %v1276_v44 = vmul.f32 %v6354_v22, %v1275_v33  ;;  %vm6490_vm15 = vmor %vm1317_vm8, %vm1318_vm13  ;;  %vm1327_vm1 = vweird.f32 %v6379_v51 }
 0x192   : > { %v1294_v48 = vmul.f32 0.5, %v1293_v14  ;;  %v1302_v37 = vmul.f32 %v4875_v34, %v6364_v40  ;;  %v1290_v49 = vsel %vm6418_vm7, %v6345_v8, %v1286_v3  ;;  %vm1308_vm14 = vweird.f32 %v4875_v34 }
 0x193   : > { %v1314_v19 = vmul.f32 0.5, %v1313_v42  ;;  %v6448_v50 = vmul.f32 %v1290_v49, %v6090_v46  ;;  %v1280_v24 = vsel %vm6432_vm9, %v6354_v22, %v1276_v44  ;;  %v6465_v46 = vadd.f32 1e-12, %v1188_v10  ;;  %v1192_v44 = vpop.xlane.xlu2 %1191  ;;  %vm6500_vm0 = vmor %vm1307_vm11, %vm1308_vm14 }
 0x194   : > { %v1295_v54 = vsub.f32 1.5, %v1294_v48  ;;  %v1303_v57 = vmul.f32 %v4875_v34, %v1302_v37  ;;  %v6453_v13 = vpop.eup %4876  ;;  %v6456_v59 = vmul.f32 %v1280_v24, %v6092_v47  ;;  %v1522_v1 = vadd.f32 %v6155_v62, %v1521_v58 }
 0x195   : > { %v1315_v26 = vsub.f32 1.5, %v1314_v19  ;;  %v1322_v47 = vmul.f32 %v6453_v13, %v6379_v51  ;;  %v6470_v53 = vpop.eup %4878  ;;  %4880 = vrsqrt.f32 %v6465_v46  ;;  %vm1328_vm2 = vweird.f32 %v6453_v13 }
 0x196   : > { %v1296_v22 = vmul.f32 %v6381_v12, %v1295_v54  ;;  %v1304_v35 = vmul.f32 0.5, %v1303_v57  ;;  %v1342_v42 = vmul.f32 %v6470_v53, %v6393_v4  ;;  %v6507_v19 = vpack.c.bf16 %v1522_v1, %v1522_v1  ;;  %v1814_v57 = vpop.f32.mrf.mxu3  ;;  %vm6526_vm3 = vmor %vm1327_vm1, %vm1328_vm2 }
 0x197   : > { %v1316_v33 = vmul.f32 %v6395_v9, %v1315_v26  ;;  %v1323_v39 = vmul.f32 %v6453_v13, %v1322_v47  ;;  %v1194_v48 = vpop.xlane.xlu0 %1193  ;;  %v6512_v54 = vadd.f32 1e-12, %v1192_v44  ;;  %vm1348_vm5 = vweird.f32 %v6470_v53 }
 0x198   : > { %1586 = vrot.lane.b32.xlu2 %v6291_v29, %s5610_s12  ;;  %v1300_v14 = vsel %vm6460_vm12, %v6381_v12, %v1296_v22  ;;  %v1305_v3 = vsub.f32 1.5, %v1304_v35  ;;  %v1343_v49 = vmul.f32 %v6470_v53, %v1342_v42  ;;  %7603 = vst [vmem:[#allocation61_spill] sm:$0xff] %v6507_v19  ;;  %v6514_v40 = vadd.f32 1e-12, %v1194_v48  ;;  %vm6558_vm6 = vmor %vm1347_vm4, %vm1348_vm5 }
 0x199   : > { %1863 = vrot.lane.b32.xlu1 %v6228_v2, %s5610_s12  ;;  %1650 = vrot.lane.b32.xlu0 %v6291_v29, %s5611_s16  ;;  %v1324_v37 = vmul.f32 0.5, %v1323_v39  ;;  %v6510_v24 = vmul.f32 %v1300_v14, %v6069_v27  ;;  %v1320_v8 = vsel %vm6490_vm15, %v6395_v9, %v1316_v33  ;;  %4882 = vrsqrt.f32 %v6512_v54  ;;  %v1503_v9 = vpop.f32.mrf.mxu0 }
 0x19a   : > { %v1306_v31 = vmul.f32 %v4875_v34, %v1305_v3  ;;  %v1344_v22 = vmul.f32 0.5, %v1343_v49  ;;  %v6541_v51 = vmul.f32 %v1320_v8, %v6105_v60  ;;  %4884 = vrsqrt.f32 %v6514_v40 }
 0x19b   : > { %7604 = vst [vmem:[#allocation62_spill] sm:$0xff] %v6510_v24  ;;  %v1325_v58 = vsub.f32 1.5, %v1324_v37  ;;  %v4881_v35 = vpop.eup %4880  ;;  %v1504_v42 = vadd.f32 %v6155_v62, %v1503_v9  ;;  %vm1337_vm7 = vweird.f32 %v6465_v46  ;;  %vm1357_vm10 = vweird.f32 %v6512_v54 }
 0x19c   : > { %v1310_v26 = vsel %vm6500_vm0, %v4875_v34, %v1306_v31  ;;  %v1345_v34 = vsub.f32 1.5, %v1344_v22  ;;  %v1332_v33 = vmul.f32 %v4881_v35, %v6465_v46  ;;  %vm1338_vm8 = vweird.f32 %v4881_v35  ;;  %v1796_v46 = vpop.f32.mrf.mxu1 }
 0x19d   : > { %v6522_v47 = vmul.f32 %v1310_v26, %v6071_v28  ;;  %v1326_v1 = vmul.f32 %v6453_v13, %v1325_v58  ;;  %v1815_v28 = vadd.f32 %v6160_v63, %v1814_v57  ;;  %v6571_v57 = vpack.c.bf16 %v1504_v42, %v1504_v42  ;;  %vm6573_vm9 = vmor %vm1337_vm7, %vm1338_vm8  ;;  %v1523_v26 = vpop.f32.mrf.mxu2 }
 0x19e   : > { %v1346_v3 = vmul.f32 %v6470_v53, %v1345_v34  ;;  %v1333_v39 = vmul.f32 %v4881_v35, %v1332_v33  ;;  %v1797_v33 = vadd.f32 %v6160_v63, %v1796_v46  ;;  %vm1367_vm12 = vweird.f32 %v6514_v40 }
 0x19f   : > { %v1330_v10 = vsel %vm6526_vm3, %v6453_v13, %v1326_v1  ;;  %v4883_v12 = vpop.eup %4882  ;;  %v6563_v13 = vpack.c.bf16 %v1815_v28, %v1815_v28  ;;  %v1524_v28 = vadd.f32 %v6155_v62, %v1523_v26 }
 0x1a0   : > { %1879 = vrot.lane.b32.xlu2 %v6317_v11, %s5610_s12  ;;  %v6554_v60 = vmul.f32 %v1330_v10, %v6107_v61  ;;  %v1334_v48 = vmul.f32 0.5, %v1333_v39  ;;  %v1350_v61 = vsel %vm6558_vm6, %v6470_v53, %v1346_v3  ;;  %v1352_v4 = vmul.f32 %v4883_v12, %v6512_v54  ;;  %v4885_v49 = vpop.eup %4884 }
 0x1a1   : > { %1618 = vrot.lane.b32.xlu1 %v6291_v29, %s5612_s14  ;;  %1572 = vrot.lane.b32.xlu0 %v6319_v18, %s5610_s12  ;;  %7609 = vst [vmem:[#allocation63_spill] sm:$0xff] %v6563_v13  ;;  %v1362_v27 = vmul.f32 %v4885_v49, %v6514_v40  ;;  %v6583_v53 = vmul.f32 %v1350_v61, %v6125_v17  ;;  %vm1358_vm11 = vweird.f32 %v4883_v12  ;;  %vm1368_vm13 = vweird.f32 %v4885_v49  ;;  %v1506_v26 = vpop.f32.mrf.mxu0 }
 0x1a2   : > { %v1335_v37 = vsub.f32 1.5, %v1334_v48  ;;  %v1353_v22 = vmul.f32 %v4883_v12, %v1352_v4  ;;  %vm1359_vm14 = vmor %vm1357_vm10, %vm1358_vm11  ;;  %v6598_v42 = vpack.c.bf16 %v1524_v28, %v1524_v28  ;;  %v6600_v44 = vpack.c.bf16 %v1797_v33, %v1797_v33  ;;  %v1816_v48 = vpop.f32.mrf.mxu3 }
 0x1a3   : > { %v1363_v34 = vmul.f32 %v4885_v49, %v1362_v27  ;;  %vm1369_vm15 = vmor %vm1367_vm12, %vm1368_vm13  ;;  %v1817_v4 = vadd.f32 %v6160_v63, %v1816_v48 }
 0x1a4   : > { %v1336_v58 = vmul.f32 %v4881_v35, %v1335_v37  ;;  %v1354_v1 = vmul.f32 0.5, %v1353_v22  ;;  %7613 = vst [vmem:[#allocation65_spill] sm:$0xff] %v6600_v44 }
 0x1a5   : > { %v1364_v3 = vmul.f32 0.5, %v1363_v34  ;;  %v6617_v46 = vpack.c.bf16 %v1817_v4, %v1817_v4 }
 0x1a6   : > { %v1340_v9 = vsel %vm6573_vm9, %v4881_v35, %v1336_v58  ;;  %v1355_v17 = vsub.f32 1.5, %v1354_v1  ;;  %v1507_v58 = vadd.f32 %v6155_v62, %v1506_v26 }
 0x1a7   : > { %v6593_v10 = vmul.f32 %v1340_v9, %v6123_v16  ;;  %v1365_v39 = vsub.f32 1.5, %v1364_v3  ;;  %7615 = vst [vmem:[#allocation67_spill] sm:$0xff] %v6617_v46 }
 0x1a8   : > { %1604 = vrot.lane.b32.xlu2 %v6319_v18, %s5612_s14  ;;  %v1356_v35 = vmul.f32 %v4883_v12, %v1355_v17 }
 0x1a9   : > { %1636 = vrot.lane.b32.xlu1 %v6319_v18, %s5611_s16  ;;  %1865 = vrot.lane.b32.xlu0 %v6338_v7, %s5610_s12  ;;  %7612 = vst [vmem:[#allocation64_spill] sm:$0xff] %v6593_v10  ;;  %v1366_v16 = vmul.f32 %v4885_v49, %v1365_v39  ;;  %v1508_v28 = vpop.f32.mrf.mxu0 }
 0x1aa   : > { %v1360_v61 = vsel %vm1359_vm14, %v4883_v12, %v1356_v35  ;;  %v1819_v33 = vpop.f32.mrf.mxu3  ;;  %v1509_v3 = vadd.f32 %v6155_v62, %v1508_v28 }
 0x1ab   : > { %v6607_v40 = vmul.f32 %v1360_v61, %v6131_v20  ;;  %v1370_v37 = vsel %vm1369_vm15, %v4885_v49, %v1366_v16  ;;  %v6626_v20 = vpack.c.bf16 %v1507_v58, %v1507_v58  ;;  %v1526_v49 = vpop.f32.mrf.mxu2  ;;  %v1820_v17 = vadd.f32 %v6160_v63, %v1819_v33 }
 0x1ac   : > { %v6613_v8 = vmul.f32 %v1370_v37, %v6137_v25  ;;  %v1799_v25 = vpop.f32.mrf.mxu1  ;;  %v1527_v22 = vadd.f32 %v6155_v62, %v1526_v49  ;;  %v6654_v48 = vpack.c.bf16 %v1509_v3, %v1509_v3 }
 0x1ad   : > { %7616 = vst [vmem:[#allocation68_spill] sm:$0xff] %v6626_v20  ;;  %v1800_v27 = vadd.f32 %v6160_v63, %v1799_v25  ;;  %v6652_v39 = vpack.c.bf16 %v1820_v17, %v1820_v17 }
 0x1ae   : > { %7614 = vst [vmem:[#allocation66_spill] sm:$0xff] %v6613_v8  ;;  %v6638_v1 = vpack.c.bf16 %v1527_v22, %v1527_v22 }
 0x1af   : > { %v6640_v34 = vpack.c.bf16 %v1800_v27, %v1800_v27  ;;  %7621 = vst [vmem:[#allocation73_spill] sm:$0xff] %v6652_v39 }
 0x1b0   : > { %1652 = vrot.lane.b32.xlu2 %v6507_v19, %s5611_s16  ;;  %7618 = vst [vmem:[#allocation70_spill] sm:$0xff] %v6638_v1 }
 0x1b1   : > { %1588 = vrot.lane.b32.xlu1 %v6507_v19, %s5610_s12  ;;  %1620 = vrot.lane.b32.xlu0 %v6507_v19, %s5612_s14  ;;  %7619 = vst [vmem:[#allocation71_spill] sm:$0xff] %v6640_v34  ;;  %v1511_v28 = vpop.f32.mrf.mxu0 }
 0x1b2   : > { %v1821_v27 = vpop.f32.mrf.mxu3  ;;  %v1512_v17 = vadd.f32 %v6155_v62, %v1511_v28 }
 0x1b3   : > { %v1528_v26 = vpop.f32.mrf.mxu2  ;;  %v1822_v3 = vadd.f32 %v6160_v63, %v1821_v27 }
 0x1b4   : > { %v1801_v61 = vpop.f32.mrf.mxu1  ;;  %v1529_v58 = vadd.f32 %v6155_v62, %v1528_v26 }
 0x1b5   : > { %v1802_v16 = vadd.f32 %v6160_v63, %v1801_v61  ;;  %v6698_v28 = vpack.c.bf16 %v1822_v3, %v1822_v3 }
 0x1b6   : > { %v6680_v33 = vpack.c.bf16 %v1529_v58, %v1529_v58  ;;  %v6696_v58 = vpack.c.bf16 %v1512_v17, %v1512_v17 }
 0x1b7   : > { %v6665_v4 = vpack.c.bf16 %v1802_v16, %v1802_v16 }
 0x1b8   : > { %1574 = vrot.lane.b32.xlu2 %v6571_v57, %s5610_s12 }
 0x1b9   : > { %1881 = vrot.lane.b32.xlu1 %v6563_v13, %s5610_s12  ;;  %1638 = vrot.lane.b32.xlu0 %v6571_v57, %s5611_s16  ;;  %7623 = vst [vmem:[#allocation75_spill] sm:$0xff] %v6665_v4 }
 0x1ba   : > { %v1824_v31 = vpop.f32.mrf.mxu3 }
 0x1bb   : > { %v1531_v32 = vpop.f32.mrf.mxu2  ;;  %v1825_v54 = vadd.f32 %v6160_v63, %v1824_v31 }
 0x1bc   : > { %v1804_v30 = vpop.f32.mrf.mxu1  ;;  %v1532_v56 = vadd.f32 %v6155_v62, %v1531_v32 }
 0x1bd   : > { %v1805_v27 = vadd.f32 %v6160_v63, %v1804_v30 }
 0x1be   : > { %v6714_v14 = vpack.c.bf16 %v1532_v56, %v1532_v56 }
 0x1bf   : > { %v6716_v32 = vpack.c.bf16 %v1805_v27, %v1805_v27  ;;  %v6731_v27 = vpack.c.bf16 %v1825_v54, %v1825_v54 }
 0x1c0   : > { %1867 = vrot.lane.b32.xlu2 %v6600_v44, %s5610_s12  ;;  %7633 = vst [vmem:[#allocation85_spill] sm:$0xff] %v6714_v14 }
 0x1c1   : > { %1606 = vrot.lane.b32.xlu1 %v6571_v57, %s5612_s14  ;;  %1590 = vrot.lane.b32.xlu0 %v6598_v42, %s5610_s12  ;;  %7634 = vst [vmem:[#allocation86_spill] sm:$0xff] %v6716_v32 }
 0x1c2   : > { %7638 = vst [vmem:[#allocation90_spill] sm:$0xff] %v6731_v27 }
 0x1c4   : > { %v1806_v54 = vpop.f32.mrf.mxu1 }
 0x1c8   : > { %1622 = vrot.lane.b32.xlu2 %v6598_v42, %s5612_s14 }
 0x1c9   : > { %1654 = vrot.lane.b32.xlu1 %v6598_v42, %s5611_s16  ;;  %1883 = vrot.lane.b32.xlu0 %v6617_v46, %s5610_s12 }
 0x1d0   : > { %1640 = vrot.lane.b32.xlu2 %v6626_v20, %s5611_s16 }
 0x1d1   : > { %1576 = vrot.lane.b32.xlu1 %v6626_v20, %s5610_s12  ;;  %1608 = vrot.lane.b32.xlu0 %v6626_v20, %s5612_s14 }
 0x1d2   : > { %v6636_v9 = vpop.permute.xlu2 %1861 }
 0x1d3   : > { %7617 = vst [vmem:[#allocation69_spill] sm:$0xff] %v6636_v9 }
 0x1d8   : > { %1592 = vrot.lane.b32.xlu2 %v6638_v1, %s5610_s12 }
 0x1d9   : > { %1869 = vrot.lane.b32.xlu1 %v6640_v34, %s5610_s12  ;;  %1656 = vrot.lane.b32.xlu0 %v6638_v1, %s5611_s16 }
 0x1da   : > { %v6650_v35 = vpop.permute.xlu2 %1616 }
 0x1db   : > { %7620 = vst [vmem:[#allocation72_spill] sm:$0xff] %v6650_v35 }
 0x1e0   : > { %1885 = vrot.lane.b32.xlu2 %v6652_v39, %s5610_s12 }
 0x1e1   : > { %1624 = vrot.lane.b32.xlu1 %v6638_v1, %s5612_s14  ;;  %1578 = vrot.lane.b32.xlu0 %v6654_v48, %s5610_s12 }
 0x1e2   : > { %v6663_v37 = vpop.permute.xlu2 %1570 }
 0x1e3   : > { %7622 = vst [vmem:[#allocation74_spill] sm:$0xff] %v6663_v37 }
 0x1e8   : > { %1610 = vrot.lane.b32.xlu2 %v6654_v48, %s5612_s14 }
 0x1e9   : > { %1642 = vrot.lane.b32.xlu1 %v6654_v48, %s5611_s16  ;;  %1871 = vrot.lane.b32.xlu0 %v6665_v4, %s5610_s12 }
 0x1ea   : > { %v6678_v22 = vpop.permute.xlu2 %1634 }
 0x1eb   : > { %v6674_v25 = vpop.permute.xlu1 %1568  ;;  %v6676_v49 = vpop.permute.xlu0 %1632  ;;  %7626 = vst [vmem:[#allocation78_spill] sm:$0xff] %v6678_v22 }
 0x1ec   : > { %7624 = vst [vmem:[#allocation76_spill] sm:$0xff] %v6674_v25 }
 0x1ed   : > { %7625 = vst [vmem:[#allocation77_spill] sm:$0xff] %v6676_v49  ;;  %v1533_v49 = vpop.f32.mrf.mxu2 }
 0x1f0   : > { %1658 = vrot.lane.b32.xlu2 %v6680_v33, %s5611_s16 }
 0x1f1   : > { %1594 = vrot.lane.b32.xlu1 %v6680_v33, %s5610_s12  ;;  %1626 = vrot.lane.b32.xlu0 %v6680_v33, %s5612_s14 }
 0x1f2   : > { %v6694_v26 = vpop.permute.xlu2 %1586 }
 0x1f3   : > { %v6690_v61 = vpop.permute.xlu1 %1600  ;;  %v6692_v16 = vpop.permute.xlu0 %1584  ;;  %7629 = vst [vmem:[#allocation81_spill] sm:$0xff] %v6694_v26 }
 0x1f4   : > { %7627 = vst [vmem:[#allocation79_spill] sm:$0xff] %v6690_v61 }
 0x1f5   : > { %7628 = vst [vmem:[#allocation80_spill] sm:$0xff] %v6692_v16 }
 0x1f8   : > { %1580 = vrot.lane.b32.xlu2 %v6696_v58, %s5610_s12 }
 0x1f9   : > { %1887 = vrot.lane.b32.xlu1 %v6698_v28, %s5610_s12  ;;  %1644 = vrot.lane.b32.xlu0 %v6696_v58, %s5611_s16 }
 0x1fa   : > { %v6712_v3 = vpop.permute.xlu2 %1879 }
 0x1fb   : > { %v6708_v45 = vpop.permute.xlu1 %1893  ;;  %v6710_v17 = vpop.permute.xlu0 %1877  ;;  %7632 = vst [vmem:[#allocation84_spill] sm:$0xff] %v6712_v3 }
 0x1fc   : > { %7630 = vst [vmem:[#allocation82_spill] sm:$0xff] %v6708_v45  ;;  %v1513_v45 = vpop.f32.mrf.mxu0 }
 0x1fd   : > { %7631 = vst [vmem:[#allocation83_spill] sm:$0xff] %v6710_v17  ;;  %v1514_v31 = vadd.f32 %v6155_v62, %v1513_v45  ;;  %v1534_v45 = vadd.f32 %v6155_v62, %v1533_v49 }
 0x1ff   : > { %v6746_v22 = vpack.c.bf16 %v1514_v31, %v1514_v31  ;;  %v6764_v25 = vpack.c.bf16 %v1534_v45, %v1534_v45 }
 0x200   : > { %1873 = vrot.lane.b32.xlu2 %v6716_v32, %s5610_s12 }
 0x201   : > { %1612 = vrot.lane.b32.xlu1 %v6696_v58, %s5612_s14  ;;  %1596 = vrot.lane.b32.xlu0 %v6714_v14, %s5610_s12 }
 0x202   : > { %v6729_v56 = vpop.permute.xlu2 %1604 }
 0x203   : > { %v6725_v30 = vpop.permute.xlu1 %1648  ;;  %v6727_v12 = vpop.permute.xlu0 %1602  ;;  %7637 = vst [vmem:[#allocation89_spill] sm:$0xff] %v6729_v56 }
 0x204   : > { %7635 = vst [vmem:[#allocation87_spill] sm:$0xff] %v6725_v30  ;;  %v1826_v56 = vpop.f32.mrf.mxu3  ;;  %v6823_v30 = vld [vmem:[%s902_s0] sm:$0xff] }
 0x205   : > { %7636 = vst [vmem:[#allocation88_spill] sm:$0xff] %v6727_v12  ;;  %v1807_v12 = vadd.f32 %v6160_v63, %v1806_v54 }
 0x207   : > { %v6762_v37 = vpack.c.bf16 %v1807_v12, %v1807_v12 }
 0x208   : > { %1628 = vrot.lane.b32.xlu2 %v6714_v14, %s5612_s14 }
 0x209   : > { %1660 = vrot.lane.b32.xlu1 %v6714_v14, %s5611_s16  ;;  %1889 = vrot.lane.b32.xlu0 %v6731_v27, %s5610_s12  ;;  %7645 = vst [vmem:[#allocation97_spill] sm:$0xff] %v6762_v37 }
 0x20a   : > { %v6744_v17 = vpop.permute.xlu2 %1652 }
 0x20b   : > { %v6740_v9 = vpop.permute.xlu1 %1863  ;;  %v6742_v3 = vpop.permute.xlu0 %1650  ;;  %7641 = vst [vmem:[#allocation93_spill] sm:$0xff] %v6744_v17 }
 0x20c   : > { %7639 = vst [vmem:[#allocation91_spill] sm:$0xff] %v6740_v9 }
 0x20d   : > { %7640 = vst [vmem:[#allocation92_spill] sm:$0xff] %v6742_v3 }
 0x210   : > { %1646 = vrot.lane.b32.xlu2 %v6746_v22, %s5611_s16 }
 0x211   : > { %1582 = vrot.lane.b32.xlu1 %v6746_v22, %s5610_s12  ;;  %1614 = vrot.lane.b32.xlu0 %v6746_v22, %s5612_s14 }
 0x212   : > { %v6760_v31 = vpop.permute.xlu2 %1574 }
 0x213   : > { %v6756_v9 = vpop.permute.xlu1 %1618  ;;  %v6758_v61 = vpop.permute.xlu0 %1572  ;;  %7644 = vst [vmem:[#allocation96_spill] sm:$0xff] %v6760_v31  ;;  %v1827_v31 = vadd.f32 %v6160_v63, %v1826_v56 }
 0x214   : > { %7642 = vst [vmem:[#allocation94_spill] sm:$0xff] %v6756_v9 }
 0x215   : > { %7643 = vst [vmem:[#allocation95_spill] sm:$0xff] %v6758_v61 }
 0x218   : > { %1598 = vrot.lane.b32.xlu2 %v6764_v25, %s5610_s12 }
 0x219   : > { %1875 = vrot.lane.b32.xlu1 %v6762_v37, %s5610_s12  ;;  %1662 = vrot.lane.b32.xlu0 %v6764_v25, %s5611_s16 }
 0x21a   : > { %v6776_v54 = vpop.permute.xlu2 %1867 }
 0x21b   : > { %v6772_v62 = vpop.permute.xlu1 %1636  ;;  %v6774_v49 = vpop.permute.xlu0 %1865  ;;  %7648 = vst [vmem:[#allocation100_spill] sm:$0xff] %v6776_v54 }
 0x21c   : > { %7646 = vst [vmem:[#allocation98_spill] sm:$0xff] %v6772_v62  ;;  %v6789_v62 = vpack.c.bf16 %v1827_v31, %v1827_v31 }
 0x21d   : > { %7647 = vst [vmem:[#allocation99_spill] sm:$0xff] %v6774_v49 }
 0x21e   : > { %7652 = vst [vmem:[#allocation104_spill] sm:$0xff] %v6789_v62 }
 0x220   : > { %1895 = vrot.lane.b32.xlu2 %v6228_v2, %s5612_s14 }
 0x221   : > { %1630 = vrot.lane.b32.xlu1 %v6764_v25, %s5612_s14 }
 0x222   : > { %v6787_v61 = vpop.permute.xlu2 %1622 }
 0x223   : > { %v6782_v12 = vpop.permute.xlu1 %1588  ;;  %v6784_v45 = vpop.permute.xlu0 %1620  ;;  %7651 = vst [vmem:[#allocation103_spill] sm:$0xff] %v6787_v61 }
 0x224   : > { %7649 = vst [vmem:[#allocation101_spill] sm:$0xff] %v6782_v12 }
 0x225   : > { %7650 = vst [vmem:[#allocation102_spill] sm:$0xff] %v6784_v45 }
 0x228   : > { %1891 = vrot.lane.b32.xlu2 %v6789_v62, %s5610_s12 }
 0x229   : > { %1897 = vrot.lane.b32.xlu1 %v6338_v7, %s5612_s14 }
 0x22a   : > { %v6799_v3 = vpop.permute.xlu2 %1640 }
 0x22b   : > { %v6795_v54 = vpop.permute.xlu1 %1881  ;;  %v6797_v49 = vpop.permute.xlu0 %1638  ;;  %7655 = vst [vmem:[#allocation107_spill] sm:$0xff] %v6799_v3 }
 0x22c   : > { %7653 = vst [vmem:[#allocation105_spill] sm:$0xff] %v6795_v54 }
 0x22d   : > { %7654 = vst [vmem:[#allocation106_spill] sm:$0xff] %v6797_v49 }
 0x230   : > { %1899 = vrot.lane.b32.xlu2 %v6600_v44, %s5612_s14 }
 0x231   : > { %1901 = vrot.lane.b32.xlu1 %v6640_v34, %s5612_s14 }
 0x232   : > { %v6809_v31 = vpop.permute.xlu2 %1592 }
 0x233   : > { %v6805_v63 = vpop.permute.xlu1 %1606  ;;  %v6807_v56 = vpop.permute.xlu0 %1590 }
 0x234   : > { %7656 = vst [vmem:[#allocation108_spill] sm:$0xff] %v6805_v63 }
 0x235   : > { %7657 = vst [vmem:[#allocation109_spill] sm:$0xff] %v6807_v56 }
 0x238   : > { %1903 = vrot.lane.b32.xlu2 %v6665_v4, %s5612_s14 }
 0x239   : > { %1905 = vrot.lane.b32.xlu1 %v6716_v32, %s5612_s14 }
 0x23a   : > { %v6819_v3 = vpop.permute.xlu2 %1885 }
 0x23b   : > { %v6815_v54 = vpop.permute.xlu1 %1654  ;;  %v6817_v49 = vpop.permute.xlu0 %1883  ;;  %7660 = vst [vmem:[#allocation112_spill] sm:$0xff] %v6819_v3 }
 0x23c   : > { %7658 = vst [vmem:[#allocation110_spill] sm:$0xff] %v6815_v54 }
 0x23d   : > { %7659 = vst [vmem:[#allocation111_spill] sm:$0xff] %v6817_v49 }
 0x240   : > { %1907 = vrot.lane.b32.xlu2 %v6762_v37, %s5612_s14 }
 0x241   : > { %1909 = vrot.lane.b32.xlu1 %v6197_v38, %s5612_s14 }
 0x242   : > { %v6834_v35 = vpop.permute.xlu2 %1610 }
 0x243   : > { %v6829_v63 = vpop.permute.xlu1 %1576  ;;  %v6831_v9 = vpop.permute.xlu0 %1608  ;;  %1957 = vadd.xlane.f32.xlu0 %v6823_v30  ;;  %7663 = vst [vmem:[#allocation115_spill] sm:$0xff] %v6834_v35 }
 0x244   : > { %7661 = vst [vmem:[#allocation113_spill] sm:$0xff] %v6829_v63 }
 0x245   : > { %7662 = vst [vmem:[#allocation114_spill] sm:$0xff] %v6831_v9 }
 0x248   : > { %1911 = vrot.lane.b32.xlu2 %v6317_v11, %s5612_s14 }
 0x24a   : > { %v6842_v26 = vpop.permute.xlu2 %1658 }
 0x24b   : > { %v6838_v49 = vpop.permute.xlu1 %1869  ;;  %v6840_v3 = vpop.permute.xlu0 %1656 }
 0x24c   : > { %7664 = vst [vmem:[#allocation116_spill] sm:$0xff] %v6838_v49 }
 0x24d   : > { %7665 = vst [vmem:[#allocation117_spill] sm:$0xff] %v6840_v3 }
 0x250   : > { %1915 = vrot.lane.b32.xlu2 %v6617_v46, %s5612_s14 }
 0x252   : > { %v6850_v9 = vpop.permute.xlu2 %1580 }
 0x253   : > { %v6846_v16 = vpop.permute.xlu1 %1624  ;;  %v6848_v63 = vpop.permute.xlu0 %1578  ;;  %7668 = vst [vmem:[#allocation120_spill] sm:$0xff] %v6850_v9 }
 0x254   : > { %7666 = vst [vmem:[#allocation118_spill] sm:$0xff] %v6846_v16 }
 0x255   : > { %7667 = vst [vmem:[#allocation119_spill] sm:$0xff] %v6848_v63 }
 0x257   : > { %1913 = vrot.lane.b32.xlu0 %v6563_v13, %s5612_s14 }
 0x258   : > { %1917 = vrot.lane.b32.xlu2 %v6652_v39, %s5612_s14 }
 0x25a   : > { %v6860_v54 = vpop.permute.xlu2 %1873 }
 0x25b   : > { %v6856_v49 = vpop.permute.xlu1 %1642  ;;  %v6858_v35 = vpop.permute.xlu0 %1871  ;;  %7671 = vst [vmem:[#allocation123_spill] sm:$0xff] %v6860_v54 }
 0x25c   : > { %7669 = vst [vmem:[#allocation121_spill] sm:$0xff] %v6856_v49 }
 0x25d   : > { %7670 = vst [vmem:[#allocation122_spill] sm:$0xff] %v6858_v35 }
 0x25f   : > { %1921 = vrot.lane.b32.xlu0 %v6731_v27, %s5612_s14 }
 0x260   : > { %1919 = vrot.lane.b32.xlu2 %v6698_v28, %s5612_s14 }
 0x262   : > { %v6870_v17 = vpop.permute.xlu2 %1628 }
 0x263   : > { %v6866_v63 = vpop.permute.xlu1 %1594  ;;  %v6868_v9 = vpop.permute.xlu0 %1626  ;;  %7673 = vst [vmem:[#allocation125_spill] sm:$0xff] %v6870_v17 }
 0x264   : > { %7672 = vst [vmem:[#allocation124_spill] sm:$0xff] %v6868_v9 }
 0x267   : > { %1925 = vrot.lane.b32.xlu0 %v6166_v6, %s5611_s16 }
 0x268   : > { %1923 = vrot.lane.b32.xlu2 %v6789_v62, %s5612_s14 }
 0x26a   : > { %v6880_v49 = vpop.permute.xlu2 %1646 }
 0x26b   : > { %v6876_v35 = vpop.permute.xlu1 %1887  ;;  %v6878_v54 = vpop.permute.xlu0 %1644  ;;  %7676 = vst [vmem:[#allocation128_spill] sm:$0xff] %v6880_v49 }
 0x26c   : > { %7674 = vst [vmem:[#allocation126_spill] sm:$0xff] %v6876_v35 }
 0x26d   : > { %7675 = vst [vmem:[#allocation127_spill] sm:$0xff] %v6878_v54 }
 0x26f   : > { %1929 = vrot.lane.b32.xlu0 %v6338_v7, %s5611_s16 }
 0x270   : > { %1927 = vrot.lane.b32.xlu2 %v6228_v2, %s5611_s16 }
 0x272   : > { %v6890_v6 = vpop.permute.xlu2 %1598 }
 0x273   : > { %v6886_v61 = vpop.permute.xlu1 %1612  ;;  %v6888_v45 = vpop.permute.xlu0 %1596  ;;  %7678 = vst [vmem:[#allocation130_spill] sm:$0xff] %v6890_v6 }
 0x274   : > { %7677 = vst [vmem:[#allocation129_spill] sm:$0xff] %v6886_v61 }
 0x277   : > { %1935 = vrot.lane.b32.xlu0 %v6665_v4, %s5611_s16 }
 0x278   : > { %1933 = vrot.lane.b32.xlu2 %v6640_v34, %s5611_s16 }
 0x27a   : > { %v6900_v7 = vpop.permute.xlu2 %1895 }
 0x27b   : > { %v6896_v35 = vpop.permute.xlu1 %1660  ;;  %v6898_v49 = vpop.permute.xlu0 %1889  ;;  %7680 = vst [vmem:[#allocation132_spill] sm:$0xff] %v6900_v7 }
 0x27c   : > { %7679 = vst [vmem:[#allocation131_spill] sm:$0xff] %v6898_v49 }
 0x27f   : > { %1939 = vrot.lane.b32.xlu0 %v6762_v37, %s5611_s16 }
 0x280   : > { %1937 = vrot.lane.b32.xlu2 %v6716_v32, %s5611_s16  ;;  %v5613_v32 = vmov 128.0  }
 0x281   : > { %4886 = vrcp.f32 %v5613_v32 }
 0x282   : > { %v6910_v4 = vpop.permute.xlu2 %1891 }
 0x283   : > { %v6906_v2 = vpop.permute.xlu1 %1582  ;;  %v6908_v54 = vpop.permute.xlu0 %1614  ;;  %7683 = vst [vmem:[#allocation135_spill] sm:$0xff] %v6910_v4 }
 0x284   : > { %7681 = vst [vmem:[#allocation133_spill] sm:$0xff] %v6906_v2 }
 0x285   : > { %7682 = vst [vmem:[#allocation134_spill] sm:$0xff] %v6908_v54 }
 0x287   : > { %1943 = vrot.lane.b32.xlu0 %v6317_v11, %s5611_s16  ;;  %v4887_v11 = vpop.eup %4886 }
 0x288   : > { %1941 = vrot.lane.b32.xlu2 %v6197_v38, %s5611_s16  ;;  %vm1964_vm0 = vweird.f32 %v4887_v11 }
 0x28a   : > { %v6920_v34 = vpop.permute.xlu2 %1899 }
 0x28b   : > { %v6916_v49 = vpop.permute.xlu1 %1875  ;;  %v6918_v7 = vpop.permute.xlu0 %1662  ;;  %7686 = vst [vmem:[#allocation138_spill] sm:$0xff] %v6920_v34 }
 0x28c   : > { %7684 = vst [vmem:[#allocation136_spill] sm:$0xff] %v6916_v49 }
 0x28d   : > { %7685 = vst [vmem:[#allocation137_spill] sm:$0xff] %v6918_v7 }
 0x28f   : > { %1949 = vrot.lane.b32.xlu0 %v6652_v39, %s5611_s16  ;;  %v1960_v39 = vmul.f32 128.0, %v4887_v11 }
 0x290   : > { %1947 = vrot.lane.b32.xlu2 %v6617_v46, %s5611_s16 }
 0x291   : > { %v1961_v54 = vsub.f32 1.0, %v1960_v39 }
 0x292   : > { %v6928_v4 = vpop.permute.xlu2 %1903 }
 0x293   : > { %v6926_v37 = vpop.permute.xlu1 %1630  ;;  %7687 = vst [vmem:[#allocation139_spill] sm:$0xff] %v6928_v4 }
 0x297   : > { %1955 = vrot.lane.b32.xlu0 %v6789_v62, %s5611_s16  ;;  %v1962_v62 = vmul.f32 %v4887_v11, %v1961_v54 }
 0x298   : > { %1953 = vrot.lane.b32.xlu2 %v6731_v27, %s5611_s16 }
 0x299   : > { %v1963_v2 = vadd.f32 %v4887_v11, %v1962_v62 }
 0x29a   : > { %v6936_v34 = vpop.permute.xlu2 %1907 }
 0x29b   : > { %v6934_v49 = vpop.permute.xlu1 %1897  ;;  %7689 = vst [vmem:[#allocation141_spill] sm:$0xff] %v6936_v34  ;;  %v6950_v32 = vsel %vm1964_vm0, %v4887_v11, %v1963_v2 }
 0x29c   : > { %7688 = vst [vmem:[#allocation140_spill] sm:$0xff] %v6934_v49 }
 0x29d   : > { %7696 = vst [vmem:[#allocation148_spill] sm:$0xff] %v6950_v32 }
 0x2a2   : > { %v6940_v46 = vpop.permute.xlu2 %1911 }
 0x2a3   : > { %v6938_v38 = vpop.permute.xlu1 %1901  ;;  %7691 = vst [vmem:[#allocation143_spill] sm:$0xff] %v6940_v46 }
 0x2a4   : > { %7690 = vst [vmem:[#allocation142_spill] sm:$0xff] %v6938_v38 }
 0x2aa   : > { %v6944_v61 = vpop.permute.xlu2 %1915 }
 0x2ab   : > { %v6942_v4 = vpop.permute.xlu1 %1905  ;;  %7693 = vst [vmem:[#allocation145_spill] sm:$0xff] %v6944_v61 }
 0x2ac   : > { %7692 = vst [vmem:[#allocation144_spill] sm:$0xff] %v6942_v4 }
 0x2b2   : > { %v6948_v49 = vpop.permute.xlu2 %1917 }
 0x2b3   : > { %v6946_v27 = vpop.permute.xlu1 %1909  ;;  %7695 = vst [vmem:[#allocation147_spill] sm:$0xff] %v6948_v49 }
 0x2b4   : > { %7694 = vst [vmem:[#allocation146_spill] sm:$0xff] %v6946_v27 }
 0x2b6   : > { %v1958_v34 = vpop.xlane.xlu0 %1957 }
 0x2b7   : > { %v1966_v38 = vmul.f32 %v6950_v32, %v1958_v34 }
 0x2b9   : > { %v1967_v46 = vsub.f32 %v6823_v30, %v1966_v38 }
 0x2ba   : > { %v6954_v39 = vpop.permute.xlu2 %1919 }
 0x2bb   : > { %v1968_v56 = vmul.f32 %v1967_v46, %v1967_v46  ;;  %7697 = vst [vmem:[#allocation149_spill] sm:$0xff] %v6954_v39 }
 0x2bd   : > { %1969 = vadd.xlane.f32.xlu1 %v1968_v56 }
 0x2c2   : > { %v6956_v4 = vpop.permute.xlu2 %1923 }
 0x2c3   : > { %7698 = vst [vmem:[#allocation150_spill] sm:$0xff] %v6956_v4 }
 0x2c9   : > { %v6958_v54 = vpop.permute.xlu0 %1913 }
 0x2ca   : > { %7699 = vst [vmem:[#allocation151_spill] sm:$0xff] %v6958_v54  ;;  %v6960_v62 = vpop.permute.xlu2 %1927 }
 0x2cb   : > { %7700 = vst [vmem:[#allocation152_spill] sm:$0xff] %v6960_v62 }
 0x2d1   : > { %v6962_v27 = vpop.permute.xlu0 %1921 }
 0x2d2   : > { %7701 = vst [vmem:[#allocation153_spill] sm:$0xff] %v6962_v27  ;;  %v6964_v61 = vpop.permute.xlu2 %1933 }
 0x2d3   : > { %7702 = vst [vmem:[#allocation154_spill] sm:$0xff] %v6964_v61 }
 0x2d6   : > { %1931 = vrot.lane.b32.xlu1 %v6600_v44, %s5611_s16 }
 0x2d9   : > { %v6968_v2 = vpop.permute.xlu0 %1925 }
 0x2da   : > { %7703 = vst [vmem:[#allocation155_spill] sm:$0xff] %v6968_v2  ;;  %v6970_v38 = vpop.permute.xlu2 %1937 }
 0x2db   : > { %7704 = vst [vmem:[#allocation156_spill] sm:$0xff] %v6970_v38 }
 0x2de   : > { %1945 = vrot.lane.b32.xlu1 %v6563_v13, %s5611_s16 }
 0x2e1   : > { %v6974_v11 = vpop.permute.xlu0 %1929 }
 0x2e2   : > { %7705 = vst [vmem:[#allocation157_spill] sm:$0xff] %v6974_v11  ;;  %v6976_v34 = vpop.permute.xlu2 %1941 }
 0x2e3   : > { %7706 = vst [vmem:[#allocation158_spill] sm:$0xff] %v6976_v34 }
 0x2e6   : > { %1951 = vrot.lane.b32.xlu1 %v6698_v28, %s5611_s16 }
 0x2e9   : > { %v6980_v30 = vpop.permute.xlu0 %1935 }
 0x2ea   : > { %7707 = vst [vmem:[#allocation159_spill] sm:$0xff] %v6980_v30  ;;  %v6982_v56 = vpop.permute.xlu2 %1947 }
 0x2eb   : > { %7708 = vst [vmem:[#allocation160_spill] sm:$0xff] %v6982_v56  ;;  %v6995_v56 = vld [vmem:[#allocation10] sm:$0xf] }
 0x2f1   : > { %v6984_v62 = vpop.permute.xlu0 %1939 }
 0x2f2   : > { %7709 = vst [vmem:[#allocation161_spill] sm:$0xff] %v6984_v62  ;;  %v6986_v54 = vpop.permute.xlu2 %1953 }
 0x2f3   : > { %7710 = vst [vmem:[#allocation162_spill] sm:$0xff] %v6986_v54 }
 0x2f9   : > { %v6988_v2 = vpop.permute.xlu0 %1943 }
 0x2fa   : > { %7711 = vst [vmem:[#allocation163_spill] sm:$0xff] %v6988_v2  ;;  %v7000_v2 = vld [vmem:[%s7714_s25] sm:$0xf] }
 0x301   : > { %v6990_v61 = vpop.permute.xlu0 %1949 }
 0x302   : > { %7712 = vst [vmem:[#allocation164_spill] sm:$0xff] %v6990_v61 }
 0x309   : > { %v6992_v39 = vpop.permute.xlu0 %1955 }
 0x30a   : > { %7713 = vst [vmem:[#allocation165_spill] sm:$0xff] %v6992_v39 }
 0x330   : > { %v1970_v11 = vpop.xlane.xlu1 %1969 }
 0x331   : > { %v1971_v49 = vmul.f32 %v1970_v11, %v6950_v32 }
 0x333   : > { %v1972_v38 = vadd.f32 1e-05, %v1971_v49  ;;  %v1984_v49 = vperm.slane %v6995_v56, 0 }
 0x335   : > { %4888 = vrsqrt.f32 %v1972_v38  ;;  %vm1979_vm2 = vweird.f32 %v1972_v38 }
 0x33b   : > { %v4889_v34 = vpop.eup %4888 }
 0x33c   : > { %v1974_v4 = vmul.f32 %v4889_v34, %v1972_v38  ;;  %vm1980_vm1 = vweird.f32 %v4889_v34 }
 0x33d   : > { %vm1981_vm3 = vmor %vm1979_vm2, %vm1980_vm1 }
 0x33e   : > { %v1975_v30 = vmul.f32 %v4889_v34, %v1974_v4  ;;  %v1986_v4 = vperm.slane %v7000_v2, 0 }
 0x340   : > { %v1976_v27 = vmul.f32 0.5, %v1975_v30 }
 0x342   : > { %v1977_v62 = vsub.f32 1.5, %v1976_v27 }
 0x344   : > { %v1978_v61 = vmul.f32 %v4889_v34, %v1977_v62 }
 0x346   : > { %v1982_v11 = vsel %vm1981_vm3, %v4889_v34, %v1978_v61 }
 0x347   : > { %v1983_v30 = vmul.f32 %v1982_v11, %v1967_v46 }
 0x348   : > { %v7004_v32 = vpop.permute.xlu1 %1931 }
 0x349   : > { %v1985_v39 = vmul.f32 %v1984_v49, %v1983_v30 }
 0x34b   : > { %v1987_v27 = vadd.f32 %v1986_v4, %v1985_v39  }
 0x350   : > { %v7006_v54 = vpop.permute.xlu1 %1945 }
 0x358   : > { %v7008_v44 = vpop.permute.xlu1 %1951 }
 0x359 LB: >> { %v7715_v8 = vld [vmem:[#allocation66_spill] sm:$0xff]  ;;  %v1995_v61 = vmul.f32 %v5576_v27, %v5576_v27  ;;  %v7717_v10 = vld [vmem:[#allocation64_spill] sm:$0xff]  ;;  %v7719_v62 = vpack.c.bf16 %v6554_v60, %v6541_v51  ;;  %v7722_v34 = vpack.c.bf16 %v6448_v50, %v6456_v59  ;;  %v7723_v49 = vpack.c.bf16 %v6425_v36, %v6384_v52  ;;  %s5590_s17 = smov 0   ;;  %s5580_s18 = sphi %s7014_s18, %s1993_s18   ;;  %v5576_v27 = vphi %v1987_v27, %v7844_v27  }
 0x35a   : >> { %v7716_v46 = vpack.c.bf16 %v7715_v8, %v6607_v40  ;;  %v7718_v39 = vpack.c.bf16 %v6583_v53, %v7717_v10  ;;  %v7720_v24 = vld [vmem:[#allocation62_spill] sm:$0xff]  ;;  %v7724_v23 = vld [vmem:[#allocation60_spill] sm:$0xff] }
 0x35b   : >> { %1996 = vadd.xlane.f32.xlu0 %v1995_v61  ;;  %v7721_v38 = vpack.c.bf16 %v6522_v47, %v7720_v24  ;;  %v7725_v11 = vpack.c.bf16 %v6367_v41, %v7724_v23  ;;  %v7726_v21 = vld [vmem:[#allocation58_spill] sm:$0xff] }
 0x35c   : >> { %2011 = vmatpush.bf16.xpose.msra.mxu0 %v7716_v46  ;;  %v7727_v4 = vpack.c.bf16 %v7726_v21, %v6294_v55 }
 0x364   : >> { %2012 = vmatpush.bf16.xpose.msra.mxu0 %v7718_v39 }
 0x36c   : >> { %2013 = vmatpush.bf16.xpose.msra.mxu0 %v7719_v62 }
 0x374   : >> { %2014 = vmatpush.bf16.xpose.msra.mxu0 %v7721_v38 }
 0x37c   : >> { %2015 = vmatpush.bf16.xpose.msra.mxu0 %v7722_v34 }
 0x384   : >> { %2016 = vmatpush.bf16.xpose.msra.mxu0 %v7723_v49 }
 0x38c   : >> { %2017 = vmatpush.bf16.xpose.msra.mxu0 %v7725_v11 }
 0x394   : >> { %2018 = vmatpush.bf16.xpose.msra.mxu0 %v7727_v4  ;;  %v5582_v4 = vmov 0.0  }
 0x3ce   : >> { %v1997_v30 = vpop.xlane.xlu0 %1996 }
 0x3cf   : >> { %v1998_v46 = vadd.f32 1e-12, %v1997_v30 }
 0x3d1   : >> { %4890 = vrsqrt.f32 %v1998_v46  ;;  %vm2005_vm5 = vweird.f32 %v1998_v46 }
 0x3d7   : >> { %v4891_v61 = vpop.eup %4890 }
 0x3d8   : >> { %v2000_v39 = vmul.f32 %v4891_v61, %v1998_v46  ;;  %vm2006_vm4 = vweird.f32 %v4891_v61 }
 0x3d9   : >> { %vm2007_vm6 = vmor %vm2005_vm5, %vm2006_vm4 }
 0x3da   : >> { %v2001_v62 = vmul.f32 %v4891_v61, %v2000_v39 }
 0x3dc   : >> { %v2002_v38 = vmul.f32 0.5, %v2001_v62 }
 0x3de   : >> { %v2003_v34 = vsub.f32 1.5, %v2002_v38 }
 0x3e0   : >> { %v2004_v8 = vmul.f32 %v4891_v61, %v2003_v34 }
 0x3e2   : >> { %v2008_v49 = vsel %vm2007_vm6, %v4891_v61, %v2004_v8 }
 0x3e3   : >> { %v2009_v10 = vmul.f32 %v5576_v27, %v2008_v49 }
 0x3e5   : >> { %v2010_v11 = vpack.c.bf16 %v2009_v10, %v2009_v10 }
 0x3e7   : >> { %2019 = vmatmul.bf16.vlgmr.msra.gmra.mxu0 %v2010_v11 }
 0x464   : >> { %v2020_v23 = vpop.f32.mrf.mxu0  }
 0x465   : >> { %v5586_v24 = vmov %v2020_v23  }
 0x46c   : >> { %v2022_v21 = vpop.f32.mrf.mxu0 }
 0x46d LB: >>> { %2032 = vmax.xlane.f32.xlu0 %v5588_v24  ;;  %v5614_v46 = vmov 0.0   ;;  %s2029_s17 = sadd.s32 1, %s5592_s17   ;;  %s5592_s17 = sphi %s5590_s17, %s2029_s17   ;;  %v5588_v24 = vphi %v5586_v24, %v2038_v24   ;;  %v5584_v4 = vphi %v5582_v4, %v5583_v4  }
 0x46e   : >>> { %p2026_p9 = scmp.ge.s32.totalorder %s2029_s17, 4  }
 0x46f   : >> { %v4485_v21 = vld [vmem:[#allocation11 + $0x38] sm:$0xff] (%p2026_p9)  ;;  %v2146_v10 = vunpack.c.l.b16 (%p2026_p9), %v6764_v25  ;;  %v4484_v61 = vld [vmem:[#allocation11 + $0x30] sm:$0xff] (%p2026_p9)  ;;  %vm2155_vm8 = vcmask (%p2026_p9), 261120   ;;  %v2144_v34 = vunpack.c.l.b16 (%p2026_p9), %v6680_v33  ;;  %v4483_v11 = vld [vmem:[#allocation11 + $0x28] sm:$0xff] (%p2026_p9)  ;;  %s5615_s1 = smov (%p2026_p9), 64   ;;  %s5616_s0 = smov (%p2026_p9), 96  }
 0x470   : >> { %v7729_v14 = vld [vmem:[#allocation85_spill] sm:$0xff] (%p2026_p9)  ;;  %2110 = vmatpush.bf16.msra.mxu1 (%p2026_p9), %v4485_v21  ;;  %v7730_v1 = vld [vmem:[#allocation70_spill] sm:$0xff] (%p2026_p9)  ;;  %v7733_v20 = vld [vmem:[#allocation68_spill] sm:$0xff] (%p2026_p9)  ;;  %s5617_s5 = smov (%p2026_p9), 32   ;;  %vm2631_vm10 = vcmask (%p2026_p9), 523264   ;;  %vm2633_vm11 = vcmask (%p2026_p9), 785408  }
 0x471   : >> { %v2145_v23 = vunpack.c.l.b16 (%p2026_p9), %v7729_v14  ;;  %v2143_v38 = vunpack.c.l.b16 (%p2026_p9), %v7730_v1  ;;  %v7731_v19 = vld [vmem:[#allocation61_spill] sm:$0xff] (%p2026_p9)  ;;  %v7735_v5 = vld [vmem:[#allocation51_spill] sm:$0xff] (%p2026_p9)  ;;  %v7736_v6 = vld [vmem:[#allocation130_spill] sm:$0xff] (%p2026_p9)  ;;  %s7839_s4 = sld [smem:[#allocation179_spill]] (%p2026_p9)  ;;  %vm3028_vm15 = vcmask (%p2026_p9), 1043456   ;;  %vm2976_vm0 = vcmask (%p2026_p9), 64512  }
 0x472   : >> { %v4481_v21 = vld [vmem:[#allocation11 + $0x18] sm:$0xff] (%p2026_p9)  ;;  %v7739_v9 = vld [vmem:[#allocation124_spill] sm:$0xff] (%p2026_p9)  ;;  %v7781_v13 = vld [vmem:[#allocation63_spill] sm:$0xff] (%p2026_p9)  ;;  %s7840_s20 = sld [smem:[#allocation181_spill]] (%p2026_p9)  ;;  %s1993_s18 = sadd.s32 (%p2026_p9), 1, %s5580_s18  }
 0x473   : >> { %v2154_v62 = vpack.c.b16 (%p2026_p9), %v2146_v10, %v2145_v23  ;;  %v4480_v10 = vld [vmem:[#allocation11 + $0x10] sm:$0xff] (%p2026_p9)  ;;  %v7738_v16 = vld [vmem:[#allocation118_spill] sm:$0xff] (%p2026_p9)  ;;  %s7841_s6 = sld [smem:[#allocation183_spill]] (%p2026_p9)  ;;  %p1990_p13 = scmp.ge.s32.totalorder (%p2026_p9), %s1993_s18, 2  }
 0x474   : >> { %2111 = vmatpush.bf16.msra.mxu1 (%p2026_p9), %v4484_v61  ;;  %v7732_v15 = vld [vmem:[#allocation53_spill] sm:$0xff] (%p2026_p9)  ;;  %s7842_s16 = sld [smem:[#allocation185_spill]] (%p2026_p9) }
 0x475   : >> { %v2181_v49 = vsel (%p2026_p9), %vm2155_vm8, %v2154_v62, 0  ;;  %v2139_v61 = vunpack.c.l.b16 (%p2026_p9), %v7732_v15  ;;  %v7734_v18 = vld [vmem:[#allocation57_spill] sm:$0xff] (%p2026_p9)  ;;  %s7843_s23 = sld [smem:[#allocation187_spill]] (%p2026_p9) }
 0x476   : >> { %2183 = vmatpush.bf16.xpose.msra.mxu2 (%p2026_p9), %v2181_v49  ;;  %v7737_v17 = vld [vmem:[#allocation125_spill] sm:$0xff] (%p2026_p9) }
 0x477   : >> { %v7740_v7 = vld [vmem:[#allocation137_spill] sm:$0xff] (%p2026_p9) }
 0x478   : >> { %2112 = vmatpush.bf16.msra.mxu1 (%p2026_p9), %v4483_v11  ;;  %v2040_v11 = vadd.f32 (%p2026_p9), %v5576_v27, %v6049_v0  ;;  %v7741_v3 = vld [vmem:[#allocation117_spill] sm:$0xff] (%p2026_p9) }
 0x479   : >> { %v2336_v15 = vunpack.c.l.b16 (%p2026_p9), %v7741_v3  ;;  %v7742_v12 = vld [vmem:[#allocation101_spill] sm:$0xff] (%p2026_p9) }
 0x4e0   : >>> { %v2033_v30 = vpop.xlane.xlu0 %2032 }
 0x4e1   : >>> { %vm2034_vm7 = vcmp.ge.f32.partialorder %v5588_v24, %v2033_v30 }
 0x4e2   : >>> { %v4113_v39 = vsel %vm2034_vm7, 1.0, %v5614_v46  ;;  %v2038_v24 = vsel %vm2034_vm7, -inf, %v5588_v24   ;;  %2028 = sbr.rel (!%p2026_p9) target bundleno = 1133 (0x46d), region = 273  ;;  %v2141_v46 = vunpack.c.l.b16 (%p2026_p9), %v7731_v19 }
 0x4e3   : >>> { %v7049_v4 = vmax.f32 %v5584_v4, %v4113_v39   ;;  %v2153_v24 = vpack.c.b16 (%p2026_p9), %v2144_v34, %v2143_v38  ;;  %v2142_v39 = vunpack.c.l.b16 (%p2026_p9), %v6598_v42  ;;  %v2140_v38 = vunpack.c.l.b16 (%p2026_p9), %v6291_v29  ;;  %v4479_v34 = vld [vmem:[#allocation11 + $0x8] sm:$0xff] (%p2026_p9) }
 0x4e5   : >>> { %v7728_v8 = vmov %v7049_v4  ;;  %v2178_v30 = vsel (%p2026_p9), %vm2155_vm8, %v2153_v24, 0  ;;  %v2152_v23 = vpack.c.b16 (%p2026_p9), %v2142_v39, %v2141_v46  ;;  %v2151_v49 = vpack.c.b16 (%p2026_p9), %v2140_v38, %v2139_v61  ;;  %v4478_v24 = vld [vmem:[#allocation11] sm:$0xff] (%p2026_p9) }
 0x4e6   : >>> { %v5583_v4 = vmov %v7728_v8   ;;  %2184 = vmatpush.bf16.xpose.msra.mxu2 (%p2026_p9), %v2178_v30  ;;  %v2137_v30 = vunpack.c.l.b16 (%p2026_p9), %v6696_v58  ;;  %v2138_v46 = vunpack.c.l.b16 (%p2026_p9), %v6746_v22  ;;  %v2057_v39 = vpack.c.bf16 (%p2026_p9), %v2040_v11, %v2040_v11 }
 0x4e7   : >> { %v4482_v4 = vld [vmem:[#allocation11 + $0x20] sm:$0xff]  ;;  %v2175_v62 = vsel %vm2155_vm8, %v2152_v23, 0  ;;  %vm2039_vm9 = vcmp.gt.f32.partialorder %v7728_v8, 0.5  ;;  %v2448_v8 = vunpack.c.l.b16 %v7781_v13  ;;  %s7845_s25 = sld [smem:[#allocation45_spill]] (%p1990_p13)  ;;  %s3637_s10 = scalar_lea.sflag (%p1990_p13), [#allocation4], %s5995_s21 }
 0x4e8   : >> { %2113 = vmatpush.bf16.msra.mxu1 %v4482_v4  ;;  %v2172_v4 = vsel %vm2155_vm8, %v2151_v49, 0  ;;  %v2134_v49 = vunpack.c.l.b16 %v6571_v57 }
 0x4ec   : >> { %2114 = vmatpush.bf16.msra.mxu1 %v4481_v21  ;;  %v2150_v21 = vpack.c.b16 %v2138_v46, %v2137_v30  ;;  %v2132_v30 = vunpack.c.l.b16 %v6205_v43 }
 0x4ed   : > { %s4448_s17 = sshll.u32 (%p1990_p13), %s7845_s25, 3 }
 0x4ee   : >> { %2185 = vmatpush.bf16.xpose.msra.mxu2 %v2175_v62  ;;  %v2169_v23 = vsel %vm2155_vm8, %v2150_v21, 0  ;;  %v2136_v62 = vunpack.c.l.b16 %v6654_v48  ;;  %v2210_v21 = vunpack.c.l.b16 %v6888_v45 }
 0x4f0   : >> { %2115 = vmatpush.bf16.msra.mxu1 %v4480_v10  ;;  %v2135_v10 = vunpack.c.l.b16 %v7733_v20  ;;  %v7805_v20 = vld [vmem:[#allocation158_spill] sm:$0xff] }
 0x4f2   : >> { %v2149_v61 = vpack.c.b16 %v2136_v62, %v2135_v10  ;;  %v2274_v10 = vunpack.c.l.b16 %v7737_v17  ;;  %v2275_v62 = vunpack.c.l.b16 %v6926_v37  ;;  %v7802_v17 = vld [vmem:[#allocation153_spill] sm:$0xff] }
 0x4f4   : >> { %2116 = vmatpush.bf16.msra.mxu1 %v4479_v34  ;;  %v2166_v38 = vsel %vm2155_vm8, %v2149_v61, 0  ;;  %v2133_v34 = vunpack.c.l.b16 %v7734_v18  ;;  %v2208_v61 = vunpack.c.l.b16 %v6809_v31  ;;  %v2542_v18 = vunpack.c.l.b16 %v7802_v17 }
 0x4f6   : >> { %2186 = vmatpush.bf16.xpose.msra.mxu2 %v2172_v4  ;;  %v2148_v11 = vpack.c.b16 %v2134_v49, %v2133_v34  ;;  %v2131_v4 = vunpack.c.l.b16 %v7735_v5  ;;  %v2272_v34 = vunpack.c.l.b16 %v7738_v16  ;;  %v2273_v49 = vunpack.c.l.b16 %v7739_v9 }
 0x4f8   : >> { %2117 = vmatpush.bf16.msra.mxu1 %v4478_v24  ;;  %v2163_v24 = vsel %vm2155_vm8, %v2148_v11, 0  ;;  %v2147_v46 = vpack.c.b16 %v2132_v30, %v2131_v4  ;;  %v2338_v4 = vunpack.c.l.b16 %v6896_v35  ;;  %v2339_v30 = vunpack.c.l.b16 %v7740_v7 }
 0x4fa   : >> { %v2347_v1 = vpack.c.b16 %v2339_v30, %v2338_v4  ;;  %v7744_v4 = vld [vmem:[#allocation102_spill] sm:$0xff] }
 0x4fb   : >> { %2118 = vmatmul.bf16.vlgmr.msra.gmra.mxu1 %v2057_v39  ;;  %v2160_v39 = vsel %vm2155_vm8, %v2147_v46, 0  ;;  %v2270_v30 = vunpack.c.l.b16 %v7744_v4 }
 0x4fc   : >> { %v2373_v14 = vsel %vm2155_vm8, %v2347_v1, 0 }
 0x4fd   : >> { %2375 = vmatpush.bf16.xpose.msrb.mxu0 %v2373_v14 }
 0x4fe   : >> { %2187 = vmatpush.bf16.xpose.msra.mxu2 %v2169_v23  ;;  %v2211_v23 = vunpack.c.l.b16 %v7736_v6  ;;  %v2282_v6 = vpack.c.b16 %v2273_v49, %v2272_v34  ;;  %v7746_v34 = vld [vmem:[#allocation93_spill] sm:$0xff] }
 0x4ff   : >> { %v2334_v49 = vunpack.c.l.b16 %v7746_v34  ;;  %v7751_v34 = vld [vmem:[#allocation94_spill] sm:$0xff] }
 0x500   : >> { %v2219_v11 = vpack.c.b16 %v2211_v23, %v2210_v21  ;;  %v2337_v21 = vunpack.c.l.b16 %v6842_v26  ;;  %v2269_v16 = vunpack.c.l.b16 %v7751_v34  ;;  %v7758_v34 = vld [vmem:[#allocation127_spill] sm:$0xff] }
 0x502   : >> { %v2245_v46 = vsel %vm2155_vm8, %v2219_v11, 0  ;;  %v2346_v23 = vpack.c.b16 %v2337_v21, %v2336_v15  ;;  %v4892_v21 = vld [vmem:[#allocation13] ss:$0 sm:$0xff] }
 0x503   : >> { %2247 = vmatpush.bf16.xpose.msra.mxu3 %v2245_v46  ;;  %v7747_v46 = vld [vmem:[#allocation110_spill] sm:$0xff] }
 0x504   : >> { %v2370_v1 = vsel %vm2155_vm8, %v2346_v23, 0  ;;  %v7750_v23 = vld [vmem:[#allocation72_spill] sm:$0xff] }
 0x505   : >> { %2376 = vmatpush.bf16.xpose.msrb.mxu0 %v2370_v1 }
 0x506   : >> { %2188 = vmatpush.bf16.xpose.msra.mxu2 %v2166_v38  ;;  %v2209_v38 = vunpack.c.l.b16 %v6866_v63 }
 0x508   : >> { %v2218_v5 = vpack.c.b16 %v2209_v38, %v2208_v61  ;;  %v7745_v61 = vld [vmem:[#allocation103_spill] sm:$0xff] }
 0x509   : >> { %v2271_v38 = vunpack.c.l.b16 %v7745_v61  ;;  %v7749_v61 = vld [vmem:[#allocation81_spill] sm:$0xff] }
 0x50a   : >> { %v2242_v11 = vsel %vm2155_vm8, %v2218_v5, 0  ;;  %v2205_v9 = vunpack.c.l.b16 %v7749_v61 }
 0x50b   : >> { %2248 = vmatpush.bf16.xpose.msra.mxu3 %v2242_v11  ;;  %v2281_v14 = vpack.c.b16 %v2271_v38, %v2270_v30  ;;  %v7753_v30 = vld [vmem:[#allocation92_spill] sm:$0xff] }
 0x50c   : >> { %v2333_v38 = vunpack.c.l.b16 %v7753_v30 }
 0x50d   : >> { %v2303_v4 = vsel %vm2155_vm8, %v2281_v14, 0  ;;  %v7754_v14 = vld [vmem:[#allocation120_spill] sm:$0xff] }
 0x50e   : >> { %2189 = vmatpush.bf16.xpose.msra.mxu2 %v2163_v24  ;;  %v2283_v24 = vpack.c.b16 %v2275_v62, %v2274_v10  ;;  %v2206_v10 = vunpack.c.l.b16 %v7742_v12  ;;  %v7743_v62 = vld [vmem:[#allocation109_spill] sm:$0xff]  ;;  %v2268_v12 = vunpack.c.l.b16 %v7750_v23 }
 0x50f   : >> { %v2207_v7 = vunpack.c.l.b16 %v7743_v62 }
 0x511   : >> { %v2217_v15 = vpack.c.b16 %v2207_v7, %v2206_v10  ;;  %v7752_v10 = vld [vmem:[#allocation87_spill] sm:$0xff] }
 0x513   : >> { %v2239_v5 = vsel %vm2155_vm8, %v2217_v15, 0 }
 0x514   : >> { %2249 = vmatpush.bf16.xpose.msra.mxu3 %v2239_v5 }
 0x516   : >> { %2190 = vmatpush.bf16.xpose.msra.mxu2 %v2160_v39  ;;  %v2309_v39 = vsel %vm2155_vm8, %v2283_v24, 0  ;;  %v2306_v24 = vsel %vm2155_vm8, %v2282_v6, 0  ;;  %v7748_v6 = vld [vmem:[#allocation80_spill] sm:$0xff] }
 0x517   : >> { %2311 = vmatpush.bf16.xpose.msrb.mxu1 %v2309_v39  ;;  %v2335_v39 = vunpack.c.l.b16 %v7747_v46  ;;  %v2204_v3 = vunpack.c.l.b16 %v7748_v6 }
 0x519   : >> { %v2345_v62 = vpack.c.b16 %v2335_v39, %v2334_v49  ;;  %v2216_v49 = vpack.c.b16 %v2205_v9, %v2204_v3  ;;  %v2280_v39 = vpack.c.b16 %v2269_v16, %v2268_v12  ;;  %v7756_v9 = vld [vmem:[#allocation129_spill] sm:$0xff]  ;;  %v7757_v3 = vld [vmem:[#allocation134_spill] sm:$0xff] }
 0x51a   : >> { %v2266_v16 = vunpack.c.l.b16 %v7756_v9  ;;  %v2267_v12 = vunpack.c.l.b16 %v7757_v3  ;;  %v7762_v9 = vld [vmem:[#allocation114_spill] sm:$0xff] }
 0x51b   : >> { %v2367_v7 = vsel %vm2155_vm8, %v2345_v62, 0  ;;  %v7755_v62 = vld [vmem:[#allocation133_spill] sm:$0xff]  ;;  %v2236_v5 = vsel %vm2155_vm8, %v2216_v49, 0  ;;  %v2264_v3 = vunpack.c.l.b16 %v7762_v9  ;;  %v7769_v9 = vld [vmem:[#allocation108_spill] sm:$0xff] }
 0x51c   : >> { %2377 = vmatpush.bf16.xpose.msrb.mxu0 %v2367_v7  ;;  %v2203_v6 = vunpack.c.l.b16 %v7755_v62  ;;  %2250 = vmatpush.bf16.xpose.msra.mxu3 %v2236_v5  ;;  %v7760_v49 = vld [vmem:[#allocation113_spill] sm:$0xff] }
 0x51f   : >> { %2312 = vmatpush.bf16.xpose.msrb.mxu1 %v2306_v24  ;;  %v2332_v24 = vunpack.c.l.b16 %v7752_v10 }
 0x521   : >> { %v2344_v15 = vpack.c.b16 %v2333_v38, %v2332_v24  ;;  %v2279_v24 = vpack.c.b16 %v2267_v12, %v2266_v16  ;;  %v7765_v16 = vld [vmem:[#allocation121_spill] sm:$0xff] }
 0x522   : >> { %v2329_v12 = vunpack.c.l.b16 %v7765_v16  ;;  %v7772_v16 = vld [vmem:[#allocation76_spill] sm:$0xff] }
 0x523   : >> { %v2364_v23 = vsel %vm2155_vm8, %v2344_v15, 0  ;;  %v7761_v15 = vld [vmem:[#allocation119_spill] sm:$0xff] }
 0x524   : >> { %2378 = vmatpush.bf16.xpose.msrb.mxu0 %v2364_v23  ;;  %v2201_v62 = vunpack.c.l.b16 %v7761_v15  ;;  %v7768_v15 = vld [vmem:[#allocation89_spill] sm:$0xff] }
 0x527   : >> { %2313 = vmatpush.bf16.xpose.msrb.mxu1 %v2303_v4  ;;  %v2300_v4 = vsel %vm2155_vm8, %v2280_v39, 0  ;;  %v2200_v39 = vunpack.c.l.b16 %v7760_v49 }
 0x52f   : >> { %2314 = vmatpush.bf16.xpose.msrb.mxu1 %v2300_v4 }
 0x578   : >> { %v2119_v46 = vpop.f32.mrf.mxu1 }
 0x579   : >> { %v2120_v11 = vadd.f32 %v4892_v21, %v2119_v46  ;;  %v2202_v21 = vunpack.c.l.b16 %v7754_v14  ;;  %v2330_v46 = vunpack.c.l.b16 %v7758_v34  ;;  %v2297_v14 = vsel %vm2155_vm8, %v2279_v24, 0 }
 0x57a   : >> { %2315 = vmatpush.bf16.xpose.msrb.mxu1 %v2297_v14 }
 0x57b   : >> { %v2123_v1 = vpack.c.bf16 %v2120_v11, %v2120_v11  ;;  %v7759_v11 = vld [vmem:[#allocation128_spill] sm:$0xff]  ;;  %v2215_v10 = vpack.c.b16 %v2203_v6, %v2202_v21  ;;  %v7764_v6 = vld [vmem:[#allocation107_spill] sm:$0xff] }
 0x57c   : >> { %v2331_v7 = vunpack.c.l.b16 %v7759_v11  ;;  %v2328_v4 = vunpack.c.l.b16 %v7764_v6 }
 0x57d   : >> { %2127 = vrot.lane.b32.xlu1 %v2123_v1, %s5615_s1  ;;  %2125 = vrot.lane.b32.xlu0 %v2123_v1, %s5616_s0  ;;  %v2233_v38 = vsel %vm2155_vm8, %v2215_v10, 0 }
 0x57e   : >> { %4146 = vmatmul.msk.bf16.vlgmr.msra.gmra.mxu2 %vm2155_vm8, %v2123_v1  ;;  %v2343_v30 = vpack.c.b16 %v2331_v7, %v2330_v46  ;;  %2251 = vmatpush.bf16.xpose.msra.mxu3 %v2233_v38  ;;  %v2342_v34 = vpack.c.b16 %v2329_v12, %v2328_v4  ;;  %v7766_v46 = vld [vmem:[#allocation95_spill] sm:$0xff]  ;;  %v7767_v7 = vld [vmem:[#allocation96_spill] sm:$0xff]  ;;  %v7770_v38 = vld [vmem:[#allocation98_spill] sm:$0xff]  ;;  %v2196_v12 = vunpack.c.l.b16 %v7772_v16 }
 0x57f   : >> { %v2198_v11 = vunpack.c.l.b16 %v7766_v46  ;;  %v2199_v10 = vunpack.c.l.b16 %v7767_v7  ;;  %v2326_v14 = vunpack.c.l.b16 %v7770_v38  ;;  %v7774_v7 = vld [vmem:[#allocation79_spill] sm:$0xff] }
 0x580   : >> { %v2121_v61 = vpop.f32.mrf.mxu1  ;;  %v2361_v21 = vsel %vm2155_vm8, %v2343_v30, 0  ;;  %v2262_v30 = vunpack.c.l.b16 %v7768_v15  ;;  %v2358_v6 = vsel %vm2155_vm8, %v2342_v34, 0  ;;  %v2260_v34 = vunpack.c.l.b16 %v7774_v7  ;;  %v7775_v15 = vld [vmem:[#allocation88_spill] sm:$0xff] }
 0x581   : >> { %v7763_v61 = vld [vmem:[#allocation115_spill] sm:$0xff]  ;;  %2379 = vmatpush.bf16.xpose.msrb.mxu0 %v2361_v21 }
 0x582   : >> { %v2265_v5 = vunpack.c.l.b16 %v7763_v61  ;;  %v2263_v61 = vunpack.c.l.b16 %v7769_v9  ;;  %v2261_v9 = vunpack.c.l.b16 %v7775_v15 }
 0x584   : >> { %v2278_v23 = vpack.c.b16 %v2265_v5, %v2264_v3  ;;  %v2213_v3 = vpack.c.b16 %v2199_v10, %v2198_v11  ;;  %v2277_v5 = vpack.c.b16 %v2263_v61, %v2262_v30  ;;  %v2276_v10 = vpack.c.b16 %v2261_v9, %v2260_v34  ;;  %v7776_v30 = vld [vmem:[#allocation77_spill] sm:$0xff] }
 0x585   : >> { %2129 = vrot.lane.b32.xlu0 %v2123_v1, %s5617_s5  ;;  %v2214_v1 = vpack.c.b16 %v2201_v62, %v2200_v39  ;;  %v7771_v39 = vld [vmem:[#allocation106_spill] sm:$0xff]  ;;  %v2324_v61 = vunpack.c.l.b16 %v7776_v30 }
 0x586   : >> { %v2294_v49 = vsel %vm2155_vm8, %v2278_v23, 0  ;;  %v2327_v62 = vunpack.c.l.b16 %v7771_v39  ;;  %v2227_v4 = vsel %vm2155_vm8, %v2213_v3, 0  ;;  %v7773_v23 = vld [vmem:[#allocation74_spill] sm:$0xff] }
 0x587   : >> { %v2230_v24 = vsel %vm2155_vm8, %v2214_v1, 0  ;;  %2316 = vmatpush.bf16.xpose.msrb.mxu1 %v2294_v49  ;;  %v2291_v1 = vsel %vm2155_vm8, %v2277_v5, 0  ;;  %v2197_v46 = vunpack.c.l.b16 %v7773_v23  ;;  %v2288_v49 = vsel %vm2155_vm8, %v2276_v10, 0 }
 0x588   : >> { %2252 = vmatpush.bf16.xpose.msra.mxu3 %v2230_v24  ;;  %v2341_v21 = vpack.c.b16 %v2327_v62, %v2326_v14 }
 0x589   : >> { %2380 = vmatpush.bf16.xpose.msrb.mxu0 %v2358_v6  ;;  %v2212_v11 = vpack.c.b16 %v2197_v46, %v2196_v12  ;;  %v7777_v6 = vld [vmem:[#allocation78_spill] sm:$0xff] }
 0x58a   : >> { %v2355_v38 = vsel %vm2155_vm8, %v2341_v21, 0  ;;  %v2325_v14 = vunpack.c.l.b16 %v7777_v6 }
 0x58b   : >> { %v2224_v24 = vsel %vm2155_vm8, %v2212_v11, 0 }
 0x58c   : >> { %v2340_v39 = vpack.c.b16 %v2325_v14, %v2324_v61 }
 0x58e   : >> { %v2352_v62 = vsel %vm2155_vm8, %v2340_v39, 0 }
 0x58f   : >> { %2317 = vmatpush.bf16.xpose.msrb.mxu1 %v2291_v1 }
 0x590   : >> { %2253 = vmatpush.bf16.xpose.msra.mxu3 %v2227_v4 }
 0x591   : >> { %2381 = vmatpush.bf16.xpose.msrb.mxu0 %v2355_v38 }
 0x597   : >> { %2318 = vmatpush.bf16.xpose.msrb.mxu1 %v2288_v49 }
 0x598   : >> { %2254 = vmatpush.bf16.xpose.msra.mxu3 %v2224_v24 }
 0x599   : >> { %2382 = vmatpush.bf16.xpose.msrb.mxu0 %v2352_v62  ;;  %v7778_v62 = vld [vmem:[#allocation90_spill] sm:$0xff] }
 0x5ef   : >> { %v2128_v3 = vpop.permute.xlu1 %2127  ;;  %v2126_v5 = vpop.permute.xlu0 %2125 }
 0x5f0   : >> { %4147 = vmatmul.msk.bf16.vlgmr.msra.gmra.mxu3 %vm2155_vm8, %v2126_v5  ;;  %4148 = vmatmul.msk.bf16.vlgmr.msrb.gmra.mxu1 %vm2155_vm8, %v2128_v3  ;;  %v2452_v3 = vunpack.c.l.b16 %v7778_v62  ;;  %v7779_v5 = vld [vmem:[#allocation104_spill] sm:$0xff] }
 0x5f7   : >> { %v2130_v21 = vpop.permute.xlu0 %2129 }
 0x5f8   : >> { %4149 = vmatmul.msk.bf16.vlgmr.msrb.gmra.mxu0 %vm2155_vm8, %v2130_v21  ;;  %v2453_v21 = vunpack.c.l.b16 %v7779_v5  ;;  %v7787_v5 = vld [vmem:[#allocation71_spill] sm:$0xff] }
 0x601   : >> { %v2192_v4 = vpop.f32.mrf.mxu2 }
 0x602   : >> { %v2388_v16 = vmul.f32 0.17677669, %v2192_v4  ;;  %v2461_v4 = vpack.c.b16 %v2453_v21, %v2452_v3  ;;  %v2442_v21 = vunpack.c.l.b16 %v7787_v5 }
 0x604   : >> { %v2394_v12 = vsel %vm2039_vm9, %v2388_v16, -1e+09  ;;  %2470 = vmatpush.bf16.msrb.mxu2 %v2461_v4  ;;  %v7780_v16 = vld [vmem:[#allocation73_spill] sm:$0xff]  ;;  %v7788_v4 = vld [vmem:[#allocation75_spill] sm:$0xff] }
 0x605   : >> { %2398 = vmax.xlane.f32.xlu1 %v2394_v12 }
 0x609   : >> { %v2194_v1 = vpop.f32.mrf.mxu2 }
 0x60a   : >> { %v2451_v1 = vunpack.c.l.b16 %v6698_v28 }
 0x66d   : >> { %v2320_v23 = vpop.f32.mrf.mxu1 }
 0x66e   : >> { %v2390_v46 = vmul.f32 0.17677669, %v2320_v23 }
 0x670   : >> { %v7162_v7 = vsel %vm2039_vm9, %v2390_v46, -1e+09  ;;  %v7782_v46 = vld [vmem:[#allocation67_spill] sm:$0xff] }
 0x671   : >> { %2402 = vmax.xlane.f32.xlu0 %v7162_v7 }
 0x673   : >> { %v2256_v34 = vpop.f32.mrf.mxu3 }
 0x674   : >> { %v2389_v15 = vmul.f32 0.17677669, %v2256_v34  ;;  %v2449_v34 = vunpack.c.l.b16 %v7782_v46 }
 0x675   : >> { %v2322_v9 = vpop.f32.mrf.mxu1  ;;  %v2384_v38 = vpop.f32.mrf.mxu0 }
 0x676   : >> { %v7167_v11 = vsel %vm2039_vm9, %v2389_v15, -1e+09  ;;  %v2391_v49 = vmul.f32 0.17677669, %v2384_v38  ;;  %v2459_v15 = vpack.c.b16 %v2449_v34, %v2448_v8  ;;  %v7783_v9 = vld [vmem:[#allocation54_spill] sm:$0xff]  ;;  %v7790_v8 = vld [vmem:[#allocation65_spill] sm:$0xff] }
 0x677   : >> { %2400 = vmax.xlane.f32.xlu2 %v7167_v11  ;;  %v2446_v38 = vunpack.c.l.b16 %v7783_v9  ;;  %v2441_v46 = vunpack.c.l.b16 %v7790_v8  ;;  %v7798_v8 = vld [vmem:[#allocation112_spill] sm:$0xff] }
 0x678   : >> { %v2399_v10 = vpop.xlane.xlu1 %2398  ;;  %v2397_v14 = vsel %vm2039_vm9, %v2391_v49, -1e+09 }
 0x679   : >> { %v2406_v24 = vsub.f32 %v2394_v12, %v2399_v10  ;;  %v2450_v12 = vunpack.c.l.b16 %v7780_v16  ;;  %v7784_v10 = vld [vmem:[#allocation56_spill] sm:$0xff]  ;;  %v2443_v16 = vunpack.c.l.b16 %v7788_v4  ;;  %v7796_v4 = vld [vmem:[#allocation131_spill] sm:$0xff] }
 0x67b   : >> { %v2258_v30 = vpop.f32.mrf.mxu3  ;;  %v2410_v61 = vmul.f32 1.442695, %v2406_v24  ;;  %v2460_v23 = vpack.c.b16 %v2451_v1, %v2450_v12  ;;  %v2447_v24 = vunpack.c.l.b16 %v7784_v10  ;;  %v2456_v12 = vpack.c.b16 %v2443_v16, %v2442_v21  ;;  %v7789_v1 = vld [vmem:[#allocation59_spill] sm:$0xff] }
 0x67c   : >> { %v7785_v30 = vld [vmem:[#allocation86_spill] sm:$0xff]  ;;  %v2586_v21 = vunpack.c.l.b16 %v7008_v44  ;;  %v2497_v16 = vunpack.c.l.b16 %v7796_v4 }
 0x67d   : >> { %v2386_v6 = vpop.f32.mrf.mxu0  ;;  %4896 = vpow2.f32 %v2410_v61  ;;  %2471 = vmatpush.bf16.msrb.mxu2 %v2460_v23  ;;  %v2458_v49 = vpack.c.b16 %v2447_v24, %v2446_v38  ;;  %v2444_v61 = vunpack.c.l.b16 %v7785_v30  ;;  %v2440_v23 = vunpack.c.l.b16 %v7789_v1  ;;  %v7792_v38 = vld [vmem:[#allocation55_spill] sm:$0xff]  ;;  %v7793_v30 = vld [vmem:[#allocation162_spill] sm:$0xff] }
 0x67e   : >> { %v7786_v6 = vld [vmem:[#allocation97_spill] sm:$0xff]  ;;  %v2439_v10 = vunpack.c.l.b16 %v7792_v38 }
 0x67f   : >> { %2404 = vmax.xlane.f32.xlu2 %v2397_v14  ;;  %v2445_v62 = vunpack.c.l.b16 %v7786_v6  ;;  %v2455_v34 = vpack.c.b16 %v2441_v46, %v2440_v23  ;;  %v7794_v6 = vld [vmem:[#allocation165_spill] sm:$0xff]  ;;  %v2495_v46 = vunpack.c.l.b16 %v7798_v8  ;;  %v7804_v8 = vld [vmem:[#allocation150_spill] sm:$0xff] }
 0x681   : >> { %2472 = vmatpush.bf16.msrb.mxu2 %v2459_v15  ;;  %v2457_v3 = vpack.c.b16 %v2445_v62, %v2444_v61  ;;  %v7791_v15 = vld [vmem:[#allocation52_spill] sm:$0xff]  ;;  %v2587_v61 = vunpack.c.l.b16 %v7793_v30  ;;  %v2588_v62 = vunpack.c.l.b16 %v7794_v6 }
 0x682   : >> { %v2438_v9 = vunpack.c.l.b16 %v7791_v15  ;;  %v7800_v30 = vld [vmem:[#allocation160_spill] sm:$0xff] }
 0x683   : >> { %v7172_v39 = vpop.eup %4896  ;;  %v2596_v23 = vpack.c.b16 %v2588_v62, %v2587_v61  ;;  %v2584_v6 = vunpack.c.l.b16 %v7800_v30  ;;  %v7803_v61 = vld [vmem:[#allocation111_spill] sm:$0xff] }
 0x684   : >> { %v2454_v24 = vpack.c.b16 %v2439_v10, %v2438_v9  ;;  %v7799_v9 = vld [vmem:[#allocation126_spill] sm:$0xff]  ;;  %v2494_v62 = vunpack.c.l.b16 %v7803_v61  ;;  %v7809_v61 = vld [vmem:[#allocation83_spill] sm:$0xff] }
 0x685   : >> { %2473 = vmatpush.bf16.msrb.mxu2 %v2458_v49  ;;  %v2496_v38 = vunpack.c.l.b16 %v7799_v9 }
 0x687   : >> { %2418 = vadd.xlane.f32.xlu2 %v7172_v39 }
 0x689   : >> { %2474 = vmatpush.bf16.msrb.mxu2 %v2457_v3  ;;  %v7795_v3 = vld [vmem:[#allocation164_spill] sm:$0xff] }
 0x68a   : >> { %v2585_v5 = vunpack.c.l.b16 %v7795_v3  ;;  %v7801_v3 = vld [vmem:[#allocation105_spill] sm:$0xff] }
 0x68b   : >> { %v2493_v13 = vunpack.c.l.b16 %v7801_v3 }
 0x68d   : >> { %2475 = vmatpush.bf16.msrb.mxu2 %v2456_v12  ;;  %v7797_v12 = vld [vmem:[#allocation135_spill] sm:$0xff]  ;;  %v2504_v17 = vpack.c.b16 %v2494_v62, %v2493_v13  ;;  %v2491_v62 = vunpack.c.l.b16 %v7809_v61 }
 0x68e   : >> { %v2498_v1 = vunpack.c.l.b16 %v7797_v12  ;;  %v2505_v12 = vpack.c.b16 %v2496_v38, %v2495_v46 }
 0x690   : >> { %v2506_v15 = vpack.c.b16 %v2498_v1, %v2497_v16  ;;  %v2543_v16 = vunpack.c.l.b16 %v7804_v8 }
 0x691   : >> { %2476 = vmatpush.bf16.msrb.mxu2 %v2455_v34  ;;  %v2583_v34 = vunpack.c.l.b16 %v7006_v54 }
 0x692   : >> { %2515 = vmatpush.bf16.msrb.mxu3 %v2506_v15  ;;  %v2551_v19 = vpack.c.b16 %v2543_v16, %v2542_v18  ;;  %v7807_v15 = vld [vmem:[#allocation156_spill] sm:$0xff]  ;;  %v7811_v16 = vld [vmem:[#allocation147_spill] sm:$0xff] }
 0x693   : >> { %v2594_v9 = vpack.c.b16 %v2584_v6, %v2583_v34  ;;  %v2579_v38 = vunpack.c.l.b16 %v7807_v15  ;;  %v7815_v15 = vld [vmem:[#allocation123_spill] sm:$0xff] }
 0x694   : >> { %2560 = vmatpush.bf16.msra.mxu1 %v2551_v19 }
 0x695   : >> { %2477 = vmatpush.bf16.msrb.mxu2 %v2454_v24  ;;  %v2595_v24 = vpack.c.b16 %v2586_v21, %v2585_v5  ;;  %v7806_v5 = vld [vmem:[#allocation163_spill] sm:$0xff] }
 0x696   : >> { %v2582_v21 = vunpack.c.l.b16 %v7806_v5  ;;  %2516 = vmatpush.bf16.msrb.mxu3 %v2505_v12 }
 0x699   : >> { %2605 = vmatpush.bf16.msra.mxu2 %v2596_v23  ;;  %v2581_v23 = vunpack.c.l.b16 %v7805_v20 }
 0x69a   : >> { %2517 = vmatpush.bf16.msrb.mxu3 %v2504_v17 }
 0x69b   : >> { %v2593_v46 = vpack.c.b16 %v2582_v21, %v2581_v23  ;;  %v7813_v23 = vld [vmem:[#allocation154_spill] sm:$0xff]  ;;  %v7814_v21 = vld [vmem:[#allocation159_spill] sm:$0xff] }
 0x69c   : >> { %v2577_v5 = vunpack.c.l.b16 %v7813_v23  ;;  %v7823_v23 = vld [vmem:[#allocation143_spill] sm:$0xff] }
 0x69d   : >> { %2606 = vmatpush.bf16.msra.mxu2 %v2595_v24 }
 0x6a1   : >> { %2607 = vmatpush.bf16.msra.mxu2 %v2594_v9 }
 0x6a5   : >> { %2608 = vmatpush.bf16.msra.mxu2 %v2593_v46 }
 0x6e4   : >> { %v2403_v34 = vpop.xlane.xlu0 %2402 }
 0x6e5   : >> { %v2408_v13 = vsub.f32 %v7162_v7, %v2403_v34  ;;  %v7810_v7 = vld [vmem:[#allocation84_spill] sm:$0xff] }
 0x6e6   : >> { %v2492_v8 = vunpack.c.l.b16 %v7810_v7  ;;  %v7820_v7 = vld [vmem:[#allocation116_spill] sm:$0xff] }
 0x6e7   : >> { %v2414_v24 = vmul.f32 1.442695, %v2408_v13 }
 0x6e8   : >> { %v2503_v17 = vpack.c.b16 %v2492_v8, %v2491_v62  ;;  %v2487_v8 = vunpack.c.l.b16 %v7820_v7  ;;  %v7831_v7 = vld [vmem:[#allocation91_spill] sm:$0xff] }
 0x6ea   : >> { %v2401_v49 = vpop.xlane.xlu2 %2400  ;;  %2518 = vmatpush.bf16.msrb.mxu3 %v2503_v17  ;;  %v7825_v17 = vld [vmem:[#allocation152_spill] sm:$0xff] }
 0x6eb   : >> { %v2407_v30 = vsub.f32 %v7167_v11, %v2401_v49 }
 0x6ed   : >> { %v2412_v18 = vmul.f32 1.442695, %v2407_v30  ;;  %v2578_v30 = vunpack.c.l.b16 %v7814_v21  ;;  %v7824_v21 = vld [vmem:[#allocation155_spill] sm:$0xff] }
 0x6ef   : >> { %v2591_v46 = vpack.c.b16 %v2578_v30, %v2577_v5  ;;  %v2537_v5 = vunpack.c.l.b16 %v7823_v23  ;;  %v2573_v30 = vunpack.c.l.b16 %v7824_v21  ;;  %v7834_v21 = vld [vmem:[#allocation140_spill] sm:$0xff] }
 0x6f2   : >> { %v2405_v10 = vpop.xlane.xlu2 %2404 }
 0x6f3   : >> { %v2409_v4 = vsub.f32 %v2397_v14, %v2405_v10  ;;  %v7808_v10 = vld [vmem:[#allocation161_spill] sm:$0xff] }
 0x6f4   : >> { %v2580_v3 = vunpack.c.l.b16 %v7808_v10  ;;  %v7816_v10 = vld [vmem:[#allocation136_spill] sm:$0xff] }
 0x6f5   : >> { %v2416_v1 = vmul.f32 1.442695, %v2409_v4 }
 0x6f6   : >> { %v2592_v11 = vpack.c.b16 %v2580_v3, %v2579_v38  ;;  %v2489_v38 = vunpack.c.l.b16 %v7815_v15  ;;  %v2490_v3 = vunpack.c.l.b16 %v7816_v10  ;;  %v7826_v10 = vld [vmem:[#allocation99_spill] sm:$0xff] }
 0x6f7   : >> { %4898 = vpow2.f32 %v2416_v1  ;;  %v2540_v1 = vunpack.c.l.b16 %v7811_v16  ;;  %v7821_v16 = vld [vmem:[#allocation122_spill] sm:$0xff] }
 0x6f8   : >> { %2609 = vmatpush.bf16.msra.mxu2 %v2592_v11  ;;  %v7818_v11 = vld [vmem:[#allocation145_spill] sm:$0xff] }
 0x6f9   : >> { %v2539_v13 = vunpack.c.l.b16 %v7818_v11  ;;  %v7828_v11 = vld [vmem:[#allocation144_spill] sm:$0xff] }
 0x6fa   : >> { %v2419_v14 = vpop.xlane.xlu2 %2418 }
 0x6fb   : >> { %4900 = vrcp.f32 %v2419_v14 }
 0x6fc   : >> { %4902 = vpow2.f32 %v2412_v18  ;;  %v7817_v18 = vld [vmem:[#allocation151_spill] sm:$0xff]  ;;  %2610 = vmatpush.bf16.msra.mxu2 %v2591_v46 }
 0x6fd   : >> { %v7210_v20 = vpop.eup %4898  ;;  %4904 = vpow2.f32 %v2414_v24  ;;  %v2538_v34 = vunpack.c.l.b16 %v7817_v18  ;;  %v2576_v24 = vunpack.c.l.b16 %v7004_v32  ;;  %v7827_v18 = vld [vmem:[#allocation100_spill] sm:$0xff] }
 0x6fe   : >> { %2424 = vadd.xlane.f32.xlu2 %v7210_v20 }
 0x6ff   : >> { %v2549_v61 = vpack.c.b16 %v2539_v13, %v2538_v34  ;;  %v2486_v34 = vunpack.c.l.b16 %v7827_v18  ;;  %v2534_v13 = vunpack.c.l.b16 %v7828_v11 }
 0x701   : >> { %v4901_v19 = vpop.eup %4900 }
 0x702   : >> { %v2430_v49 = vmul.f32 %v4901_v19, %v7172_v39  ;;  %v7215_v4 = vpop.eup %4902  ;;  %v7812_v39 = vld [vmem:[#allocation149_spill] sm:$0xff] }
 0x703   : >> { %v7218_v12 = vpop.eup %4904  ;;  %v2541_v9 = vunpack.c.l.b16 %v7812_v39  ;;  %v7819_v19 = vld [vmem:[#allocation157_spill] sm:$0xff]  ;;  %v7822_v39 = vld [vmem:[#allocation146_spill] sm:$0xff] }
 0x704   : >> { %v2434_v6 = vpack.c.bf16 %v2430_v49, %v2430_v49  ;;  %v2575_v49 = vunpack.c.l.b16 %v7819_v19  ;;  %v7829_v19 = vld [vmem:[#allocation141_spill] sm:$0xff] }
 0x705   : >> { %v2550_v14 = vpack.c.b16 %v2541_v9, %v2540_v1  ;;  %v2488_v1 = vunpack.c.l.b16 %v7821_v16  ;;  %v2536_v9 = vunpack.c.l.b16 %v7822_v39  ;;  %v7832_v16 = vld [vmem:[#allocation142_spill] sm:$0xff]  ;;  %v7833_v39 = vld [vmem:[#allocation139_spill] sm:$0xff] }
 0x706   : >> { %2420 = vadd.xlane.f32.xlu2 %v7215_v4  ;;  %2478 = vmatmul.bf16.vlgmr.msrb.gmra.mxu2 %v2434_v6  ;;  %v2502_v6 = vpack.c.b16 %v2490_v3, %v2489_v38  ;;  %v2590_v62 = vpack.c.b16 %v2576_v24, %v2575_v49  ;;  %v2485_v3 = vunpack.c.l.b16 %v7826_v10  ;;  %v2535_v49 = vunpack.c.l.b16 %v7829_v19  ;;  %v7837_v10 = vld [vmem:[#allocation132_spill] sm:$0xff] }
 0x707   : >> { %2561 = vmatpush.bf16.msra.mxu1 %v2550_v14  ;;  %v2574_v14 = vunpack.c.l.b16 %v7825_v17  ;;  %v2501_v46 = vpack.c.b16 %v2488_v1, %v2487_v8  ;;  %v2548_v15 = vpack.c.b16 %v2537_v5, %v2536_v9  ;;  %v2484_v8 = vunpack.c.l.b16 %v7831_v7  ;;  %v7835_v17 = vld [vmem:[#allocation138_spill] sm:$0xff] }
 0x708   : >> { %2519 = vmatpush.bf16.msrb.mxu3 %v2502_v6  ;;  %2611 = vmatpush.bf16.msra.mxu2 %v2590_v62  ;;  %v2500_v24 = vpack.c.b16 %v2486_v34, %v2485_v3  ;;  %v2547_v6 = vpack.c.b16 %v2535_v49, %v2534_v13  ;;  %v2532_v1 = vunpack.c.l.b16 %v7832_v16  ;;  %v2533_v9 = vunpack.c.l.b16 %v7833_v39 }
 0x709   : >> { %v2589_v38 = vpack.c.b16 %v2574_v14, %v2573_v30  ;;  %v2530_v30 = vunpack.c.l.b16 %v7834_v21  ;;  %v2531_v14 = vunpack.c.l.b16 %v7835_v17  ;;  %v2529_v3 = vunpack.c.l.b16 %v7837_v10  ;;  %v4509_v10 = vld [vmem:[#allocation20 + $0x38] sm:$0xff] }
 0x70a   : >> { %v2546_v5 = vpack.c.b16 %v2533_v9, %v2532_v1 }
 0x70b   : >> { %2562 = vmatpush.bf16.msra.mxu1 %v2549_v61  ;;  %v7830_v61 = vld [vmem:[#allocation69_spill] sm:$0xff] }
 0x70c   : >> { %2520 = vmatpush.bf16.msrb.mxu3 %v2501_v46  ;;  %2612 = vmatpush.bf16.msra.mxu2 %v2589_v38  ;;  %v2483_v62 = vunpack.c.l.b16 %v7830_v61  ;;  %v2545_v46 = vpack.c.b16 %v2531_v14, %v2530_v30 }
 0x70e   : >> { %2422 = vadd.xlane.f32.xlu2 %v7218_v12  ;;  %v2499_v23 = vpack.c.b16 %v2484_v8, %v2483_v62 }
 0x70f   : >> { %2563 = vmatpush.bf16.msra.mxu1 %v2548_v15  ;;  %v7836_v15 = vld [vmem:[#allocation82_spill] sm:$0xff] }
 0x710   : >> { %2521 = vmatpush.bf16.msrb.mxu3 %v2500_v24  ;;  %v2528_v38 = vunpack.c.l.b16 %v7836_v15 }
 0x712   : >> { %v2544_v18 = vpack.c.b16 %v2529_v3, %v2528_v38 }
 0x713   : >> { %2564 = vmatpush.bf16.msra.mxu1 %v2547_v6 }
 0x714   : >> { %2522 = vmatpush.bf16.msrb.mxu3 %v2499_v23 }
 0x717   : >> { %2565 = vmatpush.bf16.msra.mxu1 %v2546_v5 }
 0x71b   : >> { %2566 = vmatpush.bf16.msra.mxu1 %v2545_v46 }
 0x71f   : >> { %2567 = vmatpush.bf16.msra.mxu1 %v2544_v18  ;;  %v7838_v18 = vld [vmem:[#allocation148_spill] sm:$0xff] }
 0x723   : >> { %2875 = vmatpush.bf16.msrb.mxu1 %v4509_v10  ;;  %v4186_v10 = vld [vmem:[#allocation19 + $0x48] sm:$0xf0] }
 0x771   : >> { %v2425_v34 = vpop.xlane.xlu2 %2424 }
 0x772   : >> { %4906 = vrcp.f32 %v2425_v34 }
 0x778   : >> { %v4907_v11 = vpop.eup %4906 }
 0x779   : >> { %v2433_v13 = vmul.f32 %v4907_v11, %v7210_v20  ;;  %v2421_v19 = vpop.xlane.xlu2 %2420 }
 0x77a   : >> { %4908 = vrcp.f32 %v2421_v19  ;;  %v4208_v19 = vld [vmem:[#allocation19 + $0x70] sm:$0xf] }
 0x77b   : >> { %v2437_v49 = vpack.c.bf16 %v2433_v13, %v2433_v13 }
 0x77d   : >> { %2613 = vmatmul.bf16.vlgmr.msra.gmra.mxu2 %v2437_v49  ;;  %v4501_v49 = vld [vmem:[#allocation19 + $0x74] sm:$0xf0] }
 0x780   : >> { %v4909_v24 = vpop.eup %4908 }
 0x781   : >> { %v2423_v6 = vpop.xlane.xlu2 %2422  ;;  %v2431_v61 = vmul.f32 %v4909_v24, %v7215_v4  ;;  %v4500_v24 = vld [vmem:[#allocation19 + $0x74] sm:$0xf] }
 0x782   : >> { %4910 = vrcp.f32 %v2423_v6  ;;  %v4209_v6 = vor.u32 %v4501_v49, %v4208_v19  ;;  %v4493_v19 = vld [vmem:[#allocation19 + $0x34] sm:$0xf0]  ;;  %v4492_v49 = vld [vmem:[#allocation19 + $0x34] sm:$0xf] }
 0x783   : >> { %v2435_v62 = vpack.c.bf16 %v2431_v61, %v2431_v61  ;;  %v4210_v61 = vld [vmem:[#allocation19 + $0x78] sm:$0xf0] }
 0x784   : >> { %2764 = vmatpush.bf16.msra.mxu3 %v4209_v6  ;;  %v4178_v6 = vld [vmem:[#allocation19 + $0x38] sm:$0xf0] }
 0x785   : >> { %2523 = vmatmul.bf16.vlgmr.msrb.gmra.mxu3 %v2435_v62  ;;  %v4213_v62 = vor.u32 %v4500_v24, %v4210_v61  ;;  %v4181_v61 = vor.u32 %v4492_v49, %v4178_v6 }
 0x787   : >> { %2777 = vmatpush.bf16.msra.mxu0 %v4213_v62  ;;  %v4504_v62 = vld [vmem:[#allocation20 + $0x10] sm:$0xff] }
 0x788   : >> { %v4911_v7 = vpop.eup %4910 }
 0x789   : >> { %v2432_v8 = vmul.f32 %v4911_v7, %v7218_v12  ;;  %v2479_v16 = vpop.f32.mrf.mxu2  ;;  %v4200_v7 = vld [vmem:[#allocation19 + $0x60] sm:$0xf] }
 0x78b   : >> { %v2436_v1 = vpack.c.bf16 %v2432_v8, %v2432_v8  ;;  %v4499_v8 = vld [vmem:[#allocation19 + $0x64] sm:$0xf0] }
 0x78d   : >> { %2568 = vmatmul.bf16.vlgmr.msra.gmra.mxu1 %v2436_v1  ;;  %v4201_v1 = vor.u32 %v4499_v8, %v4200_v7  ;;  %v4491_v7 = vld [vmem:[#allocation19 + $0x24] sm:$0xf0]  ;;  %v4490_v8 = vld [vmem:[#allocation19 + $0x24] sm:$0xf] }
 0x78f   : >> { %2765 = vmatpush.bf16.msra.mxu3 %v4201_v1  ;;  %v4170_v1 = vld [vmem:[#allocation19 + $0x28] sm:$0xf0] }
 0x791   : >> { %v2481_v39 = vpop.f32.mrf.mxu2 }
 0x792   : >> { %v4202_v39 = vld [vmem:[#allocation19 + $0x68] sm:$0xf0] }
 0x800   : >> { %v2614_v9 = vpop.f32.mrf.mxu2 }
 0x801   : >> { %2627 = vrot.lane.b32.xlu0 %v2614_v9, %s5616_s0 }
 0x808   : >> { %v2524_v20 = vpop.f32.mrf.mxu3  ;;  %v2616_v23 = vpop.f32.mrf.mxu2 }
 0x809   : >> { %2619 = vrot.lane.b32.xlu2 %v2524_v20, %s5617_s5  ;;  %v4507_v20 = vld [vmem:[#allocation20 + $0x28] sm:$0xff]  ;;  %v4192_v23 = vld [vmem:[#allocation19 + $0x50] sm:$0xf] }
 0x80a   : >> { %v2569_v5 = vpop.f32.mrf.mxu1 }
 0x80b   : >> { %2623 = vrot.lane.b32.xlu1 %v2569_v5, %s5615_s1  ;;  %v4497_v5 = vld [vmem:[#allocation19 + $0x54] sm:$0xf0] }
 0x810   : >> { %v2526_v4 = vpop.f32.mrf.mxu3 }
 0x811   : >> { %v4496_v4 = vld [vmem:[#allocation19 + $0x54] sm:$0xf] }
 0x812   : >> { %v2571_v21 = vpop.f32.mrf.mxu1 }
 0x813   : >> { %v4193_v21 = vor.u32 %v4497_v5, %v4192_v23  ;;  %v4489_v23 = vld [vmem:[#allocation19 + $0x14] sm:$0xf0]  ;;  %v4488_v5 = vld [vmem:[#allocation19 + $0x14] sm:$0xf] }
 0x815   : >> { %2766 = vmatpush.bf16.msra.mxu3 %v4193_v21  ;;  %v4162_v21 = vld [vmem:[#allocation19 + $0x18] sm:$0xf0] }
 0x863   : >> { %v2620_v30 = vpop.permute.xlu2 %2619 }
 0x864   : >> { %v2630_v12 = vsel %vm2155_vm8, %v2479_v16, %v2620_v30  ;;  %v4498_v16 = vld [vmem:[#allocation19 + $0x64] sm:$0xf]  ;;  %v4194_v30 = vld [vmem:[#allocation19 + $0x58] sm:$0xf0] }
 0x865   : >> { %v4205_v9 = vor.u32 %v4498_v16, %v4202_v39  ;;  %v4173_v39 = vor.u32 %v4490_v8, %v4170_v1 }
 0x867   : >> { %2778 = vmatpush.bf16.msra.mxu0 %v4205_v9  ;;  %v4503_v9 = vld [vmem:[#allocation20 + $0x8] sm:$0xff] }
 0x873   : >> { %v2628_v14 = vpop.permute.xlu0 %2627 }
 0x87d   : >> { %v2624_v17 = vpop.permute.xlu1 %2623 }
 0x87e   : >> { %v2632_v46 = vsel %vm2631_vm10, %v2630_v12, %v2624_v17  ;;  %v4197_v12 = vor.u32 %v4496_v4, %v4194_v30  ;;  %v4506_v17 = vld [vmem:[#allocation20 + $0x20] sm:$0xff] }
 0x87f   : >> { %v2634_v15 = vsel %vm2633_vm11, %v2632_v46, %v2628_v14  ;;  %v4184_v14 = vld [vmem:[#allocation19 + $0x40] sm:$0xf]  ;;  %v4495_v46 = vld [vmem:[#allocation19 + $0x44] sm:$0xf0] }
 0x880   : >> { %v2635_v38 = vadd.f32 %v5576_v27, %v2634_v15  ;;  %v4508_v27 = vld [vmem:[#allocation20 + $0x30] sm:$0xff]  ;;  %2779 = vmatpush.bf16.msra.mxu0 %v4197_v12  ;;  %v4494_v15 = vld [vmem:[#allocation19 + $0x44] sm:$0xf]  ;;  %v4152_v12 = vld [vmem:[#allocation19] sm:$0xf] }
 0x881   : >> { %2876 = vmatpush.bf16.msrb.mxu1 %v4508_v27  ;;  %v4168_v27 = vld [vmem:[#allocation19 + $0x20] sm:$0xf] }
 0x882   : >> { %2636 = vadd.xlane.f32.xlu2 %v2635_v38  ;;  %v4169_v16 = vor.u32 %v4491_v7, %v4168_v27  ;;  %v4502_v30 = vld [vmem:[#allocation20] sm:$0xff]  ;;  %v2656_v27 = vperm.slane %v6995_v56, 1 }
 0x885   : >> { %2877 = vmatpush.bf16.msrb.mxu1 %v4507_v20  ;;  %v4160_v20 = vld [vmem:[#allocation19 + $0x10] sm:$0xf] }
 0x886   : >> { %v4161_v4 = vor.u32 %v4489_v23, %v4160_v20 }
 0x889   : >> { %2878 = vmatpush.bf16.msrb.mxu1 %v4506_v17  ;;  %v4165_v17 = vor.u32 %v4488_v5, %v4162_v21  ;;  %v2678_v5 = vld [vmem:[%s7839_s4] sm:$0x3]  ;;  %s3654_s4 = sshll.u32 (%p1990_p13), %s1070_s13, 4  ;;  %s3655_s4 = int_to_ptr.vmem [resolvable:$true] %s3654_s4 }
 0x8f5   : >> { %v2637_v3 = vpop.xlane.xlu2 %2636 }
 0x8f6   : >> { %v2638_v34 = vmul.f32 %v2637_v3, %v7838_v18  ;;  %v4189_v3 = vor.u32 %v4494_v15, %v4186_v10  ;;  %v4154_v15 = vld [vmem:[#allocation19 + $0x8] sm:$0xf0] }
 0x8f8   : >> { %v7262_v11 = vsub.f32 %v2635_v38, %v2638_v34  ;;  %v4185_v38 = vor.u32 %v4495_v46, %v4184_v14  ;;  %v4505_v34 = vld [vmem:[#allocation20 + $0x18] sm:$0xff]  ;;  %2780 = vmatpush.bf16.msra.mxu0 %v4189_v3  ;;  %v4487_v14 = vld [vmem:[#allocation19 + $0x4] sm:$0xf0]  ;;  %v4486_v46 = vld [vmem:[#allocation19 + $0x4] sm:$0xf] }
 0x8f9   : >> { %2879 = vmatpush.bf16.msrb.mxu1 %v4505_v34  ;;  %v4157_v10 = vor.u32 %v4486_v46, %v4154_v15 }
 0x8fa   : >> { %v2640_v13 = vmul.f32 %v7262_v11, %v7262_v11  ;;  %2767 = vmatpush.bf16.msra.mxu3 %v4185_v38  ;;  %v4153_v38 = vor.u32 %v4487_v14, %v4152_v12 }
 0x8fc   : >> { %2641 = vadd.xlane.f32.xlu1 %v2640_v13  ;;  %v4176_v13 = vld [vmem:[#allocation19 + $0x30] sm:$0xf]  ;;  %2781 = vmatpush.bf16.msra.mxu0 %v4181_v61 }
 0x8fd   : >> { %v4177_v24 = vor.u32 %v4493_v19, %v4176_v13  ;;  %2880 = vmatpush.bf16.msrb.mxu1 %v4504_v62 }
 0x8ff   : >> { %2768 = vmatpush.bf16.msra.mxu3 %v4177_v24 }
 0x900   : >> { %2782 = vmatpush.bf16.msra.mxu0 %v4173_v39 }
 0x901   : >> { %2881 = vmatpush.bf16.msrb.mxu1 %v4503_v9 }
 0x903   : >> { %2769 = vmatpush.bf16.msra.mxu3 %v4169_v16  ;;  %v2658_v16 = vperm.slane %v7000_v2, 1 }
 0x904   : >> { %2783 = vmatpush.bf16.msra.mxu0 %v4165_v17 }
 0x905   : >> { %2882 = vmatpush.bf16.msrb.mxu1 %v4502_v30 }
 0x907   : >> { %2770 = vmatpush.bf16.msra.mxu3 %v4161_v4  ;;  %v2681_v4 = vperm.slane %v2678_v5, 1 }
 0x908   : >> { %2784 = vmatpush.bf16.msra.mxu0 %v4157_v10 }
 0x90b   : >> { %2771 = vmatpush.bf16.msra.mxu3 %v4153_v38  ;;  %v2680_v38 = vperm.slane %v2678_v5, 0 }
 0x96f   : >> { %v2642_v3 = vpop.xlane.xlu1 %2641 }
 0x970   : >> { %v2643_v34 = vmul.f32 %v2642_v3, %v7838_v18 }
 0x972   : >> { %v2644_v13 = vadd.f32 1e-05, %v2643_v34 }
 0x974   : >> { %4912 = vrsqrt.f32 %v2644_v13  ;;  %vm2651_vm13 = vweird.f32 %v2644_v13 }
 0x97a   : >> { %v4913_v19 = vpop.eup %4912 }
 0x97b   : >> { %v2646_v49 = vmul.f32 %v4913_v19, %v2644_v13  ;;  %vm2652_vm12 = vweird.f32 %v4913_v19 }
 0x97c   : >> { %vm2653_vm14 = vmor %vm2651_vm13, %vm2652_vm12 }
 0x97d   : >> { %v2647_v24 = vmul.f32 %v4913_v19, %v2646_v49 }
 0x97f   : >> { %v2648_v6 = vmul.f32 0.5, %v2647_v24 }
 0x981   : >> { %v2649_v61 = vsub.f32 1.5, %v2648_v6 }
 0x983   : >> { %v2650_v62 = vmul.f32 %v4913_v19, %v2649_v61 }
 0x985   : >> { %v2654_v7 = vsel %vm2653_vm14, %v4913_v19, %v2650_v62 }
 0x986   : >> { %v2655_v8 = vmul.f32 %v2654_v7, %v7262_v11  ;;  %v4893_v11 = vld [vmem:[%s7840_s20] ss:$0 sm:$0xff] }
 0x988   : >> { %v2657_v1 = vmul.f32 %v2656_v27, %v2655_v8 }
 0x98a   : >> { %v7270_v39 = vadd.f32 %v2658_v16, %v2657_v1 }
 0x98c   : >> { %v2822_v9 = vpack.c.bf16 %v7270_v39, %v7270_v39  ;;  %v2660_v20 = vadd.f32 %v7270_v39, %v6049_v0  ;;  %v4550_v0 = vld [vmem:[#allocation26] sm:$0xff] (%p1990_p13) }
 0x98e   : >> { %2883 = vmatmul.bf16.vlgmr.msrb.gmra.mxu1 %v2822_v9  ;;  %v2677_v23 = vpack.c.bf16 %v2660_v20, %v2660_v20 }
 0x990   : >> { %2772 = vmatmul.bf16.vlgmr.msra.gmra.mxu3 %v2677_v23  ;;  %2785 = vmatmul.bf16.vlgmr.msra.gmra.mxu0 %v2677_v23 }
 0xa0b   : >> { %v2884_v21 = vpop.f32.mrf.mxu1 }
 0xa0c   : >> { %v2885_v30 = vadd.f32 %v4893_v11, %v2884_v21 }
 0xa0d   : >> { %v2786_v12 = vpop.f32.mrf.mxu0 }
 0xa0e   : >> { %v7282_v17 = vpack.c.bf16 %v2885_v30, %v2885_v30  ;;  %v2787_v14 = vadd.f32 %v2786_v12, %v2681_v4 }
 0xa10   : >> { %v2798_v46 = vpack.c.bf16 %v2787_v14, %v2787_v14  ;;  %v3030_v15 = vsel %vm3028_vm15, %v7282_v17, 0 }
 0xa11   : >> { %3039 = vmatpush.bf16.msra.mxu1 %v3030_v15 }
 0xa12   : >> { %2800 = vrot.lane.b32.xlu0 %v2798_v46, %s5616_s0  ;;  %v2900_v10 = vsel %vm2155_vm8, %v2798_v46, 0 }
 0xa13   : >> { %v2773_v3 = vpop.f32.mrf.mxu3  ;;  %v2886_v34 = vpop.f32.mrf.mxu1  ;;  %2909 = vmatpush.bf16.xpose.msrb.mxu2 %v2900_v10 }
 0xa14   : >> { %v2774_v13 = vadd.f32 %v2773_v3, %v2680_v38 }
 0xa15   : >> { %v2788_v19 = vpop.f32.mrf.mxu0 }
 0xa16   : >> { %v2790_v49 = vpack.c.bf16 %v2774_v13, %v2774_v13 }
 0xa18   : >> { %2796 = vrot.lane.b32.xlu2 %v2790_v49, %s5617_s5 }
 0xa1a   : >> { %2802 = vrot.lane.b32.xlu0 %v2798_v46, %s5615_s1  ;;  %4246 = vmatmul.msk.bf16.vlgmr.msrb.gmra.mxu2 %vm2155_vm8, %v2790_v49 }
 0xa1b   : >> { %v2775_v24 = vpop.f32.mrf.mxu3 }
 0xa22   : >> { %2792 = vrot.lane.b32.xlu0 %v2790_v49, %s5616_s0 }
 0xa2a   : >> { %2804 = vrot.lane.b32.xlu0 %v2798_v46, %s5617_s5 }
 0xa32   : >> { %2794 = vrot.lane.b32.xlu0 %v2790_v49, %s5615_s1 }
 0xa72   : >> { %v2797_v23 = vpop.permute.xlu2 %2796 }
 0xa84   : >> { %v2801_v6 = vpop.permute.xlu0 %2800 }
 0xa85   : >> { %v2919_v61 = vsel %vm2155_vm8, %v2801_v6, 0 }
 0xa86   : >> { %2928 = vmatpush.bf16.xpose.msrb.mxu3 %v2919_v61 }
 0xa8c   : >> { %v2803_v62 = vpop.permute.xlu0 %2802 }
 0xa8d   : >> { %v2938_v27 = vsel %vm2155_vm8, %v2803_v62, 0 }
 0xa8e   : >> { %2947 = vmatpush.bf16.xpose.msra.mxu2 %v2938_v27 }
 0xa94   : >> { %v2793_v7 = vpop.permute.xlu0 %2792 }
 0xa95   : >> { %4247 = vmatmul.msk.bf16.vlgmr.msrb.gmra.mxu3 %vm2155_vm8, %v2793_v7 }
 0xa9c   : >> { %v2805_v8 = vpop.permute.xlu0 %2804 }
 0xa9d   : >> { %v2957_v16 = vsel %vm2155_vm8, %v2805_v8, 0  ;;  %v2911_v1 = vpop.f32.mrf.mxu2 }
 0xa9e   : >> { %v2972_v9 = vmul.f32 0.17677669, %v2911_v1  ;;  %2966 = vmatpush.bf16.xpose.msra.mxu3 %v2957_v16 }
 0xaa0   : >> { %v2977_v20 = vsel %vm2976_vm0, %v2972_v9, -inf }
 0xaa1   : >> { %2978 = vmax.xlane.f32.xlu1 %v2977_v20 }
 0xaa4   : >> { %v2795_v5 = vpop.permute.xlu0 %2794 }
 0xaa5   : >> { %v2913_v11 = vpop.f32.mrf.mxu2  ;;  %4248 = vmatmul.msk.bf16.vlgmr.msra.gmra.mxu2 %vm2155_vm8, %v2795_v5  ;;  %4249 = vmatmul.msk.bf16.vlgmr.msra.gmra.mxu3 %vm2155_vm8, %v2797_v23 }
 0xb14   : >> { %v2979_v4 = vpop.xlane.xlu1 %2978 }
 0xb15   : >> { %v2989_v21 = vsub.f32 %v2972_v9, %v2979_v4 }
 0xb17   : >> { %v2993_v30 = vmul.f32 1.442695, %v2989_v21 }
 0xb18   : >> { %v2930_v12 = vpop.f32.mrf.mxu3 }
 0xb19   : >> { %4914 = vpow2.f32 %v2993_v30  ;;  %v2973_v14 = vmul.f32 0.17677669, %v2930_v12 }
 0xb1b   : >> { %v2980_v46 = vsel %vm2976_vm0, %v2973_v14, -inf }
 0xb1c   : >> { %2981 = vmax.xlane.f32.xlu1 %v2980_v46 }
 0xb1f   : >> { %v4915_v15 = vpop.eup %4914 }
 0xb20   : >> { %v2932_v38 = vpop.f32.mrf.mxu3  ;;  %v3001_v10 = vsel %vm2976_vm0, %v4915_v15, 0.0 }
 0xb21   : >> { %3002 = vadd.xlane.f32.xlu2 %v3001_v10 }
 0xb28   : >> { %v2949_v3 = vpop.f32.mrf.mxu2  ;;  %v2968_v34 = vpop.f32.mrf.mxu3 }
 0xb29   : >> { %v2974_v13 = vmul.f32 0.17677669, %v2949_v3  ;;  %v2975_v19 = vmul.f32 0.17677669, %v2968_v34 }
 0xb2b   : >> { %v2986_v49 = vsel %vm2976_vm0, %v2975_v19, -inf  ;;  %v2983_v24 = vsel %vm2976_vm0, %v2974_v13, -inf }
 0xb2c   : >> { %2987 = vmax.xlane.f32.xlu1 %v2986_v49  ;;  %2984 = vmax.xlane.f32.xlu0 %v2983_v24 }
 0xb30   : >> { %v2951_v6 = vpop.f32.mrf.mxu2  ;;  %v2970_v61 = vpop.f32.mrf.mxu3 }
 0xb39   : >> { %2890 = vrot.lane.b32.xlu2 %v7282_v17, %s5616_s0 }
 0xb40   : >> { %2892 = vrot.lane.b32.xlu0 %v7282_v17, %s5615_s1 }
 0xb8f   : >> { %v2982_v20 = vpop.xlane.xlu1 %2981 }
 0xb90   : >> { %v2990_v11 = vsub.f32 %v2973_v14, %v2982_v20 }
 0xb92   : >> { %v2995_v4 = vmul.f32 1.442695, %v2990_v11 }
 0xb94   : >> { %v3003_v62 = vpop.xlane.xlu2 %3002 }
 0xb95   : >> { %4916 = vrcp.f32 %v3003_v62 }
 0xb9b   : >> { %v4917_v27 = vpop.eup %4916 }
 0xb9c   : >> { %v3017_v7 = vmul.f32 %v4917_v27, %v4915_v15  ;;  %v2891_v8 = vpop.permute.xlu2 %2890 }
 0xb9d   : >> { %v3049_v16 = vsel %vm3028_vm15, %v2891_v8, 0 }
 0xb9e   : >> { %v3021_v1 = vpack.c.bf16 %v3017_v7, %v3017_v7  ;;  %3058 = vmatpush.bf16.msrb.mxu1 %v3049_v16 }
 0xb9f   : >> { %v2985_v9 = vpop.xlane.xlu0 %2984  ;;  %v2988_v21 = vpop.xlane.xlu1 %2987 }
 0xba0   : >> { %v2991_v23 = vsub.f32 %v2974_v13, %v2985_v9  ;;  %4250 = vmatmul.msk.bf16.vlgmr.msra.gmra.mxu1 %vm2976_vm0, %v3021_v1  ;;  %v2992_v12 = vsub.f32 %v2975_v19, %v2988_v21 }
 0xba2   : >> { %v2997_v5 = vmul.f32 1.442695, %v2991_v23  ;;  %v2999_v15 = vmul.f32 1.442695, %v2992_v12 }
 0xba4   : >> { %4918 = vpow2.f32 %v2997_v5 }
 0xba5   : >> { %4920 = vpow2.f32 %v2995_v4 }
 0xba6   : >> { %4922 = vpow2.f32 %v2999_v15  ;;  %v4517_v15 = vld [vmem:[#allocation22 + $0x38] sm:$0xff] }
 0xba7   : >> { %3186 = vmatpush.bf16.msrb.mxu0 %v4517_v15 }
 0xbaa   : >> { %v4919_v30 = vpop.eup %4918 }
 0xbab   : >> { %v3007_v46 = vsel %vm2976_vm0, %v4919_v30, 0.0  ;;  %v4921_v38 = vpop.eup %4920 }
 0xbac   : >> { %3008 = vadd.xlane.f32.xlu1 %v3007_v46  ;;  %v3004_v34 = vsel %vm2976_vm0, %v4921_v38, 0.0  ;;  %v4923_v14 = vpop.eup %4922 }
 0xbad   : >> { %v3010_v13 = vsel %vm2976_vm0, %v4923_v14, 0.0 }
 0xbb2   : >> { %v2893_v10 = vpop.permute.xlu0 %2892 }
 0xbb3   : >> { %v3068_v3 = vsel %vm3028_vm15, %v2893_v10, 0  ;;  %v4515_v10 = vld [vmem:[#allocation22 + $0x28] sm:$0xff] }
 0xbb4   : >> { %3077 = vmatpush.bf16.msrb.mxu2 %v3068_v3  ;;  %3005 = vadd.xlane.f32.xlu1 %v3004_v34  ;;  %v4514_v3 = vld [vmem:[#allocation22 + $0x20] sm:$0xff]  ;;  %v4513_v34 = vld [vmem:[#allocation22 + $0x18] sm:$0xff] }
 0xbbc   : >> { %3011 = vadd.xlane.f32.xlu1 %v3010_v13  ;;  %v4511_v13 = vld [vmem:[#allocation22 + $0x8] sm:$0xff] }
 0xbd5   : >> { %2894 = vrot.lane.b32.xlu1 %v7282_v17, %s5617_s5 }
 0xc1d   : >> { %v3041_v19 = vpop.f32.mrf.mxu1 }
 0xc1f   : >> { %v3009_v49 = vpop.xlane.xlu1 %3008 }
 0xc20   : >> { %4924 = vrcp.f32 %v3009_v49  ;;  %v4510_v49 = vld [vmem:[#allocation22] sm:$0xff] }
 0xc25   : >> { %v3043_v24 = vpop.f32.mrf.mxu1 }
 0xc26   : >> { %v4925_v6 = vpop.eup %4924 }
 0xc27   : >> { %v3019_v61 = vmul.f32 %v4925_v6, %v4919_v30  ;;  %v3006_v62 = vpop.xlane.xlu1 %3005 }
 0xc28   : >> { %4926 = vrcp.f32 %v3006_v62 }
 0xc29   : >> { %v3023_v27 = vpack.c.bf16 %v3019_v61, %v3019_v61 }
 0xc2b   : >> { %4252 = vmatmul.msk.bf16.vlgmr.msrb.gmra.mxu2 %vm2976_vm0, %v3023_v27 }
 0xc2e   : >> { %v4927_v7 = vpop.eup %4926 }
 0xc2f   : >> { %v3018_v8 = vmul.f32 %v4927_v7, %v4921_v38  ;;  %v3012_v1 = vpop.xlane.xlu1 %3011  ;;  %v4516_v38 = vld [vmem:[#allocation22 + $0x30] sm:$0xff] }
 0xc30   : >> { %4928 = vrcp.f32 %v3012_v1  ;;  %3187 = vmatpush.bf16.msrb.mxu0 %v4516_v38  ;;  %v4531_v38 = vld [vmem:[#allocation23 + $0x64] sm:$0xf0] }
 0xc31   : >> { %v3022_v16 = vpack.c.bf16 %v3018_v8, %v3018_v8 }
 0xc33   : >> { %4251 = vmatmul.msk.bf16.vlgmr.msrb.gmra.mxu1 %vm2976_vm0, %v3022_v16  ;;  %v4894_v16 = vld [vmem:[%s7841_s6] ss:$0 sm:$0xff] }
 0xc34   : >> { %3188 = vmatpush.bf16.msrb.mxu0 %v4515_v10  ;;  %v4530_v10 = vld [vmem:[#allocation23 + $0x64] sm:$0xf] }
 0xc36   : >> { %v4929_v9 = vpop.eup %4928 }
 0xc37   : >> { %v3020_v17 = vmul.f32 %v4929_v9, %v4923_v14  ;;  %v4512_v14 = vld [vmem:[#allocation22 + $0x10] sm:$0xff] }
 0xc38   : >> { %3189 = vmatpush.bf16.msrb.mxu0 %v4514_v3 }
 0xc39   : >> { %v3024_v5 = vpack.c.bf16 %v3020_v17, %v3020_v17 }
 0xc3c   : >> { %3190 = vmatpush.bf16.msrb.mxu0 %v4513_v34  ;;  %v4338_v34 = vld [vmem:[#allocation23 + $0x68] sm:$0xf0] }
 0xc40   : >> { %3191 = vmatpush.bf16.msrb.mxu0 %v4512_v14  ;;  %v4341_v14 = vor.u32 %v4530_v10, %v4338_v34  ;;  %v4521_v10 = vld [vmem:[#allocation23 + $0x14] sm:$0xf0] }
 0xc44   : >> { %3192 = vmatpush.bf16.msrb.mxu0 %v4511_v13  ;;  %v4328_v13 = vld [vmem:[#allocation23 + $0x50] sm:$0xf] }
 0xc47   : >> { %v2895_v20 = vpop.permute.xlu1 %2894 }
 0xc48   : >> { %v3087_v23 = vsel %vm3028_vm15, %v2895_v20, 0  ;;  %3193 = vmatpush.bf16.msrb.mxu0 %v4510_v49  ;;  %v4529_v49 = vld [vmem:[#allocation23 + $0x54] sm:$0xf0] }
 0xc49   : >> { %3096 = vmatpush.bf16.msrb.mxu3 %v3087_v23  ;;  %v4344_v23 = vld [vmem:[#allocation23 + $0x70] sm:$0xf] }
 0xc4c   : >> { %4253 = vmatmul.msk.bf16.vlgmr.msrb.gmra.mxu3 %vm2976_vm0, %v3024_v5  ;;  %v4533_v5 = vld [vmem:[#allocation23 + $0x74] sm:$0xf0] }
 0xcae   : >> { %v3079_v11 = vpop.f32.mrf.mxu2 }
 0xcb0   : >> { %v3060_v4 = vpop.f32.mrf.mxu1 }
 0xcb1   : >> { %3103 = vrot.lane.b32.xlu0 %v3060_v4, %s5617_s5  ;;  %v4346_v4 = vld [vmem:[#allocation23 + $0x78] sm:$0xf0]  ;;  %s7847_s5 = sld [smem:[#allocation188_spill]] (%p1990_p13) }
 0xcb6   : >> { %v3081_v21 = vpop.f32.mrf.mxu2 }
 0xcb7   : > { %s7848_s7 = smov (%p1990_p13), %s7847_s5  ;;  %s3652_s30 = scalar_lea.hbm (%p1990_p13), %s7847_s5, %s4448_s17 }
 0xcb8   : >> { %v3062_v30 = vpop.f32.mrf.mxu1  ;;  %s3656_s3 = sshll.u32 (%p1990_p13), %s3652_s30, 4  ;;  %s5438_s19 = scalar_lea.hbm (%p1990_p13), %s7848_s7, 16  ;;  %s3657_s3 = int_to_ptr.hbm [resolvable:$true] %s3656_s3 }
 0xcb9   : >> { %3107 = vrot.lane.b32.xlu0 %v3079_v11, %s5615_s1  ;;  %v4345_v11 = vor.u32 %v4533_v5, %v4344_v23  ;;  %v4524_v23 = vld [vmem:[#allocation23 + $0x34] sm:$0xf]  ;;  %s5432_s20 = sshra.s32 (%p1990_p13), %s3657_s3, 4  ;;  %s5433_s20 = int_to_ptr.hbm [resolvable:$true] %s5432_s20 }
 0xcba   : > { %s5434_s27 = scalar_lea.hbm (%p1990_p13), %s5433_s20, 8  ;;  %p5439_p1 = scmp.lt.s32.totalorder (%p1990_p13), %s5433_s20, %s7848_s7 }
 0xcbb   : >> { %3327 = vmatpush.bf16.msra.mxu1 %v4345_v11  ;;  %p5435_p0 = scmp.ne.s32.totalorder (%p1990_p13), %s5433_s20, %s5434_s27  ;;  %p5440_p6 = scmp.lt.s32.totalorder (%p1990_p13), %s5438_s19, %s5434_s27 }
 0xcbd   : > { %p5436_p2 = pnand (%p1990_p13), %p5435_p0, %p5853_p5  ;;  %p5441_p8 = por (%p1990_p13), %p5440_p6, %p5439_p1 }
 0xcbf   : > { %p5437_p12 = pneg (%p1990_p13), %p5436_p2 }
 0xcc1   : > { %p5442_p10 = pnand (%p1990_p13), %p5441_p8, %p5437_p12 }
 0xccf   : >> { %v3098_v12 = vpop.f32.mrf.mxu3 }
 0xcd0   : >> { %3111 = vrot.lane.b32.xlu1 %v3098_v12, %s5616_s0 }
 0xcd7   : >> { %v3100_v46 = vpop.f32.mrf.mxu3 }
 0xd23   : >> { %v3104_v24 = vpop.permute.xlu0 %3103 }
 0xd24   : >> { %v3114_v61 = vsel %vm2155_vm8, %v3041_v19, %v3104_v24  ;;  %v4532_v19 = vld [vmem:[#allocation23 + $0x74] sm:$0xf] }
 0xd25   : >> { %v4349_v21 = vor.u32 %v4532_v19, %v4346_v4  ;;  %v4528_v24 = vld [vmem:[#allocation23 + $0x54] sm:$0xf]  ;;  %v4314_v19 = vld [vmem:[#allocation23 + $0x38] sm:$0xf0]  ;;  %v4304_v4 = vld [vmem:[#allocation23 + $0x20] sm:$0xf] }
 0xd26   : >> { %v4317_v11 = vor.u32 %v4524_v23, %v4314_v19 }
 0xd27   : >> { %3340 = vmatpush.bf16.msra.mxu2 %v4349_v21  ;;  %v4523_v21 = vld [vmem:[#allocation23 + $0x24] sm:$0xf0] }
 0xd2b   : >> { %v3108_v6 = vpop.permute.xlu0 %3107  ;;  %3341 = vmatpush.bf16.msra.mxu2 %v4341_v14  ;;  %v4298_v14 = vld [vmem:[#allocation23 + $0x18] sm:$0xf0] }
 0xd2c   : >> { %v3115_v62 = vsel %vm2631_vm10, %v3114_v61, %v3108_v6  ;;  %v4329_v6 = vor.u32 %v4529_v49, %v4328_v13  ;;  %v4330_v61 = vld [vmem:[#allocation23 + $0x58] sm:$0xf0]  ;;  %v4288_v49 = vld [vmem:[#allocation23] sm:$0xf] }
 0xd42   : >> { %v3112_v27 = vpop.permute.xlu1 %3111 }
 0xd43   : >> { %v3116_v7 = vsel %vm2633_vm11, %v3115_v62, %v3112_v27  ;;  %v4333_v62 = vor.u32 %v4528_v24, %v4330_v61  ;;  %v4320_v27 = vld [vmem:[#allocation23 + $0x40] sm:$0xf]  ;;  %v4519_v24 = vld [vmem:[#allocation23 + $0x4] sm:$0xf0] }
 0xd44   : >> { %v3133_v8 = vpack.c.bf16 %v3116_v7, %v3116_v7  ;;  %v4527_v7 = vld [vmem:[#allocation23 + $0x44] sm:$0xf0]  ;;  %v4289_v61 = vor.u32 %v4519_v24, %v4288_v49  ;;  %v4546_v49 = vld [vmem:[#allocation25 + $0x60] sm:$0xff]  ;;  %v4536_v24 = vld [vmem:[#allocation25 + $0x10] sm:$0xff] }
 0xd45   : >> { %3342 = vmatpush.bf16.msra.mxu2 %v4333_v62  ;;  %v4290_v62 = vld [vmem:[#allocation23 + $0x8] sm:$0xf0] }
 0xd46   : >> { %3194 = vmatmul.bf16.vlgmr.msrb.gmra.mxu0 %v3133_v8  ;;  %v4526_v8 = vld [vmem:[#allocation23 + $0x44] sm:$0xf] }
 0xdc3   : >> { %v3195_v1 = vpop.f32.mrf.mxu0 }
 0xdc4   : >> { %v3196_v9 = vadd.f32 %v4894_v16, %v3195_v1  ;;  %v4321_v16 = vor.u32 %v4527_v7, %v4320_v27  ;;  %v4322_v1 = vld [vmem:[#allocation23 + $0x48] sm:$0xf0]  ;;  %v4541_v7 = vld [vmem:[#allocation25 + $0x38] sm:$0xff] }
 0xdc5   : >> { %3505 = vmatpush.bf16.msra.mxu3 %v4541_v7  ;;  %v4543_v7 = vld [vmem:[#allocation25 + $0x48] sm:$0xff] }
 0xdc6   : >> { %v3199_v17 = vadd.f32 %v3196_v9, %v7270_v39  ;;  %v4336_v39 = vld [vmem:[#allocation23 + $0x60] sm:$0xf]  ;;  %v4325_v9 = vor.u32 %v4526_v8, %v4322_v1  ;;  %v4540_v1 = vld [vmem:[#allocation25 + $0x30] sm:$0xff] }
 0xdc7   : >> { %v4337_v3 = vor.u32 %v4531_v38, %v4336_v39  ;;  %v4296_v38 = vld [vmem:[#allocation23 + $0x10] sm:$0xf] }
 0xdc8   : >> { %3200 = vadd.xlane.f32.xlu0 %v3199_v17  ;;  %3343 = vmatpush.bf16.msra.mxu2 %v4325_v9  ;;  %v4297_v34 = vor.u32 %v4521_v10, %v4296_v38  ;;  %v4549_v10 = vld [vmem:[#allocation25 + $0x78] sm:$0xff] }
 0xdc9   : >> { %3328 = vmatpush.bf16.msra.mxu1 %v4337_v3  ;;  %v4520_v3 = vld [vmem:[#allocation23 + $0x14] sm:$0xf]  ;;  %3506 = vmatpush.bf16.msra.mxu3 %v4540_v1 }
 0xdca   : >> { %v4301_v13 = vor.u32 %v4520_v3, %v4298_v14  ;;  %3518 = vmatpush.bf16.msra.mxu0 %v4549_v10  ;;  %v4539_v3 = vld [vmem:[#allocation25 + $0x28] sm:$0xff]  ;;  %v4538_v14 = vld [vmem:[#allocation25 + $0x20] sm:$0xff] }
 0xdcb   : >> { %v3197_v20 = vpop.f32.mrf.mxu0 }
 0xdcc   : >> { %v4525_v20 = vld [vmem:[#allocation23 + $0x34] sm:$0xf0]  ;;  %3344 = vmatpush.bf16.msra.mxu2 %v4317_v11 }
 0xdcd   : >> { %3329 = vmatpush.bf16.msra.mxu1 %v4329_v6  ;;  %v4518_v6 = vld [vmem:[#allocation23 + $0x4] sm:$0xf]  ;;  %3507 = vmatpush.bf16.msra.mxu3 %v4539_v3 }
 0xdce   : >> { %v4293_v27 = vor.u32 %v4518_v6, %v4290_v62  ;;  %v4545_v6 = vld [vmem:[#allocation25 + $0x58] sm:$0xff]  ;;  %v4544_v62 = vld [vmem:[#allocation25 + $0x50] sm:$0xff] }
 0xdd1   : >> { %3330 = vmatpush.bf16.msra.mxu1 %v4321_v16  ;;  %3508 = vmatpush.bf16.msra.mxu3 %v4538_v14 }
 0xe3b   : >> { %v3201_v30 = vpop.xlane.xlu0 %3200 }
 0xe3c   : >> { %v3202_v12 = vmul.f32 %v3201_v30, %v7838_v18  ;;  %v4522_v30 = vld [vmem:[#allocation23 + $0x24] sm:$0xf] }
 0xe3e   : >> { %v7332_v46 = vsub.f32 %v3199_v17, %v3202_v12  ;;  %v4312_v17 = vld [vmem:[#allocation23 + $0x30] sm:$0xf]  ;;  %v4305_v12 = vor.u32 %v4523_v21, %v4304_v4  ;;  %v3220_v4 = vperm.slane %v6995_v56, 2 }
 0xe3f   : >> { %v4313_v5 = vor.u32 %v4525_v20, %v4312_v17 }
 0xe40   : >> { %v3204_v15 = vmul.f32 %v7332_v46, %v7332_v46 }
 0xe41   : >> { %3331 = vmatpush.bf16.msra.mxu1 %v4313_v5 }
 0xe42   : >> { %3205 = vadd.xlane.f32.xlu1 %v3204_v15  ;;  %v4306_v15 = vld [vmem:[#allocation23 + $0x28] sm:$0xf0] }
 0xe43   : >> { %v4309_v39 = vor.u32 %v4522_v30, %v4306_v15 }
 0xe45   : >> { %3332 = vmatpush.bf16.msra.mxu1 %v4305_v12  ;;  %3345 = vmatpush.bf16.msra.mxu2 %v4309_v39  ;;  %v3222_v12 = vperm.slane %v7000_v2, 2 }
 0xe49   : >> { %3333 = vmatpush.bf16.msra.mxu1 %v4297_v34  ;;  %3346 = vmatpush.bf16.msra.mxu2 %v4301_v13  ;;  %v4548_v34 = vld [vmem:[#allocation25 + $0x70] sm:$0xff]  ;;  %v4547_v13 = vld [vmem:[#allocation25 + $0x68] sm:$0xff] }
 0xe4a   : >> { %3519 = vmatpush.bf16.msra.mxu0 %v4548_v34 }
 0xe4d   : >> { %3334 = vmatpush.bf16.msra.mxu1 %v4289_v61  ;;  %3347 = vmatpush.bf16.msra.mxu2 %v4293_v27  ;;  %v4535_v61 = vld [vmem:[#allocation25 + $0x8] sm:$0xff]  ;;  %v4534_v27 = vld [vmem:[#allocation25] sm:$0xff] }
 0xe4e   : >> { %3520 = vmatpush.bf16.msra.mxu0 %v4547_v13 }
 0xe52   : >> { %3521 = vmatpush.bf16.msra.mxu0 %v4546_v49 }
 0xe56   : >> { %3522 = vmatpush.bf16.msra.mxu0 %v4545_v6 }
 0xe5a   : >> { %3523 = vmatpush.bf16.msra.mxu0 %v4544_v62 }
 0xe5e   : >> { %3524 = vmatpush.bf16.msra.mxu0 %v4543_v7 }
 0xeb5   : >> { %v3206_v8 = vpop.xlane.xlu1 %3205 }
 0xeb6   : >> { %v3207_v16 = vmul.f32 %v3206_v8, %v7838_v18  ;;  %v3241_v8 = vld [vmem:[%s7842_s16] sm:$0x3] }
 0xeb7   : >> { %v3243_v1 = vperm.slane %v3241_v8, 0 }
 0xeb8   : >> { %v3208_v9 = vadd.f32 1e-05, %v3207_v16  ;;  %v4542_v16 = vld [vmem:[#allocation25 + $0x40] sm:$0xff] }
 0xeb9   : >> { %3525 = vmatpush.bf16.msra.mxu0 %v4542_v16  ;;  %v4895_v16 = vld [vmem:[%s7843_s23] ss:$0 sm:$0xff] }
 0xeba   : >> { %4930 = vrsqrt.f32 %v3208_v9  ;;  %vm3215_vm2 = vweird.f32 %v3208_v9 }
 0xec0   : >> { %v4931_v17 = vpop.eup %4930 }
 0xec1   : >> { %v3210_v20 = vmul.f32 %v4931_v17, %v3208_v9  ;;  %vm3216_vm1 = vweird.f32 %v4931_v17 }
 0xec2   : >> { %vm3217_vm3 = vmor %vm3215_vm2, %vm3216_vm1 }
 0xec3   : >> { %v3211_v23 = vmul.f32 %v4931_v17, %v3210_v20 }
 0xec5   : >> { %v3212_v5 = vmul.f32 0.5, %v3211_v23  ;;  %v3244_v23 = vperm.slane %v3241_v8, 1 }
 0xec7   : >> { %v3213_v19 = vsub.f32 1.5, %v3212_v5 }
 0xec9   : >> { %v3214_v11 = vmul.f32 %v4931_v17, %v3213_v19 }
 0xecb   : >> { %v3218_v21 = vsel %vm3217_vm3, %v4931_v17, %v3214_v11 }
 0xecc   : >> { %v3219_v30 = vmul.f32 %v3218_v21, %v7332_v46  ;;  %v4537_v46 = vld [vmem:[#allocation25 + $0x18] sm:$0xff] }
 0xecd   : >> { %3509 = vmatpush.bf16.msra.mxu3 %v4537_v46 }
 0xece   : >> { %v3221_v15 = vmul.f32 %v3220_v4, %v3219_v30 }
 0xed0   : >> { %v7340_v39 = vadd.f32 %v3222_v12, %v3221_v15 }
 0xed1   : >> { %3510 = vmatpush.bf16.msra.mxu3 %v4536_v24 }
 0xed2   : >> { %v3240_v38 = vpack.c.bf16 %v7340_v39, %v7340_v39 }
 0xed4   : >> { %3335 = vmatmul.bf16.vlgmr.msra.gmra.mxu1 %v3240_v38  ;;  %3348 = vmatmul.bf16.vlgmr.msra.gmra.mxu2 %v3240_v38 }
 0xed5   : >> { %3511 = vmatpush.bf16.msra.mxu3 %v4535_v61 }
 0xed9   : >> { %3512 = vmatpush.bf16.msra.mxu3 %v4534_v27 }
 0xf51   : >> { %v3336_v9 = vpop.f32.mrf.mxu1 }
 0xf52   : >> { %v3337_v17 = vadd.f32 %v3336_v9, %v3243_v1 }
 0xf54   : >> { %v3355_v20 = vmul.f32 0.044715, %v3337_v17  ;;  %v3353_v46 = vmul.f32 0.5, %v3337_v17 }
 0xf56   : >> { %v3357_v5 = vmul.f32 %v3355_v20, %v3337_v17 }
 0xf57   : >> { %v3349_v19 = vpop.f32.mrf.mxu2 }
 0xf58   : >> { %v3359_v11 = vmul.f32 %v3357_v5, %v3337_v17  ;;  %v3350_v4 = vadd.f32 %v3349_v19, %v3244_v23 }
 0xf59   : >> { %v3338_v21 = vpop.f32.mrf.mxu1 }
 0xf5a   : >> { %v3356_v30 = vmul.f32 0.044715, %v3350_v4  ;;  %v3361_v12 = vadd.f32 %v3359_v11, %v3337_v17  ;;  %v3354_v62 = vmul.f32 0.5, %v3350_v4 }
 0xf5c   : >> { %v3358_v15 = vmul.f32 %v3356_v30, %v3350_v4  ;;  %v3363_v38 = vmul.f32 0.7978846, %v3361_v12 }
 0xf5e   : >> { %v3360_v10 = vmul.f32 %v3358_v15, %v3350_v4  ;;  %4932 = vtanh.f32 %v3363_v38 }
 0xf5f   : >> { %v3351_v3 = vpop.f32.mrf.mxu2 }
 0xf60   : >> { %v3362_v34 = vadd.f32 %v3360_v10, %v3350_v4 }
 0xf62   : >> { %v3364_v14 = vmul.f32 0.7978846, %v3362_v34 }
 0xf64   : >> { %v4933_v13 = vpop.eup %4932  ;;  %4934 = vtanh.f32 %v3364_v14 }
 0xf65   : >> { %v3367_v49 = vadd.f32 1.0, %v4933_v13 }
 0xf67   : >> { %v3369_v24 = vmul.f32 %v3367_v49, %v3353_v46  ;;  %v3552_v46 = vperm.slane %v6995_v56, 3 }
 0xf69   : >> { %v3403_v6 = vpack.c.bf16 %v3369_v24, %v3369_v24  ;;  %v3554_v24 = vperm.slane %v7000_v2, 3 }
 0xf6a   : >> { %v4935_v61 = vpop.eup %4934 }
 0xf6b   : >> { %3513 = vmatmul.bf16.vlgmr.msra.gmra.mxu3 %v3403_v6  ;;  %v3368_v27 = vadd.f32 1.0, %v4935_v61 }
 0xf6d   : >> { %v3370_v7 = vmul.f32 %v3368_v27, %v3354_v62 }
 0xf6f   : >> { %v3404_v8 = vpack.c.bf16 %v3370_v7, %v3370_v7  ;;  %v4556_v7 = vld [vmem:[#allocation26 + $0x30] sm:$0xff] (%p1990_p13) }
 0xf71   : >> { %3526 = vmatmul.bf16.vlgmr.msra.gmra.mxu0 %v3404_v8  ;;  %v4555_v8 = vld [vmem:[#allocation26 + $0x28] sm:$0xff] (%p1990_p13) }
 0xfee   : >> { %v3514_v1 = vpop.f32.mrf.mxu3  ;;  %v3527_v9 = vpop.f32.mrf.mxu0 }
 0xfef   : >> { %v3515_v20 = vadd.f32 %v4895_v16, %v3514_v1  ;;  %v4554_v16 = vld [vmem:[#allocation26 + $0x20] sm:$0xff] (%p1990_p13)  ;;  %v4553_v1 = vld [vmem:[#allocation26 + $0x18] sm:$0xff] (%p1990_p13) }
 0xff1   : >> { %v3528_v23 = vadd.f32 %v3527_v9, %v3515_v20  ;;  %v4552_v9 = vld [vmem:[#allocation26 + $0x10] sm:$0xff] (%p1990_p13)  ;;  %v4551_v20 = vld [vmem:[#allocation26 + $0x8] sm:$0xff] (%p1990_p13) }
 0xff3   : >> { %v3531_v17 = vadd.f32 %v3528_v23, %v7340_v39 }
 0xff5   : >> { %3532 = vadd.xlane.f32.xlu2 %v3531_v17 }
 0xff6   : >> { %v3516_v5 = vpop.f32.mrf.mxu3  ;;  %v3529_v19 = vpop.f32.mrf.mxu0 }
0x1068   : >> { %v3533_v11 = vpop.xlane.xlu2 %3532 }
0x1069   : >> { %v3534_v4 = vmul.f32 %v3533_v11, %v7838_v18 }
0x106b   : >> { %v3535_v21 = vsub.f32 %v3531_v17, %v3534_v4 }
0x106d   : >> { %v3536_v30 = vmul.f32 %v3535_v21, %v3535_v21 }
0x106f   : >> { %3537 = vadd.xlane.f32.xlu0 %v3536_v30 }
0x10e2   : >> { %v3538_v12 = vpop.xlane.xlu0 %3537 }
0x10e3   : >> { %v3539_v15 = vmul.f32 %v3538_v12, %v7838_v18 }
0x10e5   : >> { %v3540_v38 = vadd.f32 1e-05, %v3539_v15 }
0x10e7   : >> { %4936 = vrsqrt.f32 %v3540_v38  ;;  %vm3547_vm5 = vweird.f32 %v3540_v38 }
0x10ed   : >> { %v4937_v10 = vpop.eup %4936 }
0x10ee   : >> { %v3542_v3 = vmul.f32 %v4937_v10, %v3540_v38  ;;  %vm3548_vm4 = vweird.f32 %v4937_v10 }
0x10ef   : >> { %vm3549_vm6 = vmor %vm3547_vm5, %vm3548_vm4 }
0x10f0   : >> { %v3543_v34 = vmul.f32 %v4937_v10, %v3542_v3 }
0x10f2   : >> { %v3544_v14 = vmul.f32 0.5, %v3543_v34 }
0x10f4   : >> { %v3545_v13 = vsub.f32 1.5, %v3544_v14 }
0x10f6   : >> { %v3546_v39 = vmul.f32 %v4937_v10, %v3545_v13 }
0x10f8   : >> { %v3550_v49 = vsel %vm3549_vm6, %v4937_v10, %v3546_v39 }
0x10f9   : >> { %v3551_v6 = vmul.f32 %v3550_v49, %v3535_v21 }
0x10fb   : >> { %v3553_v61 = vmul.f32 %v3552_v46, %v3551_v6  ;;  %1992 = sbr.rel (!%p1990_p13) target bundleno = 857 (0x359), region = 284 }
0x10fd   : >> { %v3555_v62 = vadd.f32 %v3554_v24, %v3553_v61  }
0x10ff   : >> { %v7844_v27 = vmov %v3555_v62  ;;  %3634 = vst [vmem:[%s1070_s13] sm:$0xff] (%p1990_p13), %v3555_v62  ;;  %v3572_v43 = vpack.c.bf16 (%p1990_p13), %v3555_v62, %v3555_v62 }
0x1100   : > { %v4557_v27 = vld [vmem:[#allocation26 + $0x38] sm:$0xff] }
0x1101   : > { %3621 = vmatpush.bf16.msra.mxu0 %v4557_v27 }
0x1105   : > { %3622 = vmatpush.bf16.msra.mxu0 %v4556_v7 }
0x1109   : > { %3623 = vmatpush.bf16.msra.mxu0 %v4555_v8 }
0x110d   : > { %3624 = vmatpush.bf16.msra.mxu0 %v4554_v16 }
0x1111   : > { %3625 = vmatpush.bf16.msra.mxu0 %v4553_v1 }
0x1115   : > { %3626 = vmatpush.bf16.msra.mxu0 %v4552_v9 }
0x1119   : > { %3627 = vmatpush.bf16.msra.mxu0 %v4551_v20 }
0x111d   : > { %3628 = vmatpush.bf16.msra.mxu0 %v4550_v0 }
0x1120   : > { %3629 = vmatmul.bf16.vlgmr.msra.gmra.mxu0 %v3572_v43 }
0x1121   : > { %5445 = shalt.err (!%p5442_p10)
}
0x1122   : > { %4669 = dma.vmem_to_hbm [thread:$0]  (%p5853_p5), %s3655_s4, 128, %s3657_s3, %s3637_s10  }
0x1123   : > { %s7849_s11 = sld [smem:[#allocation189_spill]]  ;;  %s3668_s25 = sshll.u32 %s1077_s15, 4  ;;  %s3669_s25 = int_to_ptr.vmem [resolvable:$true] %s3668_s25 }
0x1124   : > { %s3642_s0 = scalar_lea.sflag [#allocation30], %s5995_s21 }
0x1129   : > { %s3666_s23 = scalar_lea.hbm %s7849_s11, %s4448_s17  ;;  %s5466_s17 = scalar_lea.hbm %s7849_s11, 16 }
0x112a   : > { %s3670_s1 = sshll.u32 %s3666_s23, 4  ;;  %s3671_s1 = int_to_ptr.hbm [resolvable:$true] %s3670_s1 }
0x112b   : > { %s5460_s5 = sshra.s32 %s3671_s1, 4  ;;  %s5461_s5 = int_to_ptr.hbm [resolvable:$true] %s5460_s5 }
0x112c   : > { %s5462_s30 = scalar_lea.hbm %s5461_s5, 8  ;;  %p5467_p9 = scmp.lt.s32.totalorder %s5461_s5, %s7849_s11 }
0x112d   : > { %p5463_p11 = scmp.ne.s32.totalorder %s5461_s5, %s5462_s30  ;;  %p5468_p13 = scmp.lt.s32.totalorder %s5466_s17, %s5462_s30 }
0x112f   : > { %p5464_p3 = pnand %p5463_p11, %p5853_p5  ;;  %p5469_p0 = por %p5468_p13, %p5467_p9 }
0x1131   : > { %p5465_p7 = pneg %p5464_p3 }
0x1133   : > { %p5470_p2 = pnand %p5469_p0, %p5465_p7 }
0x119d   : > { %v3630_v29 = vpop.f32.mrf.mxu0 }
0x119e   : > { %3635 = vst [vmem:[%s1077_s15] sm:$0xff] %v3630_v29 }
0x119f   : > { %5473 = shalt.err (!%p5470_p2)
}
0x11a0   : > { %4670 = dma.vmem_to_hbm [thread:$0]  (%p5853_p5), %s3669_s25, 128, %s3671_s1, %s3642_s0  }
0x11a5   : > { %v3632_v55 = vpop.f32.mrf.mxu0 }
0x11a6 PF: > { %s7850_s21 = sld [smem:[#allocation43_spill]]  ;;  %p7852_p12 = scmp.ge.s32.totalorder %s5572_s28, 2 }
0x11a8   : > { %p4724_p1 = pnand %p7852_p12, %p5857_p4 }
0x11aa   : > { %p4725_p6 = pneg %p4724_p1 }
0x11ac   : > { %s3682_s15 = sand.u32 1, %s7850_s21  }
0x11ad   : > { %s3683_s27 = scalar_lea.sflag [#allocation4], %s3682_s15 }
0x11ae   : > { %5551 = dma.done.wait (%p4725_p6), %s3683_s27, 128  }
0x11af   : > { %5553 = vsyncadd (%p4725_p6), %s3683_s27, 4294967168  ;;  %s3693_s2 = scalar_lea.sflag [#allocation30], %s3682_s15 }
0x11b0   : > { %5555 = dma.done.wait (%p4725_p6), %s3693_s2, 128  }
0x11b1   : > { %5557 = vsyncadd (%p4725_p6), %s3693_s2, 4294967168  ;;  %s7853_s28 = sld [smem:[#allocation46_spill]]  ;;  %s7856_s5 = smov %s5564_s26 }
0x11b2   : > { %s7854_s18 = sld [smem:[#allocation44_spill]] }
0x11b3   : > { %s7855_s27 = sld [smem:[#allocation47_spill]] }
0x11b7   : > { %p53_p5 = scmp.ge.s32.totalorder %s7853_s28, 4  }
0x11b8   : > { %s7857_s26 = smov %s7854_s18 }
0x11b9   :  { %55 = sbr.rel (!%p53_p5) target bundleno = 42 (0x2a), region = 295 }
0x11be   :  { %3699 = vsyncpa [#allocation3], 1 }
0x11bf   :  { %3701 = vsyncpa [#allocation3 + $0x1], 1 }
0x11c0   :  { %3702 = vsyncpa [#allocation6], 1 }
0x11c1   :  { %3704 = vsyncpa [#allocation6 + $0x1], 1 }
0x11c2   :  { %3705 = vsyncpa [#allocation9], 1 }
0x11c3   :  { %3707 = vsyncpa [#allocation9 + $0x1], 1 }
0x11c4   :  { %3708 = vsyncpa [#allocation12], 1 }
0x11c5   :  { %3709 = vsyncpa [#allocation15], 1 }
0x11c6   :  { %3710 = vsyncpa [#allocation18], 1 }
0x11c7   :  { %3711 = vsyncpa [#allocation21], 1 }
0x11c8   :  { %3712 = vsyncpa [#allocation24], 1 }
0x11c9   :  { %3713 = vsyncpa [#allocation27], 1 }
0x11ca   :  { %3714 = vsyncpa [#allocation4], 1 }
0x11cb   :  { %3716 = vsyncpa [#allocation4 + $0x1], 1 }
0x11cc   :  { %3717 = vsyncpa [#allocation30], 1 }
0x11cd   :  { %3719 = vsyncpa [#allocation30 + $0x1], 1 }

</bundles_post_ra>
